<compile_context>
chip_gen: v7x
topology: tpu7x:2x2x1
jax: 0.10.0
libtpu: 0.0.40
codegen_flags: <defaults>
</compile_context>

<pallas_src>
import functools

import jax
import jax.numpy as jnp
from jax import lax
from jax.experimental import pallas as pl
from jax.experimental.pallas import tpu as pltpu


_HEAD_DIM = 4


# ----------------------------------------------------------------------------
# Elementwise helpers (run inside the kernel)
# ----------------------------------------------------------------------------
def _erf_approx(x):
    # Abramowitz & Stegun 7.1.26, max abs error ~1.5e-7 (f32-accurate).
    a1, a2, a3, a4, a5 = (0.254829592, -0.284496736, 1.421413741,
                          -1.453152027, 1.061405429)
    p = 0.3275911
    s = jnp.where(x >= 0.0, 1.0, -1.0)
    z = jnp.abs(x)
    t = 1.0 / (1.0 + p * z)
    poly = ((((a5 * t + a4) * t + a3) * t + a2) * t + a1) * t
    return s * (1.0 - poly * jnp.exp(-z * z))


def _gelu_exact(x):
    return 0.5 * x * (1.0 + _erf_approx(x * 0.7071067811865476))


# ----------------------------------------------------------------------------
# Fused MBFD kernel: 3x3 Conv (x1) + MRLA (x2) + GA / residual / BN (x3)
# All values are channels-on-sublane / flat-spatial-on-lane: (C, H*W).
# ----------------------------------------------------------------------------
def mbfd_kernel(*refs, dl, c12, K, Nh, num_heads, head_dim, scale, with_ga):
    if with_ga:
        (pat1_ref, pat2_ref, x3_ref,
         wconv_ref, wprim_ref, bprim_ref, wcheap_ref, bcheap_ref, cmask_ref,
         winit_ref, binit_ref, whatt_ref, wvatt_ref, bbn_ref,
         pool_ref, ups_ref, mh_ref, mv_ref,
         wqkv_ref, wproj_ref, ns_ref, nb_ref, out_ref) = refs
    else:
        (pat1_ref, pat2_ref,
         wconv_ref, wprim_ref, bprim_ref, wcheap_ref, bcheap_ref, cmask_ref,
         winit_ref, binit_ref, whatt_ref, wvatt_ref, bbn_ref,
         pool_ref, ups_ref, mh_ref, mv_ref, out_ref) = refs

    f32 = jnp.float32
    pat1 = pat1_ref[0]                                       # (9*dl, N)
    pat2 = pat2_ref[0]                                       # (9*dl, N)
    N = pat1.shape[-1]

    # ---- branch 1: dense 3x3 conv on x1 == one MXU matmul over im2col taps --
    conv_out = jnp.dot(wconv_ref[...], pat1,
                       preferred_element_type=f32)           # (dl, N)

    # ---- branch 2: MRLA on x2 ----
    # primary_conv (1x1 conv + folded BN + GELU) evaluated on every 3x3-shifted
    # window of x2.  Because the 1x1 conv and GELU are pointwise, tap t equals
    # the t-shifted `prim` (zeroed outside the image via cmask), which is
    # exactly what cheap_operation's depthwise 3x3 needs.
    wp = wprim_ref[...]                                      # (c12, dl)
    bp = bprim_ref[...]                                      # (c12, 1)
    acc = jnp.zeros((c12, N), f32)
    prim = None
    for t in range(9):
        pt = _gelu_exact(jnp.dot(wp, pat2[t * dl:(t + 1) * dl, :],
                                 preferred_element_type=f32) + bp)  # (c12, N)
        if t == 4:                                           # centre tap
            prim = pt                                        # == primary_conv(x2)
        acc = acc + wcheap_ref[:, t:t + 1] * (pt * cmask_ref[t:t + 1, :])
    cheap = _gelu_exact(acc + bcheap_ref[...])               # (c12, N)

    # gate: init(avg_pool2d(x2, 2, 2)); H_att + V_att depthwise (folded BN);
    # sigmoid; 2x nearest upsample.  Pool / upsample / per-tap shifts are
    # constant linear operators -> matmuls against wrapper-built matrices.
    x2 = pat2[4 * dl:5 * dl, :]                              # (dl, N) centre tap
    pooled = jnp.dot(x2, pool_ref[...], preferred_element_type=f32)    # (dl, Nh)
    x_tem = jnp.dot(winit_ref[...], pooled,
                    preferred_element_type=f32) + binit_ref[...]       # (dl, Nh)
    att = jnp.zeros((dl, Nh), f32)
    for k in range(K):
        sh_k = jnp.dot(x_tem, mh_ref[k * Nh:(k + 1) * Nh, :],
                       preferred_element_type=f32)           # row shift k-padk
        sv_k = jnp.dot(x_tem, mv_ref[k * Nh:(k + 1) * Nh, :],
                       preferred_element_type=f32)           # col shift k-padk
        att = att + whatt_ref[:, k:k + 1] * sh_k + wvatt_ref[:, k:k + 1] * sv_k
    gate_half = jax.nn.sigmoid(att + bbn_ref[...])                     # (dl, Nh)
    gate = jnp.dot(gate_half, ups_ref[...], preferred_element_type=f32)  # (dl, N)
    mrla_out = jnp.concatenate([prim, cheap], axis=0) * gate           # (dl, N)

    # ---- branch 3: GA self-attention + residual + folded BN (stage > 2) ----
    if with_ga:
        x3 = x3_ref[0]                                                 # (du, N)
        ad = num_heads * head_dim
        qkv = jnp.dot(wqkv_ref[...], x3, preferred_element_type=f32)   # (3*ad, N)
        ctxs = []
        for h in range(num_heads):
            q = qkv[h * head_dim:(h + 1) * head_dim, :]
            kk = qkv[ad + h * head_dim:ad + (h + 1) * head_dim, :]
            v = qkv[2 * ad + h * head_dim:2 * ad + (h + 1) * head_dim, :]
            # s[n, m] = <q_n, k_m> * scale
            s = lax.dot_general(q, kk, (((0,), (0,)), ((), ())),
                                preferred_element_type=f32) * scale    # (N, N)
            s = s - jnp.max(s, axis=1, keepdims=True)
            p = jnp.exp(s)
            p = p * pl.reciprocal(jnp.sum(p, axis=1, keepdims=True),
                                  approx=True)
            # ctx[d, n] = sum_m p[n, m] * v[d, m]
            ctxs.append(lax.dot_general(v, p, (((1,), (1,)), ((), ())),
                                        preferred_element_type=f32))   # (hd, N)
        # TODO(synk): flash-style key tiling for large H*W (v7x 64 MiB VMEM).
        ctx = jnp.concatenate(ctxs, axis=0)                            # (ad, N)
        y3 = jnp.dot(wproj_ref[...], ctx, preferred_element_type=f32)  # (du, N)
        out3 = ns_ref[...] * (x3 + y3) + nb_ref[...]
        out_ref[0] = jnp.concatenate([conv_out, mrla_out, out3], axis=0)
    else:
        out_ref[0] = jnp.concatenate([conv_out, mrla_out], axis=0)


# ----------------------------------------------------------------------------
# Wrapper (layout plumbing only; all arithmetic stays in the kernel)
# ----------------------------------------------------------------------------
def _im2col_3x3(x_flat, H, W):
    """(B, C, H*W) -> (B, 9*C, H*W) zero-padded 3x3 im2col patches.

    Tap ordering is (dy, dx) row-major over the 3x3 window, channel-minor:
    patch row (dy*3 + dx)*C + c holds x[c, h+dy-1, w+dx-1] (0 outside)."""
    B, C, _ = x_flat.shape
    xs = x_flat.reshape(B, C, H, W)
    xp = jnp.pad(xs, ((0, 0), (0, 0), (1, 1), (1, 1)))
    taps = [xp[:, :, dy:dy + H, dx:dx + W]
            for dy in range(3) for dx in range(3)]
    return jnp.concatenate(taps, axis=1).reshape(B, 9 * C, H * W)


def mbfd_forward(x_nchw, params, *, dim, stage, att_kernel):
    B, C, H, W = x_nchw.shape
    assert C == dim and H % 2 == 0 and W % 2 == 0 and att_kernel % 2 == 1
    dl = dim // 4
    du = dim - 2 * dl
    c12 = dl // 2
    assert 2 * c12 == dl, "MBFD requires dim // 4 to be even"
    K = att_kernel
    Hh, Wh = H // 2, W // 2
    N, Nh = H * W, Hh * Wh
    padk = K // 2
    with_ga = stage > 2

    xf = x_nchw.astype(jnp.float32).reshape(B, C, N)
    x1 = xf[:, :dl]
    x2 = xf[:, dl:2 * dl]
    x3 = xf[:, 2 * dl:]

    # ---------------- layout plumbing / constant operator matrices ----------
    pat1 = _im2col_3x3(x1, H, W)                       # (B, 9*dl, N)
    pat2 = _im2col_3x3(x2, H, W)                       # (B, 9*dl, N)

    hh = jnp.arange(N) // W
    ww = jnp.arange(N) % W
    # border-validity masks for the 9 taps of the depthwise 3x3 (cheap op)
    cmask = jnp.stack(
        [((hh + dy >= 0) & (hh + dy < H) & (ww + dx >= 0) & (ww + dx < W))
         for dy in (-1, 0, 1) for dx in (-1, 0, 1)], axis=0
    ).astype(jnp.float32)                              # (9, N)
    # 2x2 average-pool / 2x nearest-upsample as constant linear operators
    cell = (hh // 2) * Wh + (ww // 2)
    pcells = jnp.arange(Nh)
    pool_m = 0.25 * (cell[:, None] == pcells[None, :]).astype(jnp.float32)  # (N, Nh)
    ups_m = (pcells[:, None] == cell[None, :]).astype(jnp.float32)          # (Nh, N)
    # per-tap row / column shift operators for H_att / V_att on the half grid
    prow, pcol = pcells // Wh, pcells % Wh
    mh_list, mv_list = [], []
    for k in range(K):
        d = k - padk
        okh = (prow + d >= 0) & (prow + d < Hh)
        mh_list.append(((pcells[:, None] == (pcells + d * Wh)[None, :]) &
                        okh[None, :]).astype(jnp.float32))
        okv = (pcol + d >= 0) & (pcol + d < Wh)
        mv_list.append(((pcells[:, None] == (pcells + d)[None, :]) &
                        okv[None, :]).astype(jnp.float32))
    mh = jnp.concatenate(mh_list, axis=0)              # (K*Nh, Nh)
    mv = jnp.concatenate(mv_list, axis=0)              # (K*Nh, Nh)

    # ---------------- pallas_call -------------------------------------------
    if with_ga:
        num_heads = max(du // _HEAD_DIM, 1)
        head_dim = _HEAD_DIM
        scale = float(head_dim) ** -0.5
    else:
        num_heads, head_dim, scale = 1, 1, 1.0

    kernel = functools.partial(
        mbfd_kernel, dl=dl, c12=c12, K=K, Nh=Nh, num_heads=num_heads,
        head_dim=head_dim, scale=scale, with_ga=with_ga)

    def per_batch(arr):
        return pl.BlockSpec((1,) + arr.shape[1:],
                            lambda b, _n=arr.ndim - 1: (b,) + (0,) * _n)

    def full(arr):
        return pl.BlockSpec(arr.shape, lambda b, _n=arr.ndim: (0,) * _n)

    weights = [params["w_conv"], params["w_prim"], params["b_prim"],
               params["w_cheap"], params["b_cheap"], cmask,
               params["w_init"], params["b_init"],
               params["w_hatt"], params["w_vatt"], params["b_bn"],
               pool_m, ups_m, mh, mv]
    if with_ga:
        ga_weights = [params["w_qkv"], params["w_proj"],
                      params["norm_scale"], params["norm_bias"]]
        operands = [pat1, pat2, x3] + weights + ga_weights
        in_specs = ([per_batch(pat1), per_batch(pat2), per_batch(x3)] +
                    [full(w) for w in weights] +
                    [full(w) for w in ga_weights])
        out_ch = dim
    else:
        operands = [pat1, pat2] + weights
        in_specs = ([per_batch(pat1), per_batch(pat2)] +
                    [full(w) for w in weights])
        out_ch = 2 * dl

    out = pl.pallas_call(
        kernel,
        out_shape=jax.ShapeDtypeStruct((B, out_ch, N), jnp.float32),
        grid_spec=pltpu.PrefetchScalarGridSpec(
            num_scalar_prefetch=0,
            grid=(B,),
            in_specs=in_specs,
            out_specs=pl.BlockSpec((1, out_ch, N), lambda b: (b, 0, 0)),
        ),
        compiler_params=pltpu.CompilerParams(
            dimension_semantics=("parallel",)),
    )(*operands)

    if with_ga:
        y = out                                        # (B, dim, N)
    else:
        y = jnp.concatenate([out, x3], axis=1)         # x3 untouched at stage<=2
    return y.reshape(B, dim, H, W)                     # NCHW


# ----------------------------------------------------------------------------
# Deterministic synthetic parameters (inference-mode BN folded to scale/bias)
# ----------------------------------------------------------------------------
def init_params(key, dim, stage, att_kernel):
    dl = dim // 4
    du = dim - 2 * dl
    c12 = dl // 2
    K = att_kernel
    eps = 1e-5
    keys = iter(jax.random.split(key, 32))

    def nrm(shape, s=0.2):
        return jax.random.normal(next(keys), shape, jnp.float32) * s

    def bn(c):
        gamma = 1.0 + 0.1 * jax.random.normal(next(keys), (c,), jnp.float32)
        beta = 0.1 * jax.random.normal(next(keys), (c,), jnp.float32)
        mean = 0.1 * jax.random.normal(next(keys), (c,), jnp.float32)
        var = jnp.abs(jax.random.normal(next(keys), (c,), jnp.float32)) * 0.5 + 0.5
        scale = gamma / jnp.sqrt(var + eps)
        bias = beta - mean * scale
        return scale, bias

    params = {}
    # MBFD.Conv: dense 3x3 (dl -> dl), stored transposed for out = W @ patches:
    #   w_conv[co, (dy*3+dx)*dl + ci] == torch_weight[co, ci, dy, dx]
    params["w_conv"] = nrm((dl, 9 * dl))
    # MRLA.primary_conv: 1x1 (dl -> c12), BN scale folded row-wise
    s, b = bn(c12)
    params["w_prim"] = nrm((c12, dl)) * s[:, None]
    params["b_prim"] = b.reshape(c12, 1)
    # MRLA.cheap_operation: depthwise 3x3 on c12, BN folded;
    #   w_cheap[c, dy*3+dx] == torch_weight[c, 0, dy, dx] * bn_scale[c]
    s, b = bn(c12)
    params["w_cheap"] = nrm((c12, 9)) * s[:, None]
    params["b_cheap"] = b.reshape(c12, 1)
    # MRLA.init: 1x1 (dl -> dl), BN folded
    s, b = bn(dl)
    params["w_init"] = nrm((dl, dl)) * s[:, None]
    params["b_init"] = b.reshape(dl, 1)
    # MRLA H_att (K,1) / V_att (1,K) depthwise; shared post-sum BN scale folded
    s, b = bn(dl)
    params["w_hatt"] = nrm((dl, K)) * s[:, None]
    params["w_vatt"] = nrm((dl, K)) * s[:, None]
    params["b_bn"] = b.reshape(dl, 1)
    if stage > 2:
        num_heads = max(du // _HEAD_DIM, 1)
        ad = num_heads * _HEAD_DIM
        params["w_qkv"] = nrm((3 * ad, du))    # torch Linear weight layout (out, in)
        params["w_proj"] = nrm((du, ad))
        s, b = bn(du)
        params["norm_scale"] = s.reshape(du, 1)
        params["norm_bias"] = b.reshape(du, 1)
    return params


if __name__ == "__main__":
    dim, stage, att_kernel = 16, 3, 3
    B, H, W = 2, 16, 16

    key = jax.random.PRNGKey(0)
    kx, kp = jax.random.split(key)
    x = jax.random.normal(kx, (B, dim, H, W), jnp.float32)
    params = init_params(kp, dim, stage, att_kernel)

    fwd = jax.jit(functools.partial(mbfd_forward, dim=dim, stage=stage,
                                    att_kernel=att_kernel))
    y = jax.block_until_ready(fwd(x, params))

    assert y.shape == (B, dim, H, W), y.shape
    assert bool(jnp.all(jnp.isfinite(y)))
    print("KERNEL_OK")
</pallas_src>

<mosaic_0001>
module attributes {stable_mosaic.version = 11 : i64} {
  func.func @mbfd_kernel(%arg0: i32, %arg1: memref<1x36x256xf32, #tpu.memory_space<vmem>>, %arg2: memref<1x36x256xf32, #tpu.memory_space<vmem>>, %arg3: memref<1x8x256xf32, #tpu.memory_space<vmem>>, %arg4: memref<4x36xf32, #tpu.memory_space<vmem>>, %arg5: memref<2x4xf32, #tpu.memory_space<vmem>>, %arg6: memref<2x1xf32, #tpu.memory_space<vmem>>, %arg7: memref<2x9xf32, #tpu.memory_space<vmem>>, %arg8: memref<2x1xf32, #tpu.memory_space<vmem>>, %arg9: memref<9x256xf32, #tpu.memory_space<vmem>>, %arg10: memref<4x4xf32, #tpu.memory_space<vmem>>, %arg11: memref<4x1xf32, #tpu.memory_space<vmem>>, %arg12: memref<4x3xf32, #tpu.memory_space<vmem>>, %arg13: memref<4x3xf32, #tpu.memory_space<vmem>>, %arg14: memref<4x1xf32, #tpu.memory_space<vmem>>, %arg15: memref<256x64xf32, #tpu.memory_space<vmem>>, %arg16: memref<64x256xf32, #tpu.memory_space<vmem>>, %arg17: memref<192x64xf32, #tpu.memory_space<vmem>>, %arg18: memref<192x64xf32, #tpu.memory_space<vmem>>, %arg19: memref<24x8xf32, #tpu.memory_space<vmem>>, %arg20: memref<8x8xf32, #tpu.memory_space<vmem>>, %arg21: memref<8x1xf32, #tpu.memory_space<vmem>>, %arg22: memref<8x1xf32, #tpu.memory_space<vmem>>, %arg23: memref<1x16x256xf32, #tpu.memory_space<vmem>>) attributes {dimension_semantics = [#tpu.dimension_semantics<parallel>], iteration_bounds = array<i64: 2>, scalar_prefetch = 0 : i64, scratch_operands = 0 : i64, tpu.core_type = #tpu.core_type<tc>, window_params = [{transform_indices = @transform_0, window_bounds = array<i64: 1, 36, 256>}, {transform_indices = @transform_1, window_bounds = array<i64: 1, 36, 256>}, {transform_indices = @transform_2, window_bounds = array<i64: 1, 8, 256>}, {pipeline_mode = #tpu.pipeline_mode<synchronous>, transform_indices = @transform_3, window_bounds = array<i64: 4, 36>}, {pipeline_mode = #tpu.pipeline_mode<synchronous>, transform_indices = @transform_4, window_bounds = array<i64: 2, 4>}, {pipeline_mode = #tpu.pipeline_mode<synchronous>, transform_indices = @transform_5, window_bounds = array<i64: 2, 1>}, {pipeline_mode = #tpu.pipeline_mode<synchronous>, transform_indices = @transform_6, window_bounds = array<i64: 2, 9>}, {pipeline_mode = #tpu.pipeline_mode<synchronous>, transform_indices = @transform_7, window_bounds = array<i64: 2, 1>}, {pipeline_mode = #tpu.pipeline_mode<synchronous>, transform_indices = @transform_8, window_bounds = array<i64: 9, 256>}, {pipeline_mode = #tpu.pipeline_mode<synchronous>, transform_indices = @transform_9, window_bounds = array<i64: 4, 4>}, {pipeline_mode = #tpu.pipeline_mode<synchronous>, transform_indices = @transform_10, window_bounds = array<i64: 4, 1>}, {pipeline_mode = #tpu.pipeline_mode<synchronous>, transform_indices = @transform_11, window_bounds = array<i64: 4, 3>}, {pipeline_mode = #tpu.pipeline_mode<synchronous>, transform_indices = @transform_12, window_bounds = array<i64: 4, 3>}, {pipeline_mode = #tpu.pipeline_mode<synchronous>, transform_indices = @transform_13, window_bounds = array<i64: 4, 1>}, {pipeline_mode = #tpu.pipeline_mode<synchronous>, transform_indices = @transform_14, window_bounds = array<i64: 256, 64>}, {pipeline_mode = #tpu.pipeline_mode<synchronous>, transform_indices = @transform_15, window_bounds = array<i64: 64, 256>}, {pipeline_mode = #tpu.pipeline_mode<synchronous>, transform_indices = @transform_16, window_bounds = array<i64: 192, 64>}, {pipeline_mode = #tpu.pipeline_mode<synchronous>, transform_indices = @transform_17, window_bounds = array<i64: 192, 64>}, {pipeline_mode = #tpu.pipeline_mode<synchronous>, transform_indices = @transform_18, window_bounds = array<i64: 24, 8>}, {pipeline_mode = #tpu.pipeline_mode<synchronous>, transform_indices = @transform_19, window_bounds = array<i64: 8, 8>}, {pipeline_mode = #tpu.pipeline_mode<synchronous>, transform_indices = @transform_20, window_bounds = array<i64: 8, 1>}, {pipeline_mode = #tpu.pipeline_mode<synchronous>, transform_indices = @transform_21, window_bounds = array<i64: 8, 1>}, {transform_indices = @transform_22, window_bounds = array<i64: 1, 16, 256>}]} {
    %c0 = arith.constant 0 : index
    %c0_0 = arith.constant 0 : index
    %c0_1 = arith.constant 0 : index
    %0 = vector.load %arg1[%c0, %c0_0, %c0_1] : memref<1x36x256xf32, #tpu.memory_space<vmem>>, vector<1x36x256xf32>
    %1 = vector.shape_cast %0 : vector<1x36x256xf32> to vector<36x256xf32>
    %c0_2 = arith.constant 0 : index
    %c0_3 = arith.constant 0 : index
    %c0_4 = arith.constant 0 : index
    %2 = vector.load %arg2[%c0_2, %c0_3, %c0_4] : memref<1x36x256xf32, #tpu.memory_space<vmem>>, vector<1x36x256xf32>
    %3 = vector.shape_cast %2 : vector<1x36x256xf32> to vector<36x256xf32>
    %c0_5 = arith.constant 0 : index
    %c0_6 = arith.constant 0 : index
    %4 = vector.load %arg4[%c0_5, %c0_6] : memref<4x36xf32, #tpu.memory_space<vmem>>, vector<4x36xf32>
    %cst = arith.constant dense<0.000000e+00> : vector<4x256xf32>
    %5 = tpu.matmul %4, %1, %cst {dimension_numbers = #tpu.dot_dimension_numbers<[1], [0], [0], [1], [0, 0, 1, 1], [], []>} : vector<4x36xf32>, vector<36x256xf32>, vector<4x256xf32> -> vector<4x256xf32>
    %c0_7 = arith.constant 0 : index
    %c0_8 = arith.constant 0 : index
    %6 = vector.load %arg5[%c0_7, %c0_8] : memref<2x4xf32, #tpu.memory_space<vmem>>, vector<2x4xf32>
    %c0_9 = arith.constant 0 : index
    %c0_10 = arith.constant 0 : index
    %7 = vector.load %arg6[%c0_9, %c0_10] : memref<2x1xf32, #tpu.memory_space<vmem>>, vector<2x1xf32>
    %cst_11 = arith.constant 0.000000e+00 : f32
    %8 = vector.broadcast %cst_11 : f32 to vector<2x256xf32>
    %9 = vector.extract_strided_slice %3 {offsets = [0, 0], sizes = [4, 256], strides = [1, 1]} : vector<36x256xf32> to vector<4x256xf32>
    %cst_12 = arith.constant dense<0.000000e+00> : vector<2x256xf32>
    %10 = tpu.matmul %6, %9, %cst_12 {dimension_numbers = #tpu.dot_dimension_numbers<[1], [0], [0], [1], [0, 0, 1, 1], [], []>} : vector<2x4xf32>, vector<4x256xf32>, vector<2x256xf32> -> vector<2x256xf32>
    %11 = vector.broadcast %7 : vector<2x1xf32> to vector<2x256xf32>
    %12 = arith.addf %10, %11 : vector<2x256xf32>
    %cst_13 = arith.constant 5.000000e-01 : f32
    %13 = vector.broadcast %cst_13 : f32 to vector<2x256xf32>
    %14 = arith.mulf %13, %12 : vector<2x256xf32>
    %cst_14 = arith.constant 0.707106769 : f32
    %15 = vector.broadcast %cst_14 : f32 to vector<2x256xf32>
    %16 = arith.mulf %12, %15 : vector<2x256xf32>
    %cst_15 = arith.constant 0.000000e+00 : f32
    %17 = vector.broadcast %cst_15 : f32 to vector<2x256xf32>
    %18 = arith.cmpf oge, %16, %17 : vector<2x256xf32>
    %cst_16 = arith.constant 1.000000e+00 : f32
    %cst_17 = arith.constant -1.000000e+00 : f32
    %19 = vector.broadcast %cst_16 : f32 to vector<2x256xf32>
    %20 = vector.broadcast %cst_17 : f32 to vector<2x256xf32>
    %21 = arith.select %18, %19, %20 : vector<2x256xi1>, vector<2x256xf32>
    %22 = math.absf %16 : vector<2x256xf32>
    %cst_18 = arith.constant 0.327591091 : f32
    %23 = vector.broadcast %cst_18 : f32 to vector<2x256xf32>
    %24 = arith.mulf %23, %22 : vector<2x256xf32>
    %cst_19 = arith.constant 1.000000e+00 : f32
    %25 = vector.broadcast %cst_19 : f32 to vector<2x256xf32>
    %26 = arith.addf %25, %24 : vector<2x256xf32>
    %cst_20 = arith.constant 1.000000e+00 : f32
    %27 = vector.broadcast %cst_20 : f32 to vector<2x256xf32>
    %28 = arith.divf %27, %26 : vector<2x256xf32>
    %cst_21 = arith.constant 1.06140542 : f32
    %29 = vector.broadcast %cst_21 : f32 to vector<2x256xf32>
    %30 = arith.mulf %29, %28 : vector<2x256xf32>
    %cst_22 = arith.constant -1.45315206 : f32
    %31 = vector.broadcast %cst_22 : f32 to vector<2x256xf32>
    %32 = arith.addf %30, %31 : vector<2x256xf32>
    %33 = arith.mulf %32, %28 : vector<2x256xf32>
    %cst_23 = arith.constant 1.42141378 : f32
    %34 = vector.broadcast %cst_23 : f32 to vector<2x256xf32>
    %35 = arith.addf %33, %34 : vector<2x256xf32>
    %36 = arith.mulf %35, %28 : vector<2x256xf32>
    %cst_24 = arith.constant -0.284496725 : f32
    %37 = vector.broadcast %cst_24 : f32 to vector<2x256xf32>
    %38 = arith.addf %36, %37 : vector<2x256xf32>
    %39 = arith.mulf %38, %28 : vector<2x256xf32>
    %cst_25 = arith.constant 0.254829586 : f32
    %40 = vector.broadcast %cst_25 : f32 to vector<2x256xf32>
    %41 = arith.addf %39, %40 : vector<2x256xf32>
    %42 = arith.mulf %41, %28 : vector<2x256xf32>
    %cst_26 = arith.constant 0.000000e+00 : f32
    %43 = vector.broadcast %cst_26 : f32 to vector<2x256xf32>
    %44 = arith.subf %43, %22 : vector<2x256xf32>
    %45 = arith.mulf %44, %22 : vector<2x256xf32>
    %46 = math.exp %45 : vector<2x256xf32>
    %47 = arith.mulf %42, %46 : vector<2x256xf32>
    %cst_27 = arith.constant 1.000000e+00 : f32
    %48 = vector.broadcast %cst_27 : f32 to vector<2x256xf32>
    %49 = arith.subf %48, %47 : vector<2x256xf32>
    %50 = arith.mulf %21, %49 : vector<2x256xf32>
    %cst_28 = arith.constant 1.000000e+00 : f32
    %51 = vector.broadcast %cst_28 : f32 to vector<2x256xf32>
    %52 = arith.addf %51, %50 : vector<2x256xf32>
    %53 = arith.mulf %14, %52 : vector<2x256xf32>
    %c0_29 = arith.constant 0 : index
    %c0_30 = arith.constant 0 : index
    %54 = vector.load %arg7[%c0_29, %c0_30] : memref<2x9xf32, #tpu.memory_space<vmem>>, vector<2x1xf32>
    %c0_31 = arith.constant 0 : index
    %c0_32 = arith.constant 0 : index
    %55 = vector.load %arg9[%c0_31, %c0_32] : memref<9x256xf32, #tpu.memory_space<vmem>>, vector<1x256xf32>
    %56 = vector.broadcast %55 : vector<1x256xf32> to vector<2x256xf32>
    %57 = arith.mulf %53, %56 : vector<2x256xf32>
    %58 = vector.broadcast %54 : vector<2x1xf32> to vector<2x256xf32>
    %59 = arith.mulf %58, %57 : vector<2x256xf32>
    %60 = arith.addf %8, %59 : vector<2x256xf32>
    %61 = vector.extract_strided_slice %3 {offsets = [4, 0], sizes = [4, 256], strides = [1, 1]} : vector<36x256xf32> to vector<4x256xf32>
    %cst_33 = arith.constant dense<0.000000e+00> : vector<2x256xf32>
    %62 = tpu.matmul %6, %61, %cst_33 {dimension_numbers = #tpu.dot_dimension_numbers<[1], [0], [0], [1], [0, 0, 1, 1], [], []>} : vector<2x4xf32>, vector<4x256xf32>, vector<2x256xf32> -> vector<2x256xf32>
    %63 = vector.broadcast %7 : vector<2x1xf32> to vector<2x256xf32>
    %64 = arith.addf %62, %63 : vector<2x256xf32>
    %cst_34 = arith.constant 5.000000e-01 : f32
    %65 = vector.broadcast %cst_34 : f32 to vector<2x256xf32>
    %66 = arith.mulf %65, %64 : vector<2x256xf32>
    %cst_35 = arith.constant 0.707106769 : f32
    %67 = vector.broadcast %cst_35 : f32 to vector<2x256xf32>
    %68 = arith.mulf %64, %67 : vector<2x256xf32>
    %cst_36 = arith.constant 0.000000e+00 : f32
    %69 = vector.broadcast %cst_36 : f32 to vector<2x256xf32>
    %70 = arith.cmpf oge, %68, %69 : vector<2x256xf32>
    %cst_37 = arith.constant 1.000000e+00 : f32
    %cst_38 = arith.constant -1.000000e+00 : f32
    %71 = vector.broadcast %cst_37 : f32 to vector<2x256xf32>
    %72 = vector.broadcast %cst_38 : f32 to vector<2x256xf32>
    %73 = arith.select %70, %71, %72 : vector<2x256xi1>, vector<2x256xf32>
    %74 = math.absf %68 : vector<2x256xf32>
    %cst_39 = arith.constant 0.327591091 : f32
    %75 = vector.broadcast %cst_39 : f32 to vector<2x256xf32>
    %76 = arith.mulf %75, %74 : vector<2x256xf32>
    %cst_40 = arith.constant 1.000000e+00 : f32
    %77 = vector.broadcast %cst_40 : f32 to vector<2x256xf32>
    %78 = arith.addf %77, %76 : vector<2x256xf32>
    %cst_41 = arith.constant 1.000000e+00 : f32
    %79 = vector.broadcast %cst_41 : f32 to vector<2x256xf32>
    %80 = arith.divf %79, %78 : vector<2x256xf32>
    %cst_42 = arith.constant 1.06140542 : f32
    %81 = vector.broadcast %cst_42 : f32 to vector<2x256xf32>
    %82 = arith.mulf %81, %80 : vector<2x256xf32>
    %cst_43 = arith.constant -1.45315206 : f32
    %83 = vector.broadcast %cst_43 : f32 to vector<2x256xf32>
    %84 = arith.addf %82, %83 : vector<2x256xf32>
    %85 = arith.mulf %84, %80 : vector<2x256xf32>
    %cst_44 = arith.constant 1.42141378 : f32
    %86 = vector.broadcast %cst_44 : f32 to vector<2x256xf32>
    %87 = arith.addf %85, %86 : vector<2x256xf32>
    %88 = arith.mulf %87, %80 : vector<2x256xf32>
    %cst_45 = arith.constant -0.284496725 : f32
    %89 = vector.broadcast %cst_45 : f32 to vector<2x256xf32>
    %90 = arith.addf %88, %89 : vector<2x256xf32>
    %91 = arith.mulf %90, %80 : vector<2x256xf32>
    %cst_46 = arith.constant 0.254829586 : f32
    %92 = vector.broadcast %cst_46 : f32 to vector<2x256xf32>
    %93 = arith.addf %91, %92 : vector<2x256xf32>
    %94 = arith.mulf %93, %80 : vector<2x256xf32>
    %cst_47 = arith.constant 0.000000e+00 : f32
    %95 = vector.broadcast %cst_47 : f32 to vector<2x256xf32>
    %96 = arith.subf %95, %74 : vector<2x256xf32>
    %97 = arith.mulf %96, %74 : vector<2x256xf32>
    %98 = math.exp %97 : vector<2x256xf32>
    %99 = arith.mulf %94, %98 : vector<2x256xf32>
    %cst_48 = arith.constant 1.000000e+00 : f32
    %100 = vector.broadcast %cst_48 : f32 to vector<2x256xf32>
    %101 = arith.subf %100, %99 : vector<2x256xf32>
    %102 = arith.mulf %73, %101 : vector<2x256xf32>
    %cst_49 = arith.constant 1.000000e+00 : f32
    %103 = vector.broadcast %cst_49 : f32 to vector<2x256xf32>
    %104 = arith.addf %103, %102 : vector<2x256xf32>
    %105 = arith.mulf %66, %104 : vector<2x256xf32>
    %c0_50 = arith.constant 0 : index
    %c1 = arith.constant 1 : index
    %106 = vector.load %arg7[%c0_50, %c1] : memref<2x9xf32, #tpu.memory_space<vmem>>, vector<2x1xf32>
    %c1_51 = arith.constant 1 : index
    %c0_52 = arith.constant 0 : index
    %107 = vector.load %arg9[%c1_51, %c0_52] : memref<9x256xf32, #tpu.memory_space<vmem>>, vector<1x256xf32>
    %108 = vector.broadcast %107 : vector<1x256xf32> to vector<2x256xf32>
    %109 = arith.mulf %105, %108 : vector<2x256xf32>
    %110 = vector.broadcast %106 : vector<2x1xf32> to vector<2x256xf32>
    %111 = arith.mulf %110, %109 : vector<2x256xf32>
    %112 = arith.addf %60, %111 : vector<2x256xf32>
    %113 = vector.extract_strided_slice %3 {offsets = [8, 0], sizes = [4, 256], strides = [1, 1]} : vector<36x256xf32> to vector<4x256xf32>
    %cst_53 = arith.constant dense<0.000000e+00> : vector<2x256xf32>
    %114 = tpu.matmul %6, %113, %cst_53 {dimension_numbers = #tpu.dot_dimension_numbers<[1], [0], [0], [1], [0, 0, 1, 1], [], []>} : vector<2x4xf32>, vector<4x256xf32>, vector<2x256xf32> -> vector<2x256xf32>
    %115 = vector.broadcast %7 : vector<2x1xf32> to vector<2x256xf32>
    %116 = arith.addf %114, %115 : vector<2x256xf32>
    %cst_54 = arith.constant 5.000000e-01 : f32
    %117 = vector.broadcast %cst_54 : f32 to vector<2x256xf32>
    %118 = arith.mulf %117, %116 : vector<2x256xf32>
    %cst_55 = arith.constant 0.707106769 : f32
    %119 = vector.broadcast %cst_55 : f32 to vector<2x256xf32>
    %120 = arith.mulf %116, %119 : vector<2x256xf32>
    %cst_56 = arith.constant 0.000000e+00 : f32
    %121 = vector.broadcast %cst_56 : f32 to vector<2x256xf32>
    %122 = arith.cmpf oge, %120, %121 : vector<2x256xf32>
    %cst_57 = arith.constant 1.000000e+00 : f32
    %cst_58 = arith.constant -1.000000e+00 : f32
    %123 = vector.broadcast %cst_57 : f32 to vector<2x256xf32>
    %124 = vector.broadcast %cst_58 : f32 to vector<2x256xf32>
    %125 = arith.select %122, %123, %124 : vector<2x256xi1>, vector<2x256xf32>
    %126 = math.absf %120 : vector<2x256xf32>
    %cst_59 = arith.constant 0.327591091 : f32
    %127 = vector.broadcast %cst_59 : f32 to vector<2x256xf32>
    %128 = arith.mulf %127, %126 : vector<2x256xf32>
    %cst_60 = arith.constant 1.000000e+00 : f32
    %129 = vector.broadcast %cst_60 : f32 to vector<2x256xf32>
    %130 = arith.addf %129, %128 : vector<2x256xf32>
    %cst_61 = arith.constant 1.000000e+00 : f32
    %131 = vector.broadcast %cst_61 : f32 to vector<2x256xf32>
    %132 = arith.divf %131, %130 : vector<2x256xf32>
    %cst_62 = arith.constant 1.06140542 : f32
    %133 = vector.broadcast %cst_62 : f32 to vector<2x256xf32>
    %134 = arith.mulf %133, %132 : vector<2x256xf32>
    %cst_63 = arith.constant -1.45315206 : f32
    %135 = vector.broadcast %cst_63 : f32 to vector<2x256xf32>
    %136 = arith.addf %134, %135 : vector<2x256xf32>
    %137 = arith.mulf %136, %132 : vector<2x256xf32>
    %cst_64 = arith.constant 1.42141378 : f32
    %138 = vector.broadcast %cst_64 : f32 to vector<2x256xf32>
    %139 = arith.addf %137, %138 : vector<2x256xf32>
    %140 = arith.mulf %139, %132 : vector<2x256xf32>
    %cst_65 = arith.constant -0.284496725 : f32
    %141 = vector.broadcast %cst_65 : f32 to vector<2x256xf32>
    %142 = arith.addf %140, %141 : vector<2x256xf32>
    %143 = arith.mulf %142, %132 : vector<2x256xf32>
    %cst_66 = arith.constant 0.254829586 : f32
    %144 = vector.broadcast %cst_66 : f32 to vector<2x256xf32>
    %145 = arith.addf %143, %144 : vector<2x256xf32>
    %146 = arith.mulf %145, %132 : vector<2x256xf32>
    %cst_67 = arith.constant 0.000000e+00 : f32
    %147 = vector.broadcast %cst_67 : f32 to vector<2x256xf32>
    %148 = arith.subf %147, %126 : vector<2x256xf32>
    %149 = arith.mulf %148, %126 : vector<2x256xf32>
    %150 = math.exp %149 : vector<2x256xf32>
    %151 = arith.mulf %146, %150 : vector<2x256xf32>
    %cst_68 = arith.constant 1.000000e+00 : f32
    %152 = vector.broadcast %cst_68 : f32 to vector<2x256xf32>
    %153 = arith.subf %152, %151 : vector<2x256xf32>
    %154 = arith.mulf %125, %153 : vector<2x256xf32>
    %cst_69 = arith.constant 1.000000e+00 : f32
    %155 = vector.broadcast %cst_69 : f32 to vector<2x256xf32>
    %156 = arith.addf %155, %154 : vector<2x256xf32>
    %157 = arith.mulf %118, %156 : vector<2x256xf32>
    %c0_70 = arith.constant 0 : index
    %c2 = arith.constant 2 : index
    %158 = vector.load %arg7[%c0_70, %c2] : memref<2x9xf32, #tpu.memory_space<vmem>>, vector<2x1xf32>
    %c2_71 = arith.constant 2 : index
    %c0_72 = arith.constant 0 : index
    %159 = vector.load %arg9[%c2_71, %c0_72] : memref<9x256xf32, #tpu.memory_space<vmem>>, vector<1x256xf32>
    %160 = vector.broadcast %159 : vector<1x256xf32> to vector<2x256xf32>
    %161 = arith.mulf %157, %160 : vector<2x256xf32>
    %162 = vector.broadcast %158 : vector<2x1xf32> to vector<2x256xf32>
    %163 = arith.mulf %162, %161 : vector<2x256xf32>
    %164 = arith.addf %112, %163 : vector<2x256xf32>
    %165 = vector.extract_strided_slice %3 {offsets = [12, 0], sizes = [4, 256], strides = [1, 1]} : vector<36x256xf32> to vector<4x256xf32>
    %cst_73 = arith.constant dense<0.000000e+00> : vector<2x256xf32>
    %166 = tpu.matmul %6, %165, %cst_73 {dimension_numbers = #tpu.dot_dimension_numbers<[1], [0], [0], [1], [0, 0, 1, 1], [], []>} : vector<2x4xf32>, vector<4x256xf32>, vector<2x256xf32> -> vector<2x256xf32>
    %167 = vector.broadcast %7 : vector<2x1xf32> to vector<2x256xf32>
    %168 = arith.addf %166, %167 : vector<2x256xf32>
    %cst_74 = arith.constant 5.000000e-01 : f32
    %169 = vector.broadcast %cst_74 : f32 to vector<2x256xf32>
    %170 = arith.mulf %169, %168 : vector<2x256xf32>
    %cst_75 = arith.constant 0.707106769 : f32
    %171 = vector.broadcast %cst_75 : f32 to vector<2x256xf32>
    %172 = arith.mulf %168, %171 : vector<2x256xf32>
    %cst_76 = arith.constant 0.000000e+00 : f32
    %173 = vector.broadcast %cst_76 : f32 to vector<2x256xf32>
    %174 = arith.cmpf oge, %172, %173 : vector<2x256xf32>
    %cst_77 = arith.constant 1.000000e+00 : f32
    %cst_78 = arith.constant -1.000000e+00 : f32
    %175 = vector.broadcast %cst_77 : f32 to vector<2x256xf32>
    %176 = vector.broadcast %cst_78 : f32 to vector<2x256xf32>
    %177 = arith.select %174, %175, %176 : vector<2x256xi1>, vector<2x256xf32>
    %178 = math.absf %172 : vector<2x256xf32>
    %cst_79 = arith.constant 0.327591091 : f32
    %179 = vector.broadcast %cst_79 : f32 to vector<2x256xf32>
    %180 = arith.mulf %179, %178 : vector<2x256xf32>
    %cst_80 = arith.constant 1.000000e+00 : f32
    %181 = vector.broadcast %cst_80 : f32 to vector<2x256xf32>
    %182 = arith.addf %181, %180 : vector<2x256xf32>
    %cst_81 = arith.constant 1.000000e+00 : f32
    %183 = vector.broadcast %cst_81 : f32 to vector<2x256xf32>
    %184 = arith.divf %183, %182 : vector<2x256xf32>
    %cst_82 = arith.constant 1.06140542 : f32
    %185 = vector.broadcast %cst_82 : f32 to vector<2x256xf32>
    %186 = arith.mulf %185, %184 : vector<2x256xf32>
    %cst_83 = arith.constant -1.45315206 : f32
    %187 = vector.broadcast %cst_83 : f32 to vector<2x256xf32>
    %188 = arith.addf %186, %187 : vector<2x256xf32>
    %189 = arith.mulf %188, %184 : vector<2x256xf32>
    %cst_84 = arith.constant 1.42141378 : f32
    %190 = vector.broadcast %cst_84 : f32 to vector<2x256xf32>
    %191 = arith.addf %189, %190 : vector<2x256xf32>
    %192 = arith.mulf %191, %184 : vector<2x256xf32>
    %cst_85 = arith.constant -0.284496725 : f32
    %193 = vector.broadcast %cst_85 : f32 to vector<2x256xf32>
    %194 = arith.addf %192, %193 : vector<2x256xf32>
    %195 = arith.mulf %194, %184 : vector<2x256xf32>
    %cst_86 = arith.constant 0.254829586 : f32
    %196 = vector.broadcast %cst_86 : f32 to vector<2x256xf32>
    %197 = arith.addf %195, %196 : vector<2x256xf32>
    %198 = arith.mulf %197, %184 : vector<2x256xf32>
    %cst_87 = arith.constant 0.000000e+00 : f32
    %199 = vector.broadcast %cst_87 : f32 to vector<2x256xf32>
    %200 = arith.subf %199, %178 : vector<2x256xf32>
    %201 = arith.mulf %200, %178 : vector<2x256xf32>
    %202 = math.exp %201 : vector<2x256xf32>
    %203 = arith.mulf %198, %202 : vector<2x256xf32>
    %cst_88 = arith.constant 1.000000e+00 : f32
    %204 = vector.broadcast %cst_88 : f32 to vector<2x256xf32>
    %205 = arith.subf %204, %203 : vector<2x256xf32>
    %206 = arith.mulf %177, %205 : vector<2x256xf32>
    %cst_89 = arith.constant 1.000000e+00 : f32
    %207 = vector.broadcast %cst_89 : f32 to vector<2x256xf32>
    %208 = arith.addf %207, %206 : vector<2x256xf32>
    %209 = arith.mulf %170, %208 : vector<2x256xf32>
    %c0_90 = arith.constant 0 : index
    %c3 = arith.constant 3 : index
    %210 = vector.load %arg7[%c0_90, %c3] : memref<2x9xf32, #tpu.memory_space<vmem>>, vector<2x1xf32>
    %c3_91 = arith.constant 3 : index
    %c0_92 = arith.constant 0 : index
    %211 = vector.load %arg9[%c3_91, %c0_92] : memref<9x256xf32, #tpu.memory_space<vmem>>, vector<1x256xf32>
    %212 = vector.broadcast %211 : vector<1x256xf32> to vector<2x256xf32>
    %213 = arith.mulf %209, %212 : vector<2x256xf32>
    %214 = vector.broadcast %210 : vector<2x1xf32> to vector<2x256xf32>
    %215 = arith.mulf %214, %213 : vector<2x256xf32>
    %216 = arith.addf %164, %215 : vector<2x256xf32>
    %217 = vector.extract_strided_slice %3 {offsets = [16, 0], sizes = [4, 256], strides = [1, 1]} : vector<36x256xf32> to vector<4x256xf32>
    %cst_93 = arith.constant dense<0.000000e+00> : vector<2x256xf32>
    %218 = tpu.matmul %6, %217, %cst_93 {dimension_numbers = #tpu.dot_dimension_numbers<[1], [0], [0], [1], [0, 0, 1, 1], [], []>} : vector<2x4xf32>, vector<4x256xf32>, vector<2x256xf32> -> vector<2x256xf32>
    %219 = vector.broadcast %7 : vector<2x1xf32> to vector<2x256xf32>
    %220 = arith.addf %218, %219 : vector<2x256xf32>
    %cst_94 = arith.constant 5.000000e-01 : f32
    %221 = vector.broadcast %cst_94 : f32 to vector<2x256xf32>
    %222 = arith.mulf %221, %220 : vector<2x256xf32>
    %cst_95 = arith.constant 0.707106769 : f32
    %223 = vector.broadcast %cst_95 : f32 to vector<2x256xf32>
    %224 = arith.mulf %220, %223 : vector<2x256xf32>
    %cst_96 = arith.constant 0.000000e+00 : f32
    %225 = vector.broadcast %cst_96 : f32 to vector<2x256xf32>
    %226 = arith.cmpf oge, %224, %225 : vector<2x256xf32>
    %cst_97 = arith.constant 1.000000e+00 : f32
    %cst_98 = arith.constant -1.000000e+00 : f32
    %227 = vector.broadcast %cst_97 : f32 to vector<2x256xf32>
    %228 = vector.broadcast %cst_98 : f32 to vector<2x256xf32>
    %229 = arith.select %226, %227, %228 : vector<2x256xi1>, vector<2x256xf32>
    %230 = math.absf %224 : vector<2x256xf32>
    %cst_99 = arith.constant 0.327591091 : f32
    %231 = vector.broadcast %cst_99 : f32 to vector<2x256xf32>
    %232 = arith.mulf %231, %230 : vector<2x256xf32>
    %cst_100 = arith.constant 1.000000e+00 : f32
    %233 = vector.broadcast %cst_100 : f32 to vector<2x256xf32>
    %234 = arith.addf %233, %232 : vector<2x256xf32>
    %cst_101 = arith.constant 1.000000e+00 : f32
    %235 = vector.broadcast %cst_101 : f32 to vector<2x256xf32>
    %236 = arith.divf %235, %234 : vector<2x256xf32>
    %cst_102 = arith.constant 1.06140542 : f32
    %237 = vector.broadcast %cst_102 : f32 to vector<2x256xf32>
    %238 = arith.mulf %237, %236 : vector<2x256xf32>
    %cst_103 = arith.constant -1.45315206 : f32
    %239 = vector.broadcast %cst_103 : f32 to vector<2x256xf32>
    %240 = arith.addf %238, %239 : vector<2x256xf32>
    %241 = arith.mulf %240, %236 : vector<2x256xf32>
    %cst_104 = arith.constant 1.42141378 : f32
    %242 = vector.broadcast %cst_104 : f32 to vector<2x256xf32>
    %243 = arith.addf %241, %242 : vector<2x256xf32>
    %244 = arith.mulf %243, %236 : vector<2x256xf32>
    %cst_105 = arith.constant -0.284496725 : f32
    %245 = vector.broadcast %cst_105 : f32 to vector<2x256xf32>
    %246 = arith.addf %244, %245 : vector<2x256xf32>
    %247 = arith.mulf %246, %236 : vector<2x256xf32>
    %cst_106 = arith.constant 0.254829586 : f32
    %248 = vector.broadcast %cst_106 : f32 to vector<2x256xf32>
    %249 = arith.addf %247, %248 : vector<2x256xf32>
    %250 = arith.mulf %249, %236 : vector<2x256xf32>
    %cst_107 = arith.constant 0.000000e+00 : f32
    %251 = vector.broadcast %cst_107 : f32 to vector<2x256xf32>
    %252 = arith.subf %251, %230 : vector<2x256xf32>
    %253 = arith.mulf %252, %230 : vector<2x256xf32>
    %254 = math.exp %253 : vector<2x256xf32>
    %255 = arith.mulf %250, %254 : vector<2x256xf32>
    %cst_108 = arith.constant 1.000000e+00 : f32
    %256 = vector.broadcast %cst_108 : f32 to vector<2x256xf32>
    %257 = arith.subf %256, %255 : vector<2x256xf32>
    %258 = arith.mulf %229, %257 : vector<2x256xf32>
    %cst_109 = arith.constant 1.000000e+00 : f32
    %259 = vector.broadcast %cst_109 : f32 to vector<2x256xf32>
    %260 = arith.addf %259, %258 : vector<2x256xf32>
    %261 = arith.mulf %222, %260 : vector<2x256xf32>
    %c0_110 = arith.constant 0 : index
    %c4 = arith.constant 4 : index
    %262 = vector.load %arg7[%c0_110, %c4] : memref<2x9xf32, #tpu.memory_space<vmem>>, vector<2x1xf32>
    %c4_111 = arith.constant 4 : index
    %c0_112 = arith.constant 0 : index
    %263 = vector.load %arg9[%c4_111, %c0_112] : memref<9x256xf32, #tpu.memory_space<vmem>>, vector<1x256xf32>
    %264 = vector.broadcast %263 : vector<1x256xf32> to vector<2x256xf32>
    %265 = arith.mulf %261, %264 : vector<2x256xf32>
    %266 = vector.broadcast %262 : vector<2x1xf32> to vector<2x256xf32>
    %267 = arith.mulf %266, %265 : vector<2x256xf32>
    %268 = arith.addf %216, %267 : vector<2x256xf32>
    %269 = vector.extract_strided_slice %3 {offsets = [20, 0], sizes = [4, 256], strides = [1, 1]} : vector<36x256xf32> to vector<4x256xf32>
    %cst_113 = arith.constant dense<0.000000e+00> : vector<2x256xf32>
    %270 = tpu.matmul %6, %269, %cst_113 {dimension_numbers = #tpu.dot_dimension_numbers<[1], [0], [0], [1], [0, 0, 1, 1], [], []>} : vector<2x4xf32>, vector<4x256xf32>, vector<2x256xf32> -> vector<2x256xf32>
    %271 = vector.broadcast %7 : vector<2x1xf32> to vector<2x256xf32>
    %272 = arith.addf %270, %271 : vector<2x256xf32>
    %cst_114 = arith.constant 5.000000e-01 : f32
    %273 = vector.broadcast %cst_114 : f32 to vector<2x256xf32>
    %274 = arith.mulf %273, %272 : vector<2x256xf32>
    %cst_115 = arith.constant 0.707106769 : f32
    %275 = vector.broadcast %cst_115 : f32 to vector<2x256xf32>
    %276 = arith.mulf %272, %275 : vector<2x256xf32>
    %cst_116 = arith.constant 0.000000e+00 : f32
    %277 = vector.broadcast %cst_116 : f32 to vector<2x256xf32>
    %278 = arith.cmpf oge, %276, %277 : vector<2x256xf32>
    %cst_117 = arith.constant 1.000000e+00 : f32
    %cst_118 = arith.constant -1.000000e+00 : f32
    %279 = vector.broadcast %cst_117 : f32 to vector<2x256xf32>
    %280 = vector.broadcast %cst_118 : f32 to vector<2x256xf32>
    %281 = arith.select %278, %279, %280 : vector<2x256xi1>, vector<2x256xf32>
    %282 = math.absf %276 : vector<2x256xf32>
    %cst_119 = arith.constant 0.327591091 : f32
    %283 = vector.broadcast %cst_119 : f32 to vector<2x256xf32>
    %284 = arith.mulf %283, %282 : vector<2x256xf32>
    %cst_120 = arith.constant 1.000000e+00 : f32
    %285 = vector.broadcast %cst_120 : f32 to vector<2x256xf32>
    %286 = arith.addf %285, %284 : vector<2x256xf32>
    %cst_121 = arith.constant 1.000000e+00 : f32
    %287 = vector.broadcast %cst_121 : f32 to vector<2x256xf32>
    %288 = arith.divf %287, %286 : vector<2x256xf32>
    %cst_122 = arith.constant 1.06140542 : f32
    %289 = vector.broadcast %cst_122 : f32 to vector<2x256xf32>
    %290 = arith.mulf %289, %288 : vector<2x256xf32>
    %cst_123 = arith.constant -1.45315206 : f32
    %291 = vector.broadcast %cst_123 : f32 to vector<2x256xf32>
    %292 = arith.addf %290, %291 : vector<2x256xf32>
    %293 = arith.mulf %292, %288 : vector<2x256xf32>
    %cst_124 = arith.constant 1.42141378 : f32
    %294 = vector.broadcast %cst_124 : f32 to vector<2x256xf32>
    %295 = arith.addf %293, %294 : vector<2x256xf32>
    %296 = arith.mulf %295, %288 : vector<2x256xf32>
    %cst_125 = arith.constant -0.284496725 : f32
    %297 = vector.broadcast %cst_125 : f32 to vector<2x256xf32>
    %298 = arith.addf %296, %297 : vector<2x256xf32>
    %299 = arith.mulf %298, %288 : vector<2x256xf32>
    %cst_126 = arith.constant 0.254829586 : f32
    %300 = vector.broadcast %cst_126 : f32 to vector<2x256xf32>
    %301 = arith.addf %299, %300 : vector<2x256xf32>
    %302 = arith.mulf %301, %288 : vector<2x256xf32>
    %cst_127 = arith.constant 0.000000e+00 : f32
    %303 = vector.broadcast %cst_127 : f32 to vector<2x256xf32>
    %304 = arith.subf %303, %282 : vector<2x256xf32>
    %305 = arith.mulf %304, %282 : vector<2x256xf32>
    %306 = math.exp %305 : vector<2x256xf32>
    %307 = arith.mulf %302, %306 : vector<2x256xf32>
    %cst_128 = arith.constant 1.000000e+00 : f32
    %308 = vector.broadcast %cst_128 : f32 to vector<2x256xf32>
    %309 = arith.subf %308, %307 : vector<2x256xf32>
    %310 = arith.mulf %281, %309 : vector<2x256xf32>
    %cst_129 = arith.constant 1.000000e+00 : f32
    %311 = vector.broadcast %cst_129 : f32 to vector<2x256xf32>
    %312 = arith.addf %311, %310 : vector<2x256xf32>
    %313 = arith.mulf %274, %312 : vector<2x256xf32>
    %c0_130 = arith.constant 0 : index
    %c5 = arith.constant 5 : index
    %314 = vector.load %arg7[%c0_130, %c5] : memref<2x9xf32, #tpu.memory_space<vmem>>, vector<2x1xf32>
    %c5_131 = arith.constant 5 : index
    %c0_132 = arith.constant 0 : index
    %315 = vector.load %arg9[%c5_131, %c0_132] : memref<9x256xf32, #tpu.memory_space<vmem>>, vector<1x256xf32>
    %316 = vector.broadcast %315 : vector<1x256xf32> to vector<2x256xf32>
    %317 = arith.mulf %313, %316 : vector<2x256xf32>
    %318 = vector.broadcast %314 : vector<2x1xf32> to vector<2x256xf32>
    %319 = arith.mulf %318, %317 : vector<2x256xf32>
    %320 = arith.addf %268, %319 : vector<2x256xf32>
    %321 = vector.extract_strided_slice %3 {offsets = [24, 0], sizes = [4, 256], strides = [1, 1]} : vector<36x256xf32> to vector<4x256xf32>
    %cst_133 = arith.constant dense<0.000000e+00> : vector<2x256xf32>
    %322 = tpu.matmul %6, %321, %cst_133 {dimension_numbers = #tpu.dot_dimension_numbers<[1], [0], [0], [1], [0, 0, 1, 1], [], []>} : vector<2x4xf32>, vector<4x256xf32>, vector<2x256xf32> -> vector<2x256xf32>
    %323 = vector.broadcast %7 : vector<2x1xf32> to vector<2x256xf32>
    %324 = arith.addf %322, %323 : vector<2x256xf32>
    %cst_134 = arith.constant 5.000000e-01 : f32
    %325 = vector.broadcast %cst_134 : f32 to vector<2x256xf32>
    %326 = arith.mulf %325, %324 : vector<2x256xf32>
    %cst_135 = arith.constant 0.707106769 : f32
    %327 = vector.broadcast %cst_135 : f32 to vector<2x256xf32>
    %328 = arith.mulf %324, %327 : vector<2x256xf32>
    %cst_136 = arith.constant 0.000000e+00 : f32
    %329 = vector.broadcast %cst_136 : f32 to vector<2x256xf32>
    %330 = arith.cmpf oge, %328, %329 : vector<2x256xf32>
    %cst_137 = arith.constant 1.000000e+00 : f32
    %cst_138 = arith.constant -1.000000e+00 : f32
    %331 = vector.broadcast %cst_137 : f32 to vector<2x256xf32>
    %332 = vector.broadcast %cst_138 : f32 to vector<2x256xf32>
    %333 = arith.select %330, %331, %332 : vector<2x256xi1>, vector<2x256xf32>
    %334 = math.absf %328 : vector<2x256xf32>
    %cst_139 = arith.constant 0.327591091 : f32
    %335 = vector.broadcast %cst_139 : f32 to vector<2x256xf32>
    %336 = arith.mulf %335, %334 : vector<2x256xf32>
    %cst_140 = arith.constant 1.000000e+00 : f32
    %337 = vector.broadcast %cst_140 : f32 to vector<2x256xf32>
    %338 = arith.addf %337, %336 : vector<2x256xf32>
    %cst_141 = arith.constant 1.000000e+00 : f32
    %339 = vector.broadcast %cst_141 : f32 to vector<2x256xf32>
    %340 = arith.divf %339, %338 : vector<2x256xf32>
    %cst_142 = arith.constant 1.06140542 : f32
    %341 = vector.broadcast %cst_142 : f32 to vector<2x256xf32>
    %342 = arith.mulf %341, %340 : vector<2x256xf32>
    %cst_143 = arith.constant -1.45315206 : f32
    %343 = vector.broadcast %cst_143 : f32 to vector<2x256xf32>
    %344 = arith.addf %342, %343 : vector<2x256xf32>
    %345 = arith.mulf %344, %340 : vector<2x256xf32>
    %cst_144 = arith.constant 1.42141378 : f32
    %346 = vector.broadcast %cst_144 : f32 to vector<2x256xf32>
    %347 = arith.addf %345, %346 : vector<2x256xf32>
    %348 = arith.mulf %347, %340 : vector<2x256xf32>
    %cst_145 = arith.constant -0.284496725 : f32
    %349 = vector.broadcast %cst_145 : f32 to vector<2x256xf32>
    %350 = arith.addf %348, %349 : vector<2x256xf32>
    %351 = arith.mulf %350, %340 : vector<2x256xf32>
    %cst_146 = arith.constant 0.254829586 : f32
    %352 = vector.broadcast %cst_146 : f32 to vector<2x256xf32>
    %353 = arith.addf %351, %352 : vector<2x256xf32>
    %354 = arith.mulf %353, %340 : vector<2x256xf32>
    %cst_147 = arith.constant 0.000000e+00 : f32
    %355 = vector.broadcast %cst_147 : f32 to vector<2x256xf32>
    %356 = arith.subf %355, %334 : vector<2x256xf32>
    %357 = arith.mulf %356, %334 : vector<2x256xf32>
    %358 = math.exp %357 : vector<2x256xf32>
    %359 = arith.mulf %354, %358 : vector<2x256xf32>
    %cst_148 = arith.constant 1.000000e+00 : f32
    %360 = vector.broadcast %cst_148 : f32 to vector<2x256xf32>
    %361 = arith.subf %360, %359 : vector<2x256xf32>
    %362 = arith.mulf %333, %361 : vector<2x256xf32>
    %cst_149 = arith.constant 1.000000e+00 : f32
    %363 = vector.broadcast %cst_149 : f32 to vector<2x256xf32>
    %364 = arith.addf %363, %362 : vector<2x256xf32>
    %365 = arith.mulf %326, %364 : vector<2x256xf32>
    %c0_150 = arith.constant 0 : index
    %c6 = arith.constant 6 : index
    %366 = vector.load %arg7[%c0_150, %c6] : memref<2x9xf32, #tpu.memory_space<vmem>>, vector<2x1xf32>
    %c6_151 = arith.constant 6 : index
    %c0_152 = arith.constant 0 : index
    %367 = vector.load %arg9[%c6_151, %c0_152] : memref<9x256xf32, #tpu.memory_space<vmem>>, vector<1x256xf32>
    %368 = vector.broadcast %367 : vector<1x256xf32> to vector<2x256xf32>
    %369 = arith.mulf %365, %368 : vector<2x256xf32>
    %370 = vector.broadcast %366 : vector<2x1xf32> to vector<2x256xf32>
    %371 = arith.mulf %370, %369 : vector<2x256xf32>
    %372 = arith.addf %320, %371 : vector<2x256xf32>
    %373 = vector.extract_strided_slice %3 {offsets = [28, 0], sizes = [4, 256], strides = [1, 1]} : vector<36x256xf32> to vector<4x256xf32>
    %cst_153 = arith.constant dense<0.000000e+00> : vector<2x256xf32>
    %374 = tpu.matmul %6, %373, %cst_153 {dimension_numbers = #tpu.dot_dimension_numbers<[1], [0], [0], [1], [0, 0, 1, 1], [], []>} : vector<2x4xf32>, vector<4x256xf32>, vector<2x256xf32> -> vector<2x256xf32>
    %375 = vector.broadcast %7 : vector<2x1xf32> to vector<2x256xf32>
    %376 = arith.addf %374, %375 : vector<2x256xf32>
    %cst_154 = arith.constant 5.000000e-01 : f32
    %377 = vector.broadcast %cst_154 : f32 to vector<2x256xf32>
    %378 = arith.mulf %377, %376 : vector<2x256xf32>
    %cst_155 = arith.constant 0.707106769 : f32
    %379 = vector.broadcast %cst_155 : f32 to vector<2x256xf32>
    %380 = arith.mulf %376, %379 : vector<2x256xf32>
    %cst_156 = arith.constant 0.000000e+00 : f32
    %381 = vector.broadcast %cst_156 : f32 to vector<2x256xf32>
    %382 = arith.cmpf oge, %380, %381 : vector<2x256xf32>
    %cst_157 = arith.constant 1.000000e+00 : f32
    %cst_158 = arith.constant -1.000000e+00 : f32
    %383 = vector.broadcast %cst_157 : f32 to vector<2x256xf32>
    %384 = vector.broadcast %cst_158 : f32 to vector<2x256xf32>
    %385 = arith.select %382, %383, %384 : vector<2x256xi1>, vector<2x256xf32>
    %386 = math.absf %380 : vector<2x256xf32>
    %cst_159 = arith.constant 0.327591091 : f32
    %387 = vector.broadcast %cst_159 : f32 to vector<2x256xf32>
    %388 = arith.mulf %387, %386 : vector<2x256xf32>
    %cst_160 = arith.constant 1.000000e+00 : f32
    %389 = vector.broadcast %cst_160 : f32 to vector<2x256xf32>
    %390 = arith.addf %389, %388 : vector<2x256xf32>
    %cst_161 = arith.constant 1.000000e+00 : f32
    %391 = vector.broadcast %cst_161 : f32 to vector<2x256xf32>
    %392 = arith.divf %391, %390 : vector<2x256xf32>
    %cst_162 = arith.constant 1.06140542 : f32
    %393 = vector.broadcast %cst_162 : f32 to vector<2x256xf32>
    %394 = arith.mulf %393, %392 : vector<2x256xf32>
    %cst_163 = arith.constant -1.45315206 : f32
    %395 = vector.broadcast %cst_163 : f32 to vector<2x256xf32>
    %396 = arith.addf %394, %395 : vector<2x256xf32>
    %397 = arith.mulf %396, %392 : vector<2x256xf32>
    %cst_164 = arith.constant 1.42141378 : f32
    %398 = vector.broadcast %cst_164 : f32 to vector<2x256xf32>
    %399 = arith.addf %397, %398 : vector<2x256xf32>
    %400 = arith.mulf %399, %392 : vector<2x256xf32>
    %cst_165 = arith.constant -0.284496725 : f32
    %401 = vector.broadcast %cst_165 : f32 to vector<2x256xf32>
    %402 = arith.addf %400, %401 : vector<2x256xf32>
    %403 = arith.mulf %402, %392 : vector<2x256xf32>
    %cst_166 = arith.constant 0.254829586 : f32
    %404 = vector.broadcast %cst_166 : f32 to vector<2x256xf32>
    %405 = arith.addf %403, %404 : vector<2x256xf32>
    %406 = arith.mulf %405, %392 : vector<2x256xf32>
    %cst_167 = arith.constant 0.000000e+00 : f32
    %407 = vector.broadcast %cst_167 : f32 to vector<2x256xf32>
    %408 = arith.subf %407, %386 : vector<2x256xf32>
    %409 = arith.mulf %408, %386 : vector<2x256xf32>
    %410 = math.exp %409 : vector<2x256xf32>
    %411 = arith.mulf %406, %410 : vector<2x256xf32>
    %cst_168 = arith.constant 1.000000e+00 : f32
    %412 = vector.broadcast %cst_168 : f32 to vector<2x256xf32>
    %413 = arith.subf %412, %411 : vector<2x256xf32>
    %414 = arith.mulf %385, %413 : vector<2x256xf32>
    %cst_169 = arith.constant 1.000000e+00 : f32
    %415 = vector.broadcast %cst_169 : f32 to vector<2x256xf32>
    %416 = arith.addf %415, %414 : vector<2x256xf32>
    %417 = arith.mulf %378, %416 : vector<2x256xf32>
    %c0_170 = arith.constant 0 : index
    %c7 = arith.constant 7 : index
    %418 = vector.load %arg7[%c0_170, %c7] : memref<2x9xf32, #tpu.memory_space<vmem>>, vector<2x1xf32>
    %c7_171 = arith.constant 7 : index
    %c0_172 = arith.constant 0 : index
    %419 = vector.load %arg9[%c7_171, %c0_172] : memref<9x256xf32, #tpu.memory_space<vmem>>, vector<1x256xf32>
    %420 = vector.broadcast %419 : vector<1x256xf32> to vector<2x256xf32>
    %421 = arith.mulf %417, %420 : vector<2x256xf32>
    %422 = vector.broadcast %418 : vector<2x1xf32> to vector<2x256xf32>
    %423 = arith.mulf %422, %421 : vector<2x256xf32>
    %424 = arith.addf %372, %423 : vector<2x256xf32>
    %425 = vector.extract_strided_slice %3 {offsets = [32, 0], sizes = [4, 256], strides = [1, 1]} : vector<36x256xf32> to vector<4x256xf32>
    %cst_173 = arith.constant dense<0.000000e+00> : vector<2x256xf32>
    %426 = tpu.matmul %6, %425, %cst_173 {dimension_numbers = #tpu.dot_dimension_numbers<[1], [0], [0], [1], [0, 0, 1, 1], [], []>} : vector<2x4xf32>, vector<4x256xf32>, vector<2x256xf32> -> vector<2x256xf32>
    %427 = vector.broadcast %7 : vector<2x1xf32> to vector<2x256xf32>
    %428 = arith.addf %426, %427 : vector<2x256xf32>
    %cst_174 = arith.constant 5.000000e-01 : f32
    %429 = vector.broadcast %cst_174 : f32 to vector<2x256xf32>
    %430 = arith.mulf %429, %428 : vector<2x256xf32>
    %cst_175 = arith.constant 0.707106769 : f32
    %431 = vector.broadcast %cst_175 : f32 to vector<2x256xf32>
    %432 = arith.mulf %428, %431 : vector<2x256xf32>
    %cst_176 = arith.constant 0.000000e+00 : f32
    %433 = vector.broadcast %cst_176 : f32 to vector<2x256xf32>
    %434 = arith.cmpf oge, %432, %433 : vector<2x256xf32>
    %cst_177 = arith.constant 1.000000e+00 : f32
    %cst_178 = arith.constant -1.000000e+00 : f32
    %435 = vector.broadcast %cst_177 : f32 to vector<2x256xf32>
    %436 = vector.broadcast %cst_178 : f32 to vector<2x256xf32>
    %437 = arith.select %434, %435, %436 : vector<2x256xi1>, vector<2x256xf32>
    %438 = math.absf %432 : vector<2x256xf32>
    %cst_179 = arith.constant 0.327591091 : f32
    %439 = vector.broadcast %cst_179 : f32 to vector<2x256xf32>
    %440 = arith.mulf %439, %438 : vector<2x256xf32>
    %cst_180 = arith.constant 1.000000e+00 : f32
    %441 = vector.broadcast %cst_180 : f32 to vector<2x256xf32>
    %442 = arith.addf %441, %440 : vector<2x256xf32>
    %cst_181 = arith.constant 1.000000e+00 : f32
    %443 = vector.broadcast %cst_181 : f32 to vector<2x256xf32>
    %444 = arith.divf %443, %442 : vector<2x256xf32>
    %cst_182 = arith.constant 1.06140542 : f32
    %445 = vector.broadcast %cst_182 : f32 to vector<2x256xf32>
    %446 = arith.mulf %445, %444 : vector<2x256xf32>
    %cst_183 = arith.constant -1.45315206 : f32
    %447 = vector.broadcast %cst_183 : f32 to vector<2x256xf32>
    %448 = arith.addf %446, %447 : vector<2x256xf32>
    %449 = arith.mulf %448, %444 : vector<2x256xf32>
    %cst_184 = arith.constant 1.42141378 : f32
    %450 = vector.broadcast %cst_184 : f32 to vector<2x256xf32>
    %451 = arith.addf %449, %450 : vector<2x256xf32>
    %452 = arith.mulf %451, %444 : vector<2x256xf32>
    %cst_185 = arith.constant -0.284496725 : f32
    %453 = vector.broadcast %cst_185 : f32 to vector<2x256xf32>
    %454 = arith.addf %452, %453 : vector<2x256xf32>
    %455 = arith.mulf %454, %444 : vector<2x256xf32>
    %cst_186 = arith.constant 0.254829586 : f32
    %456 = vector.broadcast %cst_186 : f32 to vector<2x256xf32>
    %457 = arith.addf %455, %456 : vector<2x256xf32>
    %458 = arith.mulf %457, %444 : vector<2x256xf32>
    %cst_187 = arith.constant 0.000000e+00 : f32
    %459 = vector.broadcast %cst_187 : f32 to vector<2x256xf32>
    %460 = arith.subf %459, %438 : vector<2x256xf32>
    %461 = arith.mulf %460, %438 : vector<2x256xf32>
    %462 = math.exp %461 : vector<2x256xf32>
    %463 = arith.mulf %458, %462 : vector<2x256xf32>
    %cst_188 = arith.constant 1.000000e+00 : f32
    %464 = vector.broadcast %cst_188 : f32 to vector<2x256xf32>
    %465 = arith.subf %464, %463 : vector<2x256xf32>
    %466 = arith.mulf %437, %465 : vector<2x256xf32>
    %cst_189 = arith.constant 1.000000e+00 : f32
    %467 = vector.broadcast %cst_189 : f32 to vector<2x256xf32>
    %468 = arith.addf %467, %466 : vector<2x256xf32>
    %469 = arith.mulf %430, %468 : vector<2x256xf32>
    %c0_190 = arith.constant 0 : index
    %c8 = arith.constant 8 : index
    %470 = vector.load %arg7[%c0_190, %c8] : memref<2x9xf32, #tpu.memory_space<vmem>>, vector<2x1xf32>
    %c8_191 = arith.constant 8 : index
    %c0_192 = arith.constant 0 : index
    %471 = vector.load %arg9[%c8_191, %c0_192] : memref<9x256xf32, #tpu.memory_space<vmem>>, vector<1x256xf32>
    %472 = vector.broadcast %471 : vector<1x256xf32> to vector<2x256xf32>
    %473 = arith.mulf %469, %472 : vector<2x256xf32>
    %474 = vector.broadcast %470 : vector<2x1xf32> to vector<2x256xf32>
    %475 = arith.mulf %474, %473 : vector<2x256xf32>
    %476 = arith.addf %424, %475 : vector<2x256xf32>
    %c0_193 = arith.constant 0 : index
    %c0_194 = arith.constant 0 : index
    %477 = vector.load %arg8[%c0_193, %c0_194] : memref<2x1xf32, #tpu.memory_space<vmem>>, vector<2x1xf32>
    %478 = vector.broadcast %477 : vector<2x1xf32> to vector<2x256xf32>
    %479 = arith.addf %476, %478 : vector<2x256xf32>
    %cst_195 = arith.constant 5.000000e-01 : f32
    %480 = vector.broadcast %cst_195 : f32 to vector<2x256xf32>
    %481 = arith.mulf %480, %479 : vector<2x256xf32>
    %cst_196 = arith.constant 0.707106769 : f32
    %482 = vector.broadcast %cst_196 : f32 to vector<2x256xf32>
    %483 = arith.mulf %479, %482 : vector<2x256xf32>
    %cst_197 = arith.constant 0.000000e+00 : f32
    %484 = vector.broadcast %cst_197 : f32 to vector<2x256xf32>
    %485 = arith.cmpf oge, %483, %484 : vector<2x256xf32>
    %cst_198 = arith.constant 1.000000e+00 : f32
    %cst_199 = arith.constant -1.000000e+00 : f32
    %486 = vector.broadcast %cst_198 : f32 to vector<2x256xf32>
    %487 = vector.broadcast %cst_199 : f32 to vector<2x256xf32>
    %488 = arith.select %485, %486, %487 : vector<2x256xi1>, vector<2x256xf32>
    %489 = math.absf %483 : vector<2x256xf32>
    %cst_200 = arith.constant 0.327591091 : f32
    %490 = vector.broadcast %cst_200 : f32 to vector<2x256xf32>
    %491 = arith.mulf %490, %489 : vector<2x256xf32>
    %cst_201 = arith.constant 1.000000e+00 : f32
    %492 = vector.broadcast %cst_201 : f32 to vector<2x256xf32>
    %493 = arith.addf %492, %491 : vector<2x256xf32>
    %cst_202 = arith.constant 1.000000e+00 : f32
    %494 = vector.broadcast %cst_202 : f32 to vector<2x256xf32>
    %495 = arith.divf %494, %493 : vector<2x256xf32>
    %cst_203 = arith.constant 1.06140542 : f32
    %496 = vector.broadcast %cst_203 : f32 to vector<2x256xf32>
    %497 = arith.mulf %496, %495 : vector<2x256xf32>
    %cst_204 = arith.constant -1.45315206 : f32
    %498 = vector.broadcast %cst_204 : f32 to vector<2x256xf32>
    %499 = arith.addf %497, %498 : vector<2x256xf32>
    %500 = arith.mulf %499, %495 : vector<2x256xf32>
    %cst_205 = arith.constant 1.42141378 : f32
    %501 = vector.broadcast %cst_205 : f32 to vector<2x256xf32>
    %502 = arith.addf %500, %501 : vector<2x256xf32>
    %503 = arith.mulf %502, %495 : vector<2x256xf32>
    %cst_206 = arith.constant -0.284496725 : f32
    %504 = vector.broadcast %cst_206 : f32 to vector<2x256xf32>
    %505 = arith.addf %503, %504 : vector<2x256xf32>
    %506 = arith.mulf %505, %495 : vector<2x256xf32>
    %cst_207 = arith.constant 0.254829586 : f32
    %507 = vector.broadcast %cst_207 : f32 to vector<2x256xf32>
    %508 = arith.addf %506, %507 : vector<2x256xf32>
    %509 = arith.mulf %508, %495 : vector<2x256xf32>
    %cst_208 = arith.constant 0.000000e+00 : f32
    %510 = vector.broadcast %cst_208 : f32 to vector<2x256xf32>
    %511 = arith.subf %510, %489 : vector<2x256xf32>
    %512 = arith.mulf %511, %489 : vector<2x256xf32>
    %513 = math.exp %512 : vector<2x256xf32>
    %514 = arith.mulf %509, %513 : vector<2x256xf32>
    %cst_209 = arith.constant 1.000000e+00 : f32
    %515 = vector.broadcast %cst_209 : f32 to vector<2x256xf32>
    %516 = arith.subf %515, %514 : vector<2x256xf32>
    %517 = arith.mulf %488, %516 : vector<2x256xf32>
    %cst_210 = arith.constant 1.000000e+00 : f32
    %518 = vector.broadcast %cst_210 : f32 to vector<2x256xf32>
    %519 = arith.addf %518, %517 : vector<2x256xf32>
    %520 = arith.mulf %481, %519 : vector<2x256xf32>
    %521 = vector.extract_strided_slice %3 {offsets = [16, 0], sizes = [4, 256], strides = [1, 1]} : vector<36x256xf32> to vector<4x256xf32>
    %c0_211 = arith.constant 0 : index
    %c0_212 = arith.constant 0 : index
    %522 = vector.load %arg15[%c0_211, %c0_212] : memref<256x64xf32, #tpu.memory_space<vmem>>, vector<256x64xf32>
    %cst_213 = arith.constant dense<0.000000e+00> : vector<4x64xf32>
    %523 = tpu.matmul %521, %522, %cst_213 {dimension_numbers = #tpu.dot_dimension_numbers<[1], [0], [0], [1], [0, 0, 1, 1], [], []>} : vector<4x256xf32>, vector<256x64xf32>, vector<4x64xf32> -> vector<4x64xf32>
    %c0_214 = arith.constant 0 : index
    %c0_215 = arith.constant 0 : index
    %524 = vector.load %arg10[%c0_214, %c0_215] : memref<4x4xf32, #tpu.memory_space<vmem>>, vector<4x4xf32>
    %cst_216 = arith.constant dense<0.000000e+00> : vector<4x64xf32>
    %525 = tpu.matmul %524, %523, %cst_216 {dimension_numbers = #tpu.dot_dimension_numbers<[1], [0], [0], [1], [0, 0, 1, 1], [], []>} : vector<4x4xf32>, vector<4x64xf32>, vector<4x64xf32> -> vector<4x64xf32>
    %c0_217 = arith.constant 0 : index
    %c0_218 = arith.constant 0 : index
    %526 = vector.load %arg11[%c0_217, %c0_218] : memref<4x1xf32, #tpu.memory_space<vmem>>, vector<4x1xf32>
    %527 = vector.broadcast %526 : vector<4x1xf32> to vector<4x64xf32>
    %528 = arith.addf %525, %527 : vector<4x64xf32>
    %cst_219 = arith.constant 0.000000e+00 : f32
    %529 = vector.broadcast %cst_219 : f32 to vector<4x64xf32>
    %c0_220 = arith.constant 0 : index
    %c0_221 = arith.constant 0 : index
    %530 = vector.load %arg17[%c0_220, %c0_221] : memref<192x64xf32, #tpu.memory_space<vmem>>, vector<64x64xf32>
    %cst_222 = arith.constant dense<0.000000e+00> : vector<4x64xf32>
    %531 = tpu.matmul %528, %530, %cst_222 {dimension_numbers = #tpu.dot_dimension_numbers<[1], [0], [0], [1], [0, 0, 1, 1], [], []>} : vector<4x64xf32>, vector<64x64xf32>, vector<4x64xf32> -> vector<4x64xf32>
    %c0_223 = arith.constant 0 : index
    %c0_224 = arith.constant 0 : index
    %532 = vector.load %arg18[%c0_223, %c0_224] : memref<192x64xf32, #tpu.memory_space<vmem>>, vector<64x64xf32>
    %cst_225 = arith.constant dense<0.000000e+00> : vector<4x64xf32>
    %533 = tpu.matmul %528, %532, %cst_225 {dimension_numbers = #tpu.dot_dimension_numbers<[1], [0], [0], [1], [0, 0, 1, 1], [], []>} : vector<4x64xf32>, vector<64x64xf32>, vector<4x64xf32> -> vector<4x64xf32>
    %c0_226 = arith.constant 0 : index
    %c0_227 = arith.constant 0 : index
    %534 = vector.load %arg12[%c0_226, %c0_227] : memref<4x3xf32, #tpu.memory_space<vmem>>, vector<4x1xf32>
    %535 = vector.broadcast %534 : vector<4x1xf32> to vector<4x64xf32>
    %536 = arith.mulf %535, %531 : vector<4x64xf32>
    %537 = arith.addf %529, %536 : vector<4x64xf32>
    %c0_228 = arith.constant 0 : index
    %c0_229 = arith.constant 0 : index
    %538 = vector.load %arg13[%c0_228, %c0_229] : memref<4x3xf32, #tpu.memory_space<vmem>>, vector<4x1xf32>
    %539 = vector.broadcast %538 : vector<4x1xf32> to vector<4x64xf32>
    %540 = arith.mulf %539, %533 : vector<4x64xf32>
    %541 = arith.addf %537, %540 : vector<4x64xf32>
    %c64 = arith.constant 64 : index
    %c0_230 = arith.constant 0 : index
    %542 = vector.load %arg17[%c64, %c0_230] : memref<192x64xf32, #tpu.memory_space<vmem>>, vector<64x64xf32>
    %cst_231 = arith.constant dense<0.000000e+00> : vector<4x64xf32>
    %543 = tpu.matmul %528, %542, %cst_231 {dimension_numbers = #tpu.dot_dimension_numbers<[1], [0], [0], [1], [0, 0, 1, 1], [], []>} : vector<4x64xf32>, vector<64x64xf32>, vector<4x64xf32> -> vector<4x64xf32>
    %c64_232 = arith.constant 64 : index
    %c0_233 = arith.constant 0 : index
    %544 = vector.load %arg18[%c64_232, %c0_233] : memref<192x64xf32, #tpu.memory_space<vmem>>, vector<64x64xf32>
    %cst_234 = arith.constant dense<0.000000e+00> : vector<4x64xf32>
    %545 = tpu.matmul %528, %544, %cst_234 {dimension_numbers = #tpu.dot_dimension_numbers<[1], [0], [0], [1], [0, 0, 1, 1], [], []>} : vector<4x64xf32>, vector<64x64xf32>, vector<4x64xf32> -> vector<4x64xf32>
    %c0_235 = arith.constant 0 : index
    %c1_236 = arith.constant 1 : index
    %546 = vector.load %arg12[%c0_235, %c1_236] : memref<4x3xf32, #tpu.memory_space<vmem>>, vector<4x1xf32>
    %547 = vector.broadcast %546 : vector<4x1xf32> to vector<4x64xf32>
    %548 = arith.mulf %547, %543 : vector<4x64xf32>
    %549 = arith.addf %541, %548 : vector<4x64xf32>
    %c0_237 = arith.constant 0 : index
    %c1_238 = arith.constant 1 : index
    %550 = vector.load %arg13[%c0_237, %c1_238] : memref<4x3xf32, #tpu.memory_space<vmem>>, vector<4x1xf32>
    %551 = vector.broadcast %550 : vector<4x1xf32> to vector<4x64xf32>
    %552 = arith.mulf %551, %545 : vector<4x64xf32>
    %553 = arith.addf %549, %552 : vector<4x64xf32>
    %c128 = arith.constant 128 : index
    %c0_239 = arith.constant 0 : index
    %554 = vector.load %arg17[%c128, %c0_239] : memref<192x64xf32, #tpu.memory_space<vmem>>, vector<64x64xf32>
    %cst_240 = arith.constant dense<0.000000e+00> : vector<4x64xf32>
    %555 = tpu.matmul %528, %554, %cst_240 {dimension_numbers = #tpu.dot_dimension_numbers<[1], [0], [0], [1], [0, 0, 1, 1], [], []>} : vector<4x64xf32>, vector<64x64xf32>, vector<4x64xf32> -> vector<4x64xf32>
    %c128_241 = arith.constant 128 : index
    %c0_242 = arith.constant 0 : index
    %556 = vector.load %arg18[%c128_241, %c0_242] : memref<192x64xf32, #tpu.memory_space<vmem>>, vector<64x64xf32>
    %cst_243 = arith.constant dense<0.000000e+00> : vector<4x64xf32>
    %557 = tpu.matmul %528, %556, %cst_243 {dimension_numbers = #tpu.dot_dimension_numbers<[1], [0], [0], [1], [0, 0, 1, 1], [], []>} : vector<4x64xf32>, vector<64x64xf32>, vector<4x64xf32> -> vector<4x64xf32>
    %c0_244 = arith.constant 0 : index
    %c2_245 = arith.constant 2 : index
    %558 = vector.load %arg12[%c0_244, %c2_245] : memref<4x3xf32, #tpu.memory_space<vmem>>, vector<4x1xf32>
    %559 = vector.broadcast %558 : vector<4x1xf32> to vector<4x64xf32>
    %560 = arith.mulf %559, %555 : vector<4x64xf32>
    %561 = arith.addf %553, %560 : vector<4x64xf32>
    %c0_246 = arith.constant 0 : index
    %c2_247 = arith.constant 2 : index
    %562 = vector.load %arg13[%c0_246, %c2_247] : memref<4x3xf32, #tpu.memory_space<vmem>>, vector<4x1xf32>
    %563 = vector.broadcast %562 : vector<4x1xf32> to vector<4x64xf32>
    %564 = arith.mulf %563, %557 : vector<4x64xf32>
    %565 = arith.addf %561, %564 : vector<4x64xf32>
    %c0_248 = arith.constant 0 : index
    %c0_249 = arith.constant 0 : index
    %566 = vector.load %arg14[%c0_248, %c0_249] : memref<4x1xf32, #tpu.memory_space<vmem>>, vector<4x1xf32>
    %567 = vector.broadcast %566 : vector<4x1xf32> to vector<4x64xf32>
    %568 = arith.addf %565, %567 : vector<4x64xf32>
    %569 = arith.negf %568 : vector<4x64xf32>
    %570 = math.exp %569 : vector<4x64xf32>
    %cst_250 = arith.constant 1.000000e+00 : f32
    %571 = vector.broadcast %cst_250 : f32 to vector<4x64xf32>
    %572 = arith.addf %571, %570 : vector<4x64xf32>
    %573 = arith.divf %571, %572 : vector<4x64xf32>
    %c0_251 = arith.constant 0 : index
    %c0_252 = arith.constant 0 : index
    %574 = vector.load %arg16[%c0_251, %c0_252] : memref<64x256xf32, #tpu.memory_space<vmem>>, vector<64x256xf32>
    %cst_253 = arith.constant dense<0.000000e+00> : vector<4x256xf32>
    %575 = tpu.matmul %573, %574, %cst_253 {dimension_numbers = #tpu.dot_dimension_numbers<[1], [0], [0], [1], [0, 0, 1, 1], [], []>} : vector<4x64xf32>, vector<64x256xf32>, vector<4x256xf32> -> vector<4x256xf32>
    %576 = tpu.concatenate %261, %520 in 0 : vector<2x256xf32>, vector<2x256xf32> -> vector<4x256xf32>
    %577 = arith.mulf %576, %575 : vector<4x256xf32>
    %c0_254 = arith.constant 0 : index
    %c0_255 = arith.constant 0 : index
    %c0_256 = arith.constant 0 : index
    %578 = vector.load %arg3[%c0_254, %c0_255, %c0_256] : memref<1x8x256xf32, #tpu.memory_space<vmem>>, vector<1x8x256xf32>
    %579 = vector.shape_cast %578 : vector<1x8x256xf32> to vector<8x256xf32>
    %c0_257 = arith.constant 0 : index
    %c0_258 = arith.constant 0 : index
    %580 = vector.load %arg19[%c0_257, %c0_258] : memref<24x8xf32, #tpu.memory_space<vmem>>, vector<24x8xf32>
    %cst_259 = arith.constant dense<0.000000e+00> : vector<24x256xf32>
    %581 = tpu.matmul %580, %579, %cst_259 {dimension_numbers = #tpu.dot_dimension_numbers<[1], [0], [0], [1], [0, 0, 1, 1], [], []>} : vector<24x8xf32>, vector<8x256xf32>, vector<24x256xf32> -> vector<24x256xf32>
    %582 = vector.extract_strided_slice %581 {offsets = [0, 0], sizes = [4, 256], strides = [1, 1]} : vector<24x256xf32> to vector<4x256xf32>
    %583 = vector.extract_strided_slice %581 {offsets = [8, 0], sizes = [4, 256], strides = [1, 1]} : vector<24x256xf32> to vector<4x256xf32>
    %584 = vector.extract_strided_slice %581 {offsets = [16, 0], sizes = [4, 256], strides = [1, 1]} : vector<24x256xf32> to vector<4x256xf32>
    %cst_260 = arith.constant dense<0.000000e+00> : vector<256x256xf32>
    %585 = tpu.matmul %582, %583, %cst_260 {dimension_numbers = #tpu.dot_dimension_numbers<[0], [0], [1], [1], [0, 1, 1, 1], [], []>} : vector<4x256xf32>, vector<4x256xf32>, vector<256x256xf32> -> vector<256x256xf32>
    %cst_261 = arith.constant 5.000000e-01 : f32
    %586 = vector.broadcast %cst_261 : f32 to vector<256x256xf32>
    %587 = arith.mulf %585, %586 : vector<256x256xf32>
    %cst_262 = arith.constant dense<0xFF800000> : vector<256xf32>
    %588 = vector.multi_reduction <maximumf>, %587, %cst_262 [1] : vector<256x256xf32> to vector<256xf32>
    %589 = vector.shape_cast %588 : vector<256xf32> to vector<256x1xf32>
    %590 = vector.broadcast %589 : vector<256x1xf32> to vector<256x256xf32>
    %591 = arith.subf %587, %590 : vector<256x256xf32>
    %592 = math.exp %591 : vector<256x256xf32>
    %cst_263 = arith.constant dense<0.000000e+00> : vector<256xf32>
    %593 = vector.multi_reduction <add>, %592, %cst_263 [1] : vector<256x256xf32> to vector<256xf32>
    %594 = vector.shape_cast %593 : vector<256xf32> to vector<256x1xf32>
    %595 = tpu.reciprocal %594 {approx = true} : vector<256x1xf32> -> vector<256x1xf32>
    %596 = vector.broadcast %595 : vector<256x1xf32> to vector<256x256xf32>
    %597 = arith.mulf %592, %596 : vector<256x256xf32>
    %cst_264 = arith.constant dense<0.000000e+00> : vector<4x256xf32>
    %598 = tpu.matmul %584, %597, %cst_264 {dimension_numbers = #tpu.dot_dimension_numbers<[1], [1], [0], [0], [0, 0, 1, 0], [], []>} : vector<4x256xf32>, vector<256x256xf32>, vector<4x256xf32> -> vector<4x256xf32>
    %599 = vector.extract_strided_slice %581 {offsets = [4, 0], sizes = [4, 256], strides = [1, 1]} : vector<24x256xf32> to vector<4x256xf32>
    %600 = vector.extract_strided_slice %581 {offsets = [12, 0], sizes = [4, 256], strides = [1, 1]} : vector<24x256xf32> to vector<4x256xf32>
    %601 = vector.extract_strided_slice %581 {offsets = [20, 0], sizes = [4, 256], strides = [1, 1]} : vector<24x256xf32> to vector<4x256xf32>
    %cst_265 = arith.constant dense<0.000000e+00> : vector<256x256xf32>
    %602 = tpu.matmul %599, %600, %cst_265 {dimension_numbers = #tpu.dot_dimension_numbers<[0], [0], [1], [1], [0, 1, 1, 1], [], []>} : vector<4x256xf32>, vector<4x256xf32>, vector<256x256xf32> -> vector<256x256xf32>
    %cst_266 = arith.constant 5.000000e-01 : f32
    %603 = vector.broadcast %cst_266 : f32 to vector<256x256xf32>
    %604 = arith.mulf %602, %603 : vector<256x256xf32>
    %cst_267 = arith.constant dense<0xFF800000> : vector<256xf32>
    %605 = vector.multi_reduction <maximumf>, %604, %cst_267 [1] : vector<256x256xf32> to vector<256xf32>
    %606 = vector.shape_cast %605 : vector<256xf32> to vector<256x1xf32>
    %607 = vector.broadcast %606 : vector<256x1xf32> to vector<256x256xf32>
    %608 = arith.subf %604, %607 : vector<256x256xf32>
    %609 = math.exp %608 : vector<256x256xf32>
    %cst_268 = arith.constant dense<0.000000e+00> : vector<256xf32>
    %610 = vector.multi_reduction <add>, %609, %cst_268 [1] : vector<256x256xf32> to vector<256xf32>
    %611 = vector.shape_cast %610 : vector<256xf32> to vector<256x1xf32>
    %612 = tpu.reciprocal %611 {approx = true} : vector<256x1xf32> -> vector<256x1xf32>
    %613 = vector.broadcast %612 : vector<256x1xf32> to vector<256x256xf32>
    %614 = arith.mulf %609, %613 : vector<256x256xf32>
    %cst_269 = arith.constant dense<0.000000e+00> : vector<4x256xf32>
    %615 = tpu.matmul %601, %614, %cst_269 {dimension_numbers = #tpu.dot_dimension_numbers<[1], [1], [0], [0], [0, 0, 1, 0], [], []>} : vector<4x256xf32>, vector<256x256xf32>, vector<4x256xf32> -> vector<4x256xf32>
    %616 = tpu.concatenate %598, %615 in 0 : vector<4x256xf32>, vector<4x256xf32> -> vector<8x256xf32>
    %c0_270 = arith.constant 0 : index
    %c0_271 = arith.constant 0 : index
    %617 = vector.load %arg20[%c0_270, %c0_271] : memref<8x8xf32, #tpu.memory_space<vmem>>, vector<8x8xf32>
    %cst_272 = arith.constant dense<0.000000e+00> : vector<8x256xf32>
    %618 = tpu.matmul %617, %616, %cst_272 {dimension_numbers = #tpu.dot_dimension_numbers<[1], [0], [0], [1], [0, 0, 1, 1], [], []>} : vector<8x8xf32>, vector<8x256xf32>, vector<8x256xf32> -> vector<8x256xf32>
    %c0_273 = arith.constant 0 : index
    %c0_274 = arith.constant 0 : index
    %619 = vector.load %arg21[%c0_273, %c0_274] : memref<8x1xf32, #tpu.memory_space<vmem>>, vector<8x1xf32>
    %620 = arith.addf %579, %618 : vector<8x256xf32>
    %621 = vector.broadcast %619 : vector<8x1xf32> to vector<8x256xf32>
    %622 = arith.mulf %621, %620 : vector<8x256xf32>
    %c0_275 = arith.constant 0 : index
    %c0_276 = arith.constant 0 : index
    %623 = vector.load %arg22[%c0_275, %c0_276] : memref<8x1xf32, #tpu.memory_space<vmem>>, vector<8x1xf32>
    %624 = vector.broadcast %623 : vector<8x1xf32> to vector<8x256xf32>
    %625 = arith.addf %622, %624 : vector<8x256xf32>
    %626 = tpu.concatenate %5, %577, %625 in 0 : vector<4x256xf32>, vector<4x256xf32>, vector<8x256xf32> -> vector<16x256xf32>
    %c0_277 = arith.constant 0 : index
    %c0_278 = arith.constant 0 : index
    %c0_279 = arith.constant 0 : index
    %627 = vector.load %arg23[%c0_277, %c0_278, %c0_279] : memref<1x16x256xf32, #tpu.memory_space<vmem>>, vector<1x16x256xf32>
    %628 = vector.shape_cast %627 : vector<1x16x256xf32> to vector<16x256xf32>
    %629 = vector.shape_cast %626 : vector<16x256xf32> to vector<1x16x256xf32>
    tpu.vector_store %arg23[%c0_277, %c0_278, %c0_279], %629 {strides = array<i32>} : memref<1x16x256xf32, #tpu.memory_space<vmem>>, vector<1x16x256xf32>,
    return
  }
  func.func @transform_0(%arg0: i32) -> (i32, i32, i32) {
    %c0_i32 = arith.constant 0 : i32
    %c0_i32_0 = arith.constant 0 : i32
    %c0_i32_1 = arith.constant 0 : i32
    return %arg0, %c0_i32, %c0_i32_0 : i32, i32, i32
  }
  func.func @transform_1(%arg0: i32) -> (i32, i32, i32) {
    %c0_i32 = arith.constant 0 : i32
    %c0_i32_0 = arith.constant 0 : i32
    %c0_i32_1 = arith.constant 0 : i32
    return %arg0, %c0_i32, %c0_i32_0 : i32, i32, i32
  }
  func.func @transform_2(%arg0: i32) -> (i32, i32, i32) {
    %c0_i32 = arith.constant 0 : i32
    %c0_i32_0 = arith.constant 0 : i32
    %c0_i32_1 = arith.constant 0 : i32
    return %arg0, %c0_i32, %c0_i32_0 : i32, i32, i32
  }
  func.func @transform_3(%arg0: i32) -> (i32, i32) {
    %c0_i32 = arith.constant 0 : i32
    %c0_i32_0 = arith.constant 0 : i32
    %c0_i32_1 = arith.constant 0 : i32
    return %c0_i32, %c0_i32_0 : i32, i32
  }
  func.func @transform_4(%arg0: i32) -> (i32, i32) {
    %c0_i32 = arith.constant 0 : i32
    %c0_i32_0 = arith.constant 0 : i32
    %c0_i32_1 = arith.constant 0 : i32
    return %c0_i32, %c0_i32_0 : i32, i32
  }
  func.func @transform_5(%arg0: i32) -> (i32, i32) {
    %c0_i32 = arith.constant 0 : i32
    %c0_i32_0 = arith.constant 0 : i32
    %c0_i32_1 = arith.constant 0 : i32
    return %c0_i32, %c0_i32_0 : i32, i32
  }
  func.func @transform_6(%arg0: i32) -> (i32, i32) {
    %c0_i32 = arith.constant 0 : i32
    %c0_i32_0 = arith.constant 0 : i32
    %c0_i32_1 = arith.constant 0 : i32
    return %c0_i32, %c0_i32_0 : i32, i32
  }
  func.func @transform_7(%arg0: i32) -> (i32, i32) {
    %c0_i32 = arith.constant 0 : i32
    %c0_i32_0 = arith.constant 0 : i32
    %c0_i32_1 = arith.constant 0 : i32
    return %c0_i32, %c0_i32_0 : i32, i32
  }
  func.func @transform_8(%arg0: i32) -> (i32, i32) {
    %c0_i32 = arith.constant 0 : i32
    %c0_i32_0 = arith.constant 0 : i32
    %c0_i32_1 = arith.constant 0 : i32
    return %c0_i32, %c0_i32_0 : i32, i32
  }
  func.func @transform_9(%arg0: i32) -> (i32, i32) {
    %c0_i32 = arith.constant 0 : i32
    %c0_i32_0 = arith.constant 0 : i32
    %c0_i32_1 = arith.constant 0 : i32
    return %c0_i32, %c0_i32_0 : i32, i32
  }
  func.func @transform_10(%arg0: i32) -> (i32, i32) {
    %c0_i32 = arith.constant 0 : i32
    %c0_i32_0 = arith.constant 0 : i32
    %c0_i32_1 = arith.constant 0 : i32
    return %c0_i32, %c0_i32_0 : i32, i32
  }
  func.func @transform_11(%arg0: i32) -> (i32, i32) {
    %c0_i32 = arith.constant 0 : i32
    %c0_i32_0 = arith.constant 0 : i32
    %c0_i32_1 = arith.constant 0 : i32
    return %c0_i32, %c0_i32_0 : i32, i32
  }
  func.func @transform_12(%arg0: i32) -> (i32, i32) {
    %c0_i32 = arith.constant 0 : i32
    %c0_i32_0 = arith.constant 0 : i32
    %c0_i32_1 = arith.constant 0 : i32
    return %c0_i32, %c0_i32_0 : i32, i32
  }
  func.func @transform_13(%arg0: i32) -> (i32, i32) {
    %c0_i32 = arith.constant 0 : i32
    %c0_i32_0 = arith.constant 0 : i32
    %c0_i32_1 = arith.constant 0 : i32
    return %c0_i32, %c0_i32_0 : i32, i32
  }
  func.func @transform_14(%arg0: i32) -> (i32, i32) {
    %c0_i32 = arith.constant 0 : i32
    %c0_i32_0 = arith.constant 0 : i32
    %c0_i32_1 = arith.constant 0 : i32
    return %c0_i32, %c0_i32_0 : i32, i32
  }
  func.func @transform_15(%arg0: i32) -> (i32, i32) {
    %c0_i32 = arith.constant 0 : i32
    %c0_i32_0 = arith.constant 0 : i32
    %c0_i32_1 = arith.constant 0 : i32
    return %c0_i32, %c0_i32_0 : i32, i32
  }
  func.func @transform_16(%arg0: i32) -> (i32, i32) {
    %c0_i32 = arith.constant 0 : i32
    %c0_i32_0 = arith.constant 0 : i32
    %c0_i32_1 = arith.constant 0 : i32
    return %c0_i32, %c0_i32_0 : i32, i32
  }
  func.func @transform_17(%arg0: i32) -> (i32, i32) {
    %c0_i32 = arith.constant 0 : i32
    %c0_i32_0 = arith.constant 0 : i32
    %c0_i32_1 = arith.constant 0 : i32
    return %c0_i32, %c0_i32_0 : i32, i32
  }
  func.func @transform_18(%arg0: i32) -> (i32, i32) {
    %c0_i32 = arith.constant 0 : i32
    %c0_i32_0 = arith.constant 0 : i32
    %c0_i32_1 = arith.constant 0 : i32
    return %c0_i32, %c0_i32_0 : i32, i32
  }
  func.func @transform_19(%arg0: i32) -> (i32, i32) {
    %c0_i32 = arith.constant 0 : i32
    %c0_i32_0 = arith.constant 0 : i32
    %c0_i32_1 = arith.constant 0 : i32
    return %c0_i32, %c0_i32_0 : i32, i32
  }
  func.func @transform_20(%arg0: i32) -> (i32, i32) {
    %c0_i32 = arith.constant 0 : i32
    %c0_i32_0 = arith.constant 0 : i32
    %c0_i32_1 = arith.constant 0 : i32
    return %c0_i32, %c0_i32_0 : i32, i32
  }
  func.func @transform_21(%arg0: i32) -> (i32, i32) {
    %c0_i32 = arith.constant 0 : i32
    %c0_i32_0 = arith.constant 0 : i32
    %c0_i32_1 = arith.constant 0 : i32
    return %c0_i32, %c0_i32_0 : i32, i32
  }
  func.func @transform_22(%arg0: i32) -> (i32, i32, i32) {
    %c0_i32 = arith.constant 0 : i32
    %c0_i32_0 = arith.constant 0 : i32
    %c0_i32_1 = arith.constant 0 : i32
    return %arg0, %c0_i32, %c0_i32_0 : i32, i32, i32
  }
}

</mosaic_0001>

<bundles_post_ra>
// kernel: mbfd_forward.1
= control target key start
LH: loop header
LB: loop body
LE: loop exit
PB: predicated region body
PF: predicated region fallthrough
CT: control target
= control target key end

     0   :  { %s9137_s0 = inlined_call_operand.vmem [shape: f32[2,36,256], index: 0, kind: input, shape index: {}]   ;;  %s9138_s1 = inlined_call_operand.vmem [shape: f32[2,36,256], index: 1, kind: input, shape index: {}]   ;;  %s9139_s2 = inlined_call_operand.vmem [shape: f32[2,8,256], index: 2, kind: input, shape index: {}]   ;;  %s9140_s3 = inlined_call_operand.vmem [shape: f32[4,36], index: 3, kind: input, shape index: {}]   ;;  %s9141_s4 = inlined_call_operand.vmem [shape: f32[2,4], index: 4, kind: input, shape index: {}]   ;;  %s9142_s5 = inlined_call_operand.vmem [shape: f32[2,1], index: 5, kind: input, shape index: {}]   ;;  %s9143_s6 = inlined_call_operand.vmem [shape: f32[2,9], index: 6, kind: input, shape index: {}]   ;;  %s9144_s7 = inlined_call_operand.vmem [shape: f32[2,1], index: 7, kind: input, shape index: {}]   ;;  %s9145_s8 = inlined_call_operand.vmem [shape: f32[9,256], index: 8, kind: input, shape index: {}]   ;;  %s9146_s9 = inlined_call_operand.vmem [shape: f32[4,4], index: 9, kind: input, shape index: {}]   ;;  %s9147_s10 = inlined_call_operand.vmem [shape: f32[4,1], index: 10, kind: input, shape index: {}]   ;;  %s9148_s11 = inlined_call_operand.vmem [shape: f32[4,3], index: 11, kind: input, shape index: {}]   ;;  %s9149_s12 = inlined_call_operand.vmem [shape: f32[4,3], index: 12, kind: input, shape index: {}]   ;;  %s9150_s13 = inlined_call_operand.vmem [shape: f32[4,1], index: 13, kind: input, shape index: {}]   ;;  %s9151_s14 = inlined_call_operand.vmem [shape: f32[256,64], index: 14, kind: input, shape index: {}]   ;;  %s9152_s15 = inlined_call_operand.vmem [shape: f32[64,256], index: 15, kind: input, shape index: {}]   ;;  %s9153_s16 = inlined_call_operand.vmem [shape: f32[192,64], index: 16, kind: input, shape index: {}]   ;;  %s9154_s17 = inlined_call_operand.vmem [shape: f32[192,64], index: 17, kind: input, shape index: {}]   ;;  %s9155_s18 = inlined_call_operand.vmem [shape: f32[24,8], index: 18, kind: input, shape index: {}]   ;;  %s9156_s19 = inlined_call_operand.vmem [shape: f32[8,8], index: 19, kind: input, shape index: {}]   ;;  %s9157_s20 = inlined_call_operand.vmem [shape: f32[8,1], index: 20, kind: input, shape index: {}]   ;;  %s9158_s21 = inlined_call_operand.vmem [shape: f32[8,1], index: 21, kind: input, shape index: {}]   ;;  %s9159_s22 = inlined_call_operand.vmem [shape: f32[2,16,256], index: 22, kind: output, shape index: {}]  }
   0x1   :  { %9229 = sst [smem:[#allocation42_spill]] %s9137_s0 }
   0x2   :  { %9230 = sst [smem:[#allocation43_spill]] %s9138_s1 }
   0x3   :  { %9231 = sst [smem:[#allocation44_spill]] %s9139_s2 }
   0x4   :  { %9232 = sst [smem:[#allocation45_spill]] %s9140_s3  ;;  %s6722_s3 = smov 0  }
   0x5   :  { %9233 = sst [smem:[#allocation46_spill]] %s9141_s4 }
   0x6   :  { %9234 = sst [smem:[#allocation47_spill]] %s9142_s5 }
   0x7   :  { %9235 = sst [smem:[#allocation48_spill]] %s9143_s6 }
   0x8 LB: > { %s5476_s28 = sadd.s32 4294967295, %s6592_s3   ;;  %p5480_p0 = scmp.ge.s32.totalorder %s6592_s3, 1  ;;  %s6592_s3 = sphi %s6722_s3, %s32_s3  }
   0x9   : > { %p632_p1 = scmp.lt.s32.totalorder %s6592_s3, 3 }
   0xb   : > { %p633_p2 = pnand %p5480_p0, %p632_p1 }
   0xd   : > { %636 = sbr.rel (%p633_p2) target bundleno = 2785 (0xae1), region = 108 }
  0x14   : > { %p704_p3 = scmp.lt.s32.totalorder %s5476_s28, 1  ;;  %v9162_v0 = vmov 0.0   ;;  %s9236_s0 = sld [smem:[#allocation42_spill]]  ;;  %vm749_vm0 = vcmask 1043456   ;;  %vm834_vm1 = vcmask 31744   ;;  %vm745_vm2 = vcmask 293888  }
  0x15   : > { %820 = vmatprep.mubr.f32.mxu0 %v9162_v0  ;;  %1217 = vmatprep.mubr.f32.mxu1 %v9162_v0  ;;  %s9237_s24 = sld [smem:[#allocation43_spill]]  ;;  %s9238_s2 = sld [smem:[#allocation46_spill]]  ;;  %v2303_v32 = vld [vmem:[%s9151_s14 + $0x80] sm:$0xff]  ;;  %v2304_v33 = vld [vmem:[%s9151_s14 + $0x88] sm:$0xff]  ;;  %v2305_v38 = vld [vmem:[%s9151_s14 + $0x90] sm:$0xff]  ;;  %vm6595_vm3 = vmmov 0  }
  0x16   : > { %s9421_s28 = smov (!%p704_p3, %s5476_s28), 1  ;;  %s9239_s30 = sld [smem:[#allocation45_spill]]  ;;  %v5829_v35 = vpack.c.bf16 %v2304_v33, %v2303_v32  ;;  %v2287_v36 = vld [vmem:[%s9151_s14] sm:$0xff]  ;;  %v2288_v37 = vld [vmem:[%s9151_s14 + $0x8] sm:$0xff]  ;;  %v2306_v39 = vld [vmem:[%s9151_s14 + $0x98] sm:$0xff]  ;;  %vm2480_vm4 = vcmask 523264  }
  0x17   : > { %s6077_s29 = smul.u32 80, %s9421_s28  ;;  %v5831_v40 = vpack.c.bf16 %v2288_v37, %v2287_v36  ;;  %v5833_v41 = vpack.c.bf16 %v2306_v39, %v2305_v38  ;;  %v2289_v42 = vld [vmem:[%s9151_s14 + $0x10] sm:$0xff]  ;;  %v2290_v43 = vld [vmem:[%s9151_s14 + $0x18] sm:$0xff]  ;;  %v2307_v44 = vld [vmem:[%s9151_s14 + $0xa0] sm:$0xff]  ;;  %s5609_s1 = sshll.u32 %s9421_s28, 4  ;;  %vm3103_vm5 = vcmask 64512  }
  0x18   : > { %v2308_v45 = vld [vmem:[%s9151_s14 + $0xa8] sm:$0xff]  ;;  %v5835_v46 = vpack.c.bf16 %v2290_v43, %v2289_v42  ;;  %v2291_v48 = vld [vmem:[%s9151_s14 + $0x20] sm:$0xff]  ;;  %v2309_v50 = vld [vmem:[%s9151_s14 + $0xb0] sm:$0xff]  ;;  %s9370_s26 = sld [smem:[#allocation47_spill]] }
  0x19   : > { %v5837_v47 = vpack.c.bf16 %v2308_v45, %v2307_v44  ;;  %v2292_v49 = vld [vmem:[%s9151_s14 + $0x28] sm:$0xff]  ;;  %v2310_v51 = vld [vmem:[%s9151_s14 + $0xb8] sm:$0xff]  ;;  %v2293_v54 = vld [vmem:[%s9151_s14 + $0x30] sm:$0xff] }
  0x1a   : > { %s6738_s23 = scalar_lea.vmem %s9236_s0, %s6077_s29  ;;  %v5839_v52 = vpack.c.bf16 %v2292_v49, %v2291_v48  ;;  %v5841_v53 = vpack.c.bf16 %v2310_v51, %v2309_v50  ;;  %v2294_v55 = vld [vmem:[%s9151_s14 + $0x38] sm:$0xff]  ;;  %v2311_v56 = vld [vmem:[%s9151_s14 + $0xc0] sm:$0xff]  ;;  %v2312_v57 = vld [vmem:[%s9151_s14 + $0xc8] sm:$0xff] }
  0x1b   : > { %v725_v1 = vld [vmem:[%s6738_s23 + $0x8] sm:$0xff]  ;;  %v727_v2 = vld [vmem:[%s6738_s23 + $0x18] sm:$0xff]  ;;  %v724_v3 = vld [vmem:[%s6738_s23] sm:$0xff]  ;;  %s6751_s6 = scalar_lea.vmem %s9237_s24, %s6077_s29  ;;  %v5843_v58 = vpack.c.bf16 %v2294_v55, %v2293_v54  ;;  %v5845_v59 = vpack.c.bf16 %v2312_v57, %v2311_v56  ;;  %s9371_s29 = sld [smem:[#allocation48_spill]] }
  0x1c   : > { %v5821_v4 = vpack.c.bf16 %v727_v2, %v725_v1  ;;  %v726_v5 = vld [vmem:[%s6738_s23 + $0x10] sm:$0xff]  ;;  %v729_v6 = vld [vmem:[%s6738_s23 + $0x28] sm:$0xff]  ;;  %v731_v7 = vld [vmem:[%s6738_s23 + $0x38] sm:$0xff] }
  0x1d   : > { %v5823_v8 = vpack.c.bf16 %v726_v5, %v724_v3  ;;  %v5825_v9 = vpack.c.bf16 %v731_v7, %v729_v6  ;;  %v728_v10 = vld [vmem:[%s6738_s23 + $0x20] sm:$0xff]  ;;  %v730_v11 = vld [vmem:[%s6738_s23 + $0x30] sm:$0xff]  ;;  %v737_v13 = vld [vmem:[%s6751_s6 + $0x18] sm:$0xff] }
  0x1e   : > { %5822 = vmatprep.subr.bf16.mxu0 %v5821_v4  ;;  %v5827_v12 = vpack.c.bf16 %v730_v11, %v728_v10  ;;  %v736_v14 = vld [vmem:[%s6751_s6 + $0x10] sm:$0xff]  ;;  %5497 = vmatprep.subr.msk.mxu1 %vm749_vm0, %v737_v13  ;;  %v733_v15 = vld [vmem:[%s6738_s23 + $0x48] sm:$0xf]  ;;  %v6760_v16 = vld [vmem:[%s9238_s2] sm:$0x3]  ;;  %v1302_v27 = vrot.slane %v737_v13, 4 }
  0x1f   : > { %5824 = vmatpush1.bf16.msra.mxu0 %v5823_v8  ;;  %v6763_v17 = vld [vmem:[%s6751_s6 + $0x28] sm:$0xff]  ;;  %5498 = vmatpush1.msk.msra.mxu1 %vm749_vm0, %v736_v14  ;;  %v6767_v18 = vld [vmem:[%s6751_s6 + $0x20] sm:$0xff]  ;;  %v741_v20 = vld [vmem:[%s6751_s6 + $0x38] sm:$0xff]  ;;  %v1301_v28 = vrot.slane %v736_v14, 4 }
  0x20   : > { %5826 = vmatprep.subr.bf16.mxu0 %v5825_v9  ;;  %5499 = vmatmul.mubr.msk.f32.vlgmr.msra.gmra.mrb[0].mxu1 %vm834_vm1, %v6760_v16  ;;  %v732_v19 = vld [vmem:[%s6738_s23 + $0x40] sm:$0xf]  ;;  %v735_v22 = vld [vmem:[%s6751_s6 + $0x8] sm:$0xff]  ;;  %v740_v25 = vld [vmem:[%s6751_s6 + $0x30] sm:$0xff]  ;;  %v1610_v29 = vrot.slane %v6763_v17, 4  ;;  %v1609_v30 = vrot.slane %v6767_v18, 4 }
  0x21   : > { %5505 = vmatprep.subr.msk.mxu1 %vm749_vm0, %v6763_v17  ;;  %1525 = vmatprep.mubr.f32.mxu1 %v9162_v0  ;;  %v744_v21 = vld [vmem:[%s9239_s30] sm:$0xf]  ;;  %v994_v23 = vrot.slane %v735_v22, 4  ;;  %v1918_v31 = vrot.slane %v741_v20, 4  ;;  %v1917_v34 = vrot.slane %v740_v25, 4  ;;  %v2296_v61 = vld [vmem:[%s9151_s14 + $0x48] sm:$0xff] }
  0x22   : > { %5506 = vmatpush1.msk.msra.mxu1 %vm749_vm0, %v6767_v18  ;;  %v734_v24 = vld [vmem:[%s6751_s6] sm:$0xff]  ;;  %v2313_v62 = vld [vmem:[%s9151_s14 + $0xd0] sm:$0xff]  ;;  %v2314_v63 = vld [vmem:[%s9151_s14 + $0xd8] sm:$0xff]  ;;  %s5610_s30 = sshll.u32 %s9421_s28, 5 }
  0x23   : > { %5828 = vmatpush1.bf16.msra.mxu0 %v5827_v12  ;;  %5513 = vmatprep.subr.msk.mxu1 %vm749_vm0, %v741_v20  ;;  %v993_v26 = vrot.slane %v734_v24, 4  ;;  %v2295_v60 = vld [vmem:[%s9151_s14 + $0x40] sm:$0xff]  ;;  %v5849_v2 = vpack.c.bf16 %v2314_v63, %v2313_v62  ;;  %v2297_v3 = vld [vmem:[%s9151_s14 + $0x50] sm:$0xff]  ;;  %v2298_v4 = vld [vmem:[%s9151_s14 + $0x58] sm:$0xff]  ;;  %s723_s23 = scalar_lea.vmem %s9159_s22, %s5610_s30 }
  0x24   : > { %5487 = vmatprep.subr.msk.mxu0 %vm749_vm0, %v733_v15  ;;  %5507 = vmatmul.mubr.msk.f32.vlgmr.msra.gmra.mrb[2].mxu1 %vm834_vm1, %v6760_v16  ;;  %v5847_v1 = vpack.c.bf16 %v2296_v61, %v2295_v60  ;;  %v2315_v5 = vld [vmem:[%s9151_s14 + $0xe0] sm:$0xff]  ;;  %v2316_v6 = vld [vmem:[%s9151_s14 + $0xe8] sm:$0xff]  ;;  %v5851_v7 = vpack.c.bf16 %v2298_v4, %v2297_v3  ;;  %v2317_v11 = vld [vmem:[%s9151_s14 + $0xf0] sm:$0xff] }
  0x25   : > { %5514 = vmatpush1.msk.msra.mxu1 %vm749_vm0, %v740_v25  ;;  %1833 = vmatprep.mubr.f32.mxu1 %v9162_v0  ;;  %v5853_v8 = vpack.c.bf16 %v2316_v6, %v2315_v5  ;;  %v2299_v9 = vld [vmem:[%s9151_s14 + $0x60] sm:$0xff]  ;;  %v2300_v10 = vld [vmem:[%s9151_s14 + $0x68] sm:$0xff]  ;;  %v2318_v12 = vld [vmem:[%s9151_s14 + $0xf8] sm:$0xff] }
  0x26   : > { %v5855_v13 = vpack.c.bf16 %v2300_v10, %v2299_v9  ;;  %v5857_v14 = vpack.c.bf16 %v2318_v12, %v2317_v11  ;;  %v2301_v15 = vld [vmem:[%s9151_s14 + $0x70] sm:$0xff]  ;;  %v743_v20 = vld [vmem:[%s6751_s6 + $0x48] sm:$0xf]  ;;  %v2894_v54 = vld [vmem:[%s9154_s17 + $0x80] sm:$0xff]  ;;  %v9161_v11 = vmov 1  }
  0x27   : > { %5488 = vmatpush1.msk.msra.mxu0 %vm749_vm0, %v732_v19  ;;  %5521 = vmatprep.subr.msk.mxu1 %vm749_vm0, %v743_v20  ;;  %v2478_v33 = vld [vmem:[%s9153_s16 + $0x30] sm:$0xff]  ;;  %v2895_v55 = vld [vmem:[%s9154_s17 + $0x88] sm:$0xff]  ;;  %v2897_v62 = vld [vmem:[%s9154_s17 + $0x98] sm:$0xff] }
  0x28   : > { %5489 = vmatmul.mubr.msk.f32.vlgmr.msra.gmra.mrb[0].mxu0 %vm745_vm2, %v744_v21  ;;  %5490 = vmatprep.subr.msk.mxu0 %vm749_vm0, %v735_v22  ;;  %v742_v21 = vld [vmem:[%s6751_s6 + $0x40] sm:$0xf]  ;;  %v9164_v22 = vmov 0   ;;  %v5922_v60 = vpack.c.bf16 %v2895_v55, %v2894_v54  ;;  %v2896_v61 = vld [vmem:[%s9154_s17 + $0x90] sm:$0xff]  ;;  %s9260_s6 = sld [smem:[#allocation44_spill]]  ;;  %v2649_v54 = vld [vmem:[%s9153_s16 + $0x48] sm:$0xff] }
  0x29   : > { %5491 = vmatpush1.msk.msra.mxu0 %vm749_vm0, %v734_v24  ;;  %908 = vmatprep.mubr.f32.mxu0 %v9162_v0  ;;  %v2473_v24 = vld [vmem:[%s9153_s16 + $0x8] sm:$0xff]  ;;  %v5925_v63 = vpack.c.bf16 %v2897_v62, %v2896_v61  ;;  %v2900_v6 = vld [vmem:[%s9154_s17 + $0xb0] sm:$0xff]  ;;  %v2640_v10 = vld [vmem:[%s9149_s12] sm:$0xf] }
  0x2a   : > { %5493 = vmatprep.subr.msk.mxu0 %vm749_vm0, %v994_v23  ;;  %5515 = vmatmul.mubr.msk.f32.vlgmr.msra.gmra.mrb[4].mxu1 %vm834_vm1, %v6760_v16  ;;  %v6597_v23 = vmov 0.0|0.0   ;;  %v2984_v12 = vld [vmem:[%s9150_s13] sm:$0xf]  ;;  %v2654_v62 = vld [vmem:[%s9153_s16 + $0x70] sm:$0xff] }
  0x2b   : > { %2141 = vmatprep.mubr.f32.mxu1 %v9162_v0  ;;  %5522 = vmatpush1.msk.msra.mxu1 %vm749_vm0, %v742_v21 }
  0x2c   : > { %5492 = vmatmul.mubr.msk.f32.vlgmr.msra.gmra.mrb[2].mxu0 %vm834_vm1, %v6760_v16  ;;  %5702 = vmatprep.subr.mxu1 %v9162_v0 }
  0x2d   : > { %5494 = vmatpush1.msk.msra.mxu0 %vm749_vm0, %v993_v26  ;;  %1063 = vmatprep.mubr.f32.mxu0 %v9162_v0  ;;  %v2474_v26 = vld [vmem:[%s9153_s16 + $0x10] sm:$0xff] }
  0x2e   : > { %5501 = vmatprep.subr.msk.mxu0 %vm749_vm0, %v1302_v27  ;;  %5523 = vmatmul.mubr.msk.f32.vlgmr.msra.gmra.mrb[6].mxu1 %vm834_vm1, %v6760_v16  ;;  %v2475_v27 = vld [vmem:[%s9153_s16 + $0x18] sm:$0xff]  ;;  %s7049_s25 = scalar_lea.vmem %s9260_s6, %s5609_s1 }
  0x2f   : > { %5704 = vmatprep.mubr.msk.f32.mxu1 %vm6595_vm3, %v9162_v0  ;;  %6099 = vset.pattern.permute.xlu0 %v9164_v22  ;;  %v3099_v9 = vld [vmem:[%s7049_s25 + $0x8] sm:$0xff] }
  0x30   : > { %5495 = vmatmul.mubr.msk.f32.vlgmr.msra.gmra.mrb[4].mxu0 %vm834_vm1, %v6760_v16  ;;  %6100 = vset.pattern.permute.xlu1 %v9164_v22 }
  0x31   : > { %5502 = vmatpush1.msk.msra.mxu0 %vm749_vm0, %v1301_v28  ;;  %1371 = vmatprep.mubr.f32.mxu0 %v9162_v0  ;;  %v6951_v28 = vld [vmem:[%s9148_s11] sm:$0xf] }
  0x32   : > { %5509 = vmatprep.subr.msk.mxu0 %vm749_vm0, %v1610_v29  ;;  %v5865_v29 = vpack.c.bf16 %v2475_v27, %v2474_v26  ;;  %2643 = vperm.xlu1 %6100, %v2640_v10   ;;  %v3100_v27 = vld [vmem:[%s9155_s18] sm:$0xff] }
  0x34   : > { %5503 = vmatmul.mubr.msk.f32.vlgmr.msra.gmra.mrb[6].mxu0 %vm834_vm1, %v6760_v16 }
  0x35   : > { %5510 = vmatpush1.msk.msra.mxu0 %vm749_vm0, %v1609_v30  ;;  %1679 = vmatprep.mubr.f32.mxu0 %v9162_v0  ;;  %v2476_v30 = vld [vmem:[%s9153_s16 + $0x20] sm:$0xff] }
  0x36   : > { %5517 = vmatprep.subr.msk.mxu0 %vm749_vm0, %v1918_v31  ;;  %v2477_v31 = vld [vmem:[%s9153_s16 + $0x28] sm:$0xff]  ;;  %6101 = vset.pattern.permute.xlu1 %v9161_v11 }
  0x37   : > { %v5868_v32 = vpack.c.bf16 %v2477_v31, %v2476_v30  ;;  %2805 = vperm.xlu1 %6101, %v6951_v28   ;;  %v3101_v31 = vld [vmem:[%s9155_s18 + $0x8] sm:$0xff] }
  0x38   : > { %5511 = vmatmul.mubr.msk.f32.vlgmr.msra.gmra.mrb[8].mxu0 %vm834_vm1, %v6760_v16 }
  0x39   : > { %5518 = vmatpush1.msk.msra.mxu0 %vm749_vm0, %v1917_v34  ;;  %1987 = vmatprep.mubr.f32.mxu0 %v9162_v0  ;;  %v2479_v34 = vld [vmem:[%s9153_s16 + $0x38] sm:$0xff] }
  0x3a   : > { %5830 = vmatprep.subr.bf16.mxu0 %v5829_v35  ;;  %v5871_v35 = vpack.c.bf16 %v2479_v34, %v2478_v33  ;;  %v2561_v33 = vld [vmem:[%s9154_s17 + $0x38] sm:$0xff] }
  0x3c   : > { %5519 = vmatmul.mubr.msk.f32.vlgmr.msra.gmra.mrb[10].mxu0 %vm834_vm1, %v6760_v16  ;;  %v2472_v16 = vld [vmem:[%s9153_s16] sm:$0xff] }
  0x3d   : > { %5832 = vmatpush3.bf16.msra.mxu0 %v5831_v40  ;;  %2383 = vmatprep.mubr.f32.mxu0 %v6763_v17  ;;  %v2302_v17 = vld [vmem:[%s9151_s14 + $0x78] sm:$0xff]  ;;  %v5862_v25 = vpack.c.bf16 %v2473_v24, %v2472_v16  ;;  %v3098_v16 = vld [vmem:[%s7049_s25] sm:$0xff]  ;;  %v2556_v24 = vld [vmem:[%s9154_s17 + $0x10] sm:$0xff] }
  0x3e   : > { %5834 = vmatprep.subr.bf16.mxu0 %v5833_v41  ;;  %v5859_v19 = vpack.c.bf16 %v2302_v17, %v2301_v15  ;;  %v2555_v15 = vld [vmem:[%s9154_s17 + $0x8] sm:$0xff] }
  0x41   : > { %5836 = vmatpush3.bf16.msra.mxu0 %v5835_v46 }
  0x42   : > { %5838 = vmatprep.subr.bf16.mxu0 %v5837_v47 }
  0x45   : > { %5840 = vmatpush3.bf16.msra.mxu0 %v5839_v52 }
  0x46   : > { %5842 = vmatprep.subr.bf16.mxu0 %v5841_v53 }
  0x49   : > { %5844 = vmatpush3.bf16.msra.mxu0 %v5843_v58 }
  0x4a   : > { %5846 = vmatprep.subr.bf16.mxu0 %v5845_v59  ;;  %v2389_v59 = vld [vmem:[%s9146_s9] sm:$0xf] }
  0x4d   : > { %5848 = vmatpush3.bf16.msra.mxu0 %v5847_v1  ;;  %v2898_v1 = vld [vmem:[%s9154_s17 + $0xa0] sm:$0xff] }
  0x4e   : > { %5850 = vmatprep.subr.bf16.mxu0 %v5849_v2  ;;  %v2899_v2 = vld [vmem:[%s9154_s17 + $0xa8] sm:$0xff] }
  0x4f   : > { %v5928_v3 = vpack.c.bf16 %v2899_v2, %v2898_v1  ;;  %v2726_v2 = vld [vmem:[%s9154_s17 + $0x40] sm:$0xff] }
  0x51   : > { %5852 = vmatpush3.bf16.msra.mxu0 %v5851_v7  ;;  %v2901_v7 = vld [vmem:[%s9154_s17 + $0xb8] sm:$0xff] }
  0x52   : > { %5854 = vmatprep.subr.bf16.mxu0 %v5853_v8  ;;  %v5931_v8 = vpack.c.bf16 %v2901_v7, %v2900_v6  ;;  %v2728_v7 = vld [vmem:[%s9154_s17 + $0x50] sm:$0xff] }
  0x55   : > { %5856 = vmatpush3.bf16.msra.mxu0 %v5855_v13  ;;  %v9160_v13 = vmov 2  }
  0x56   : > { %5858 = vmatprep.subr.bf16.mxu0 %v5857_v14  ;;  %6103 = vset.pattern.permute.xlu1 %v9160_v13  ;;  %v2554_v14 = vld [vmem:[%s9154_s17] sm:$0xff] }
  0x57   : > { %2973 = vperm.xlu1 %6103, %v6951_v28   ;;  %v5874_v20 = vpack.c.bf16 %v2555_v15, %v2554_v14  ;;  %v2732_v15 = vld [vmem:[%s9154_s17 + $0x70] sm:$0xff] }
  0x59   : > { %5860 = vmatpush3.bf16.msra.mxu0 %v5859_v19 }
  0x5a   : > { %5861 = vmatprep.subr.bf16.mxu0 %v6597_v23 }
  0x5b   : > { %2979 = vperm.xlu1 %6103, %v2640_v10  }
  0x5c   : > { %2384 = vmatmul.mubr.f32.vlgmr.msra.gmra.mrb[12].mxu0 %v6767_v18  ;;  %v2390_v18 = vld [vmem:[%s9147_s10] sm:$0xf] }
  0x5d   : > { %5723 = vmatprep.mubr.msk.f32.mxu0 %vm6595_vm3, %v9162_v0  ;;  %2393 = vperm.xlu0 %6099, %v2390_v18  }
  0x5e   : > { %5863 = vmatpush3.bf16.msra.mxu0 %v5862_v25  ;;  %v2557_v25 = vld [vmem:[%s9154_s17 + $0x18] sm:$0xff] }
  0x5f   : > { %5864 = vmatprep.subr.bf16.mxu0 %v6597_v23  ;;  %v5877_v26 = vpack.c.bf16 %v2557_v25, %v2556_v24  ;;  %v2818_v24 = vld [vmem:[%s9153_s16 + $0x90] sm:$0xff]  ;;  %v2819_v25 = vld [vmem:[%s9153_s16 + $0x98] sm:$0xff] }
  0x61   : > { %2635 = vperm.xlu0 %6099, %v6951_v28   ;;  %v2558_v28 = vld [vmem:[%s9154_s17 + $0x20] sm:$0xff] }
  0x62   : > { %5866 = vmatpush3.bf16.msra.mxu0 %v5865_v29  ;;  %v2559_v29 = vld [vmem:[%s9154_s17 + $0x28] sm:$0xff] }
  0x63   : > { %5867 = vmatprep.subr.bf16.mxu0 %v6597_v23  ;;  %v5880_v30 = vpack.c.bf16 %v2559_v29, %v2558_v28  ;;  %v2821_v28 = vld [vmem:[%s9153_s16 + $0xa8] sm:$0xff] }
  0x65   : > { %6102 = vset.pattern.permute.xlu0 %v9161_v11 }
  0x66   : > { %5869 = vmatpush3.bf16.msra.mxu0 %v5868_v32  ;;  %2811 = vperm.xlu0 %6102, %v2640_v10   ;;  %v2560_v32 = vld [vmem:[%s9154_s17 + $0x30] sm:$0xff]  ;;  %v2730_v10 = vld [vmem:[%s9154_s17 + $0x60] sm:$0xff] }
  0x67   : > { %5870 = vmatprep.subr.bf16.mxu0 %v6597_v23  ;;  %v5883_v34 = vpack.c.bf16 %v2561_v33, %v2560_v32  ;;  %v2998_v33 = vld [vmem:[%s9152_s15 + $0x8] sm:$0xff] }
  0x6a   : > { %5872 = vmatpush3.bf16.msra.mxu0 %v5871_v35  ;;  %6104 = vset.pattern.permute.xlu0 %v9164_v22  ;;  %v2648_v35 = vld [vmem:[%s9153_s16 + $0x40] sm:$0xff] }
  0x6b   : > { %5873 = vmatprep.subr.bf16.mxu0 %v6597_v23  ;;  %2987 = vperm.xlu0 %6104, %v2984_v12   ;;  %v5886_v55 = vpack.c.bf16 %v2649_v54, %v2648_v35  ;;  %v2731_v12 = vld [vmem:[%s9154_s17 + $0x68] sm:$0xff]  ;;  %v2997_v54 = vld [vmem:[%s9152_s15] sm:$0xff] }
  0x6c   : > { %v5904_v14 = vpack.c.bf16 %v2731_v12, %v2730_v10  ;;  %v3011_v10 = vld [vmem:[%s9152_s15 + $0x70] sm:$0xff] }
  0xdc   : > { %v2394_v17 = vpop.permute.xlu0 %2393 }
  0xf3   : > { %v6970_v36 = vpop.f32.mrb[0].mxu1 }
  0xf4   : > { %9240 = vst [vmem:[#allocation2_spill] sm:$0xff] %v6970_v36  ;;  %v6972_v37 = vpop.f32.mrb[1].mxu1 }
  0xf5   : > { %9241 = vst [vmem:[#allocation3_spill] sm:$0xff] %v6972_v37 }
  0xf7   : > { %v6974_v38 = vpop.f32.mrb[2].mxu1 }
  0xf8   : > { %9242 = vst [vmem:[#allocation4_spill] sm:$0xff] %v6974_v38  ;;  %v6976_v39 = vpop.f32.mrb[3].mxu1 }
  0xf9   : > { %9243 = vst [vmem:[#allocation5_spill] sm:$0xff] %v6976_v39 }
  0xfb   : > { %v6978_v40 = vpop.f32.mrb[0].mxu0 }
  0xfc   : > { %9244 = vst [vmem:[#allocation6_spill] sm:$0xff] %v6978_v40  ;;  %v6980_v41 = vpop.f32.mrb[1].mxu0 }
  0xfd   : > { %9245 = vst [vmem:[#allocation7_spill] sm:$0xff] %v6980_v41  ;;  %v6982_v42 = vpop.f32.mrb[4].mxu1 }
  0xfe   : > { %9246 = vst [vmem:[#allocation8_spill] sm:$0xff] %v6982_v42  ;;  %v6986_v44 = vpop.f32.mrb[5].mxu1 }
  0xff   : > { %v6984_v43 = vpop.f32.mrb[2].mxu0  ;;  %9248 = vst [vmem:[#allocation10_spill] sm:$0xff] %v6986_v44 }
 0x100   : > { %9247 = vst [vmem:[#allocation9_spill] sm:$0xff] %v6984_v43  ;;  %v6988_v45 = vpop.f32.mrb[3].mxu0 }
 0x101   : > { %9249 = vst [vmem:[#allocation11_spill] sm:$0xff] %v6988_v45  ;;  %v7035_v4 = vpop.f32.mrb[6].mxu1 }
 0x102   : > { %9258 = vst [vmem:[#allocation20_spill] sm:$0xff] %v7035_v4  ;;  %v7037_v5 = vpop.f32.mrb[7].mxu1 }
 0x103   : > { %v6990_v46 = vpop.f32.mrb[4].mxu0  ;;  %9259 = vst [vmem:[#allocation21_spill] sm:$0xff] %v7037_v5 }
 0x104   : > { %9250 = vst [vmem:[#allocation12_spill] sm:$0xff] %v6990_v46  ;;  %v6992_v47 = vpop.f32.mrb[5].mxu0 }
 0x105   : > { %9251 = vst [vmem:[#allocation13_spill] sm:$0xff] %v6992_v47 }
 0x107   : > { %v6994_v48 = vpop.f32.mrb[6].mxu0 }
 0x108   : > { %9252 = vst [vmem:[#allocation14_spill] sm:$0xff] %v6994_v48  ;;  %v6996_v49 = vpop.f32.mrb[7].mxu0 }
 0x109   : > { %9253 = vst [vmem:[#allocation15_spill] sm:$0xff] %v6996_v49 }
 0x10b   : > { %v6998_v50 = vpop.f32.mrb[8].mxu0 }
 0x10c   : > { %9254 = vst [vmem:[#allocation16_spill] sm:$0xff] %v6998_v50  ;;  %v7000_v51 = vpop.f32.mrb[9].mxu0 }
 0x10d   : > { %9255 = vst [vmem:[#allocation17_spill] sm:$0xff] %v7000_v51 }
 0x10f   : > { %v7002_v52 = vpop.f32.mrb[10].mxu0 }
 0x110   : > { %9256 = vst [vmem:[#allocation18_spill] sm:$0xff] %v7002_v52  ;;  %v7004_v53 = vpop.f32.mrb[11].mxu0 }
 0x111   : > { %9257 = vst [vmem:[#allocation19_spill] sm:$0xff] %v7004_v53 }
 0x12f   : > { %v5643_v56 = vpop.f32.mrb[12].mxu0 }
 0x130   : > { %v5644_v57 = vpop.f32.mrb[13].mxu0 }
 0x131   : > { %v5645_v58 = vadd.f32 %v5644_v57, %v5643_v56  ;;  %v2650_v56 = vld [vmem:[%s9153_s16 + $0x50] sm:$0xff]  ;;  %v2651_v57 = vld [vmem:[%s9153_s16 + $0x58] sm:$0xff] }
 0x133   : > { %5703 = vmatpush3.msk.msra.mxu1 %vm749_vm0, %v5645_v58  ;;  %v5889_v58 = vpack.c.bf16 %v2651_v57, %v2650_v56  ;;  %v3004_v56 = vld [vmem:[%s9152_s15 + $0x38] sm:$0xff] }
 0x134   : > { %5705 = vmatmul.mubr.msk.f32.vlgmr.msra.gmra.mrb[8].mxu1 %vm834_vm1, %v2389_v59  ;;  %5921 = vmatprep.subr.bf16.mxu1 %v6597_v23  ;;  %v2652_v59 = vld [vmem:[%s9153_s16 + $0x60] sm:$0xff] }
 0x135   : > { %5923 = vmatpush3.bf16.msra.mxu1 %v5922_v60  ;;  %5818 = vmatprep.mubr.msk.f32.mxu1 %vm6595_vm3, %v9162_v0  ;;  %v2653_v60 = vld [vmem:[%s9153_s16 + $0x68] sm:$0xff] }
 0x136   : > { %5924 = vmatprep.subr.bf16.mxu1 %v6597_v23  ;;  %v5892_v61 = vpack.c.bf16 %v2653_v60, %v2652_v59  ;;  %v3003_v59 = vld [vmem:[%s9152_s15 + $0x30] sm:$0xff] }
 0x139   : > { %5926 = vmatpush3.bf16.msra.mxu1 %v5925_v63  ;;  %v2655_v63 = vld [vmem:[%s9153_s16 + $0x78] sm:$0xff] }
 0x13a   : > { %5927 = vmatprep.subr.bf16.mxu1 %v6597_v23  ;;  %v5895_v1 = vpack.c.bf16 %v2655_v63, %v2654_v62  ;;  %v3008_v62 = vld [vmem:[%s9152_s15 + $0x58] sm:$0xff]  ;;  %v3005_v63 = vld [vmem:[%s9152_s15 + $0x40] sm:$0xff] }
 0x13d   : > { %5929 = vmatpush3.bf16.msra.mxu1 %v5928_v3  ;;  %v2727_v3 = vld [vmem:[%s9154_s17 + $0x48] sm:$0xff] }
 0x13e   : > { %5930 = vmatprep.subr.bf16.mxu1 %v6597_v23  ;;  %v5898_v6 = vpack.c.bf16 %v2727_v3, %v2726_v2  ;;  %v3007_v2 = vld [vmem:[%s9152_s15 + $0x50] sm:$0xff]  ;;  %v3010_v3 = vld [vmem:[%s9152_s15 + $0x68] sm:$0xff] }
 0x141   : > { %5932 = vmatpush3.bf16.msra.mxu1 %v5931_v8  ;;  %v2729_v8 = vld [vmem:[%s9154_s17 + $0x58] sm:$0xff] }
 0x142   : > { %3113 = vmatprep.subr.mxu1 %v3099_v9  ;;  %v5901_v9 = vpack.c.bf16 %v2729_v8, %v2728_v7  ;;  %v5943_v7 = vpack.c.bf16 %v3007_v2, %v3005_v63 }
 0x207   : > { %v2468_v19 = vpop.f32.mrb[8].mxu1 }
 0x208   : > { %v7070_v21 = vadd.f32 %v2468_v19, %v2394_v17  ;;  %v5706_v18 = vpop.f32.mrb[9].mxu1  ;;  %v2733_v17 = vld [vmem:[%s9154_s17 + $0x78] sm:$0xff] }
 0x209   : > { %v5907_v19 = vpack.c.bf16 %v2733_v17, %v2732_v15  ;;  %v2817_v18 = vld [vmem:[%s9153_s16 + $0x88] sm:$0xff] }
 0x20a   : > { %5724 = vmatmul.mubr.msk.f32.vlgmr.msra.gmra.mrb[14].mxu0 %vm2480_vm4, %v7070_v21  ;;  %5819 = vmatmul.mubr.msk.f32.vlgmr.msra.gmra.mrb[10].mxu1 %vm2480_vm4, %v7070_v21 }
 0x20b   : > { %5875 = vmatpush3.bf16.msra.mxu0 %v5874_v20  ;;  %3114 = vmatpush1.msra.mxu1 %v3098_v16  ;;  %v2816_v20 = vld [vmem:[%s9153_s16 + $0x80] sm:$0xff] }
 0x20c   : > { %5876 = vmatprep.subr.bf16.mxu0 %v6597_v23  ;;  %3177 = vmatprep.mubr.f32.mxu1 %v9162_v0  ;;  %v5910_v16 = vpack.c.bf16 %v2817_v18, %v2816_v20 }
 0x20d   : > { %5742 = vmatprep.mubr.msk.f32.mxu0 %vm6595_vm3, %v9162_v0 }
 0x20e   : > { %5535 = vmatmul.mubr.msk.f32.vlgmr.msra.gmra.mrb[12].mxu1 %vm3103_vm5, %v3100_v27  ;;  %v2820_v27 = vld [vmem:[%s9153_s16 + $0xa0] sm:$0xff] }
 0x20f   : > { %5878 = vmatpush3.bf16.msra.mxu0 %v5877_v26  ;;  %3183 = vmatprep.mubr.f32.mxu1 %v9162_v0  ;;  %v5913_v26 = vpack.c.bf16 %v2819_v25, %v2818_v24  ;;  %v5916_v29 = vpack.c.bf16 %v2821_v28, %v2820_v27  ;;  %v2636_v25 = vpop.permute.xlu0 %2635 }
 0x210   : > { %5879 = vmatprep.subr.bf16.mxu0 %v6597_v23 }
 0x212   : > { %5536 = vmatmul.mubr.msk.f32.gmra.mrb[14].mxu1 %vm3103_vm5, %v3101_v31  ;;  %v2823_v31 = vld [vmem:[%s9153_s16 + $0xb8] sm:$0xff] }
 0x213   : > { %5881 = vmatpush3.bf16.msra.mxu0 %v5880_v30  ;;  %3189 = vmatprep.mubr.f32.mxu1 %v9162_v0  ;;  %v2822_v30 = vld [vmem:[%s9153_s16 + $0xb0] sm:$0xff] }
 0x214   : > { %5882 = vmatprep.subr.bf16.mxu0 %v6597_v23  ;;  %v5919_v32 = vpack.c.bf16 %v2823_v31, %v2822_v30 }
 0x217   : > { %5884 = vmatpush3.bf16.msra.mxu0 %v5883_v34  ;;  %v3000_v34 = vld [vmem:[%s9152_s15 + $0x18] sm:$0xff] }
 0x218   : > { %5885 = vmatprep.subr.bf16.mxu0 %v6597_v23  ;;  %v5933_v35 = vpack.c.bf16 %v3000_v34, %v2998_v33 }
 0x21a   : > { %5743 = vmatmul.mubr.msk.f32.vlgmr.msra.gmra.mrb[16].mxu0 %vm2480_vm4, %v7070_v21 }
 0x21b   : > { %5887 = vmatpush3.bf16.msra.mxu0 %v5886_v55  ;;  %5761 = vmatprep.mubr.msk.f32.mxu0 %vm6595_vm3, %v9162_v0  ;;  %v3002_v55 = vld [vmem:[%s9152_s15 + $0x28] sm:$0xff] }
 0x21c   : > { %5888 = vmatprep.subr.bf16.mxu0 %v6597_v23  ;;  %v5937_v57 = vpack.c.bf16 %v3004_v56, %v3002_v55 }
 0x21f   : > { %5890 = vmatpush3.bf16.msra.mxu0 %v5889_v58  ;;  %v3001_v58 = vld [vmem:[%s9152_s15 + $0x20] sm:$0xff] }
 0x220   : > { %5891 = vmatprep.subr.bf16.mxu0 %v6597_v23  ;;  %v5939_v60 = vpack.c.bf16 %v3003_v59, %v3001_v58 }
 0x223   : > { %5893 = vmatpush3.bf16.msra.mxu0 %v5892_v61  ;;  %v3006_v61 = vld [vmem:[%s9152_s15 + $0x48] sm:$0xff] }
 0x224   : > { %5894 = vmatprep.subr.bf16.mxu0 %v6597_v23 }
 0x227   : > { %5896 = vmatpush3.bf16.msra.mxu0 %v5895_v1  ;;  %v5941_v1 = vpack.c.bf16 %v3008_v62, %v3006_v61 }
 0x228   : > { %5897 = vmatprep.subr.bf16.mxu0 %v6597_v23 }
 0x22a   : > { %5762 = vmatmul.mubr.msk.f32.vlgmr.msra.gmra.mrb[18].mxu0 %vm2480_vm4, %v7070_v21 }
 0x22b   : > { %5899 = vmatpush3.bf16.msra.mxu0 %v5898_v6  ;;  %5780 = vmatprep.mubr.msk.f32.mxu0 %vm6595_vm3, %v9162_v0  ;;  %v3012_v6 = vld [vmem:[%s9152_s15 + $0x78] sm:$0xff] }
 0x22c   : > { %5900 = vmatprep.subr.bf16.mxu0 %v6597_v23  ;;  %v5945_v8 = vpack.c.bf16 %v3012_v6, %v3010_v3 }
 0x22f   : > { %5902 = vmatpush3.bf16.msra.mxu0 %v5901_v9  ;;  %v3009_v9 = vld [vmem:[%s9152_s15 + $0x60] sm:$0xff] }
 0x230   : > { %5903 = vmatprep.subr.bf16.mxu0 %v6597_v23  ;;  %v5947_v12 = vpack.c.bf16 %v3011_v10, %v3009_v9 }
 0x233   : > { %5905 = vmatpush3.bf16.msra.mxu0 %v5904_v14 }
 0x234   : > { %5906 = vmatprep.subr.bf16.mxu0 %v6597_v23 }
 0x237   : > { %5908 = vmatpush3.bf16.msra.mxu0 %v5907_v19 }
 0x238   : > { %5909 = vmatprep.subr.bf16.mxu0 %v6597_v23 }
 0x23a   : > { %5781 = vmatmul.mubr.msk.f32.vlgmr.msra.gmra.mrb[20].mxu0 %vm2480_vm4, %v7070_v21 }
 0x23b   : > { %5911 = vmatpush3.bf16.msra.mxu0 %v5910_v16  ;;  %5799 = vmatprep.mubr.msk.f32.mxu0 %vm6595_vm3, %v9162_v0 }
 0x23c   : > { %5912 = vmatprep.subr.bf16.mxu0 %v6597_v23 }
 0x23f   : > { %5914 = vmatpush3.bf16.msra.mxu0 %v5913_v26  ;;  %v2644_v26 = vpop.permute.xlu1 %2643 }
 0x240   : > { %5915 = vmatprep.subr.bf16.mxu0 %v6597_v23 }
 0x243   : > { %5917 = vmatpush3.bf16.msra.mxu0 %v5916_v29 }
 0x244   : > { %5918 = vmatprep.subr.bf16.mxu0 %v6597_v23  ;;  %v2999_v23 = vld [vmem:[%s9152_s15 + $0x10] sm:$0xff] }
 0x247   : > { %5920 = vmatpush3.bf16.msra.mxu0 %v5919_v32  ;;  %v2806_v32 = vpop.permute.xlu1 %2805 }
 0x248   : > { %5934 = vmatprep.subr.bf16.mxu0 %v5933_v35 }
 0x24a   : > { %5800 = vmatmul.mubr.msk.f32.vlgmr.msra.gmra.mrb[22].mxu0 %vm2480_vm4, %v7070_v21  ;;  %v5935_v21 = vpack.c.bf16 %v2999_v23, %v2997_v54  ;;  %v2812_v23 = vpop.permute.xlu0 %2811 }
 0x24b   : > { %3080 = vmatprep.mubr.f32.mxu0 %v9162_v0  ;;  %v2974_v58 = vpop.permute.xlu1 %2973 }
 0x24c   : > { %5936 = vmatpush1.bf16.msra.mxu0 %v5935_v21 }
 0x24d   : > { %5938 = vmatprep.subr.bf16.mxu0 %v5937_v57 }
 0x24e   : > { %v2988_v2 = vpop.permute.xlu0 %2987 }
 0x24f   : > { %v2980_v59 = vpop.permute.xlu1 %2979 }
 0x250   : > { %5940 = vmatpush1.bf16.msra.mxu0 %v5939_v60 }
 0x251   : > { %5942 = vmatprep.subr.bf16.mxu0 %v5941_v1 }
 0x254   : > { %5944 = vmatpush1.bf16.msra.mxu0 %v5943_v7 }
 0x255   : > { %5946 = vmatprep.subr.bf16.mxu0 %v5945_v8 }
 0x258   : > { %5948 = vmatpush1.bf16.msra.mxu0 %v5947_v12 }
 0x2dd   : > { %v2550_v14 = vpop.f32.mrb[14].mxu0  ;;  %v2968_v15 = vpop.f32.mrb[10].mxu1 }
 0x2de   : > { %v5725_v17 = vpop.f32.mrb[15].mxu0  ;;  %v5820_v19 = vpop.f32.mrb[11].mxu1  ;;  %v2638_v28 = vmul.f32 %v2636_v25, %v2550_v14  ;;  %v2982_v63 = vmul.f32 %v2980_v59, %v2968_v15 }
 0x2e1   : > { %v7258_v20 = vpop.f32.mrb[12].mxu1 }
 0x2e2   : > { %9261 = vst [vmem:[#allocation22_spill] sm:$0xff] %v7258_v20  ;;  %3196 = vxpose.xlu1.b32.start.end [1/1] (short) %v7258_v20, 128  ;;  %v7261_v18 = vpop.f32.mrb[13].mxu1 }
 0x2e3   : > { %9262 = vst [vmem:[#allocation23_spill] sm:$0xff] %v7261_v18  ;;  %3228 = vxpose.xlu0.b32.start.end [1/1] (short) %v7261_v18, 128 }
 0x2e5   : > { %v7264_v16 = vpop.f32.mrb[14].mxu1 }
 0x2e6   : > { %9263 = vst [vmem:[#allocation24_spill] sm:$0xff] %v7264_v16  ;;  %v7266_v24 = vpop.f32.mrb[15].mxu1 }
 0x2e7   : > { %9264 = vst [vmem:[#allocation25_spill] sm:$0xff] %v7266_v24  ;;  %5538 = vmatprep.subr.msk.mxu0 %vm749_vm0, %v7266_v24 }
 0x2ed   : > { %v2628_v27 = vpop.f32.mrb[16].mxu0 }
 0x2ee   : > { %v2646_v29 = vmul.f32 %v2644_v26, %v2628_v27  ;;  %v5744_v30 = vpop.f32.mrb[17].mxu0 }
 0x2f0   : > { %v2647_v31 = vadd.f32 %v2646_v29, %v2638_v28 }
 0x2fd   : > { %v2722_v33 = vpop.f32.mrb[18].mxu0 }
 0x2fe   : > { %v2808_v34 = vmul.f32 %v2806_v32, %v2722_v33  ;;  %v5763_v35 = vpop.f32.mrb[19].mxu0 }
 0x300   : > { %v2809_v54 = vadd.f32 %v2808_v34, %v2647_v31 }
 0x30d   : > { %v2800_v21 = vpop.f32.mrb[20].mxu0 }
 0x30e   : > { %v2814_v55 = vmul.f32 %v2812_v23, %v2800_v21  ;;  %v5782_v56 = vpop.f32.mrb[21].mxu0 }
 0x310   : > { %v2815_v57 = vadd.f32 %v2814_v55, %v2809_v54 }
 0x31d   : > { %v2890_v60 = vpop.f32.mrb[22].mxu0 }
 0x31e   : > { %v2976_v61 = vmul.f32 %v2974_v58, %v2890_v60  ;;  %v5801_v62 = vpop.f32.mrb[23].mxu0 }
 0x320   : > { %v2977_v1 = vadd.f32 %v2976_v61, %v2815_v57 }
 0x322   : > { %v2983_v3 = vadd.f32 %v2982_v63, %v2977_v1 }
 0x324   : > { %v2990_v6 = vadd.f32 %v2988_v2, %v2983_v3 }
 0x326   : > { %v5533_v7 = vmul.f32 -1.442695, %v2990_v6 }
 0x328   : > { %6116 = vpow2.f32 %v5533_v7 }
 0x332   : > { %v6117_v8 = vpop.eup %6116 }
 0x333   : > { %v2994_v9 = vadd.f32 1.0, %v6117_v8 }
 0x335   : > { %6118 = vrcp.f32 %v2994_v9 }
 0x33f   : > { %v6119_v10 = vpop.eup %6118 }
 0x340   : > { %5534 = vmatmul.mubr.msk.f32.vlgmr.msra.gmra.mrb[24].mxu0 %vm2480_vm4, %v6119_v10 }
 0x341   : > { %5539 = vmatpush1.msk.msra.mxu0 %vm749_vm0, %v7264_v16  ;;  %3426 = vmatprep.mubr.f32.mxu0 %v9162_v0 }
 0x362   : > { %v3212_v12 = vpop.trf.xlu1 }
 0x363   : > { %5540 = vmatmul.mubr.msk.f32.vlgmr.msra.gmra.mrb[26].mxu0 %vm834_vm1, %v3212_v12  ;;  %v3244_v29 = vpop.trf.xlu0 }
 0x364   : > { %3432 = vmatprep.mubr.f32.mxu0 %v9162_v0 }
 0x366   : > { %v3213_v14 = vpop.trf.xlu1 }
 0x367   : > { %5541 = vmatmul.mubr.msk.f32.gmra.mrb[28].mxu0 %vm834_vm1, %v3213_v14  ;;  %v3245_v32 = vpop.trf.xlu0 }
 0x368   : > { %3438 = vmatprep.mubr.f32.mxu0 %v9162_v0 }
 0x36a   : > { %v3214_v15 = vpop.trf.xlu1 }
 0x36b   : > { %5542 = vmatmul.mubr.msk.f32.gmra.mrb[30].mxu0 %vm834_vm1, %v3214_v15  ;;  %v3246_v34 = vpop.trf.xlu0 }
 0x36c   : > { %3444 = vmatprep.mubr.f32.mxu0 %v9162_v0 }
 0x36e   : > { %v3215_v17 = vpop.trf.xlu1 }
 0x36f   : > { %5543 = vmatmul.mubr.msk.f32.gmra.mrb[32].mxu0 %vm834_vm1, %v3215_v17  ;;  %v3247_v23 = vpop.trf.xlu0 }
 0x370   : > { %3450 = vmatprep.mubr.f32.mxu0 %v9162_v0 }
 0x372   : > { %v3216_v19 = vpop.trf.xlu1 }
 0x373   : > { %5544 = vmatmul.mubr.msk.f32.gmra.mrb[34].mxu0 %vm834_vm1, %v3216_v19  ;;  %v3248_v55 = vpop.trf.xlu0 }
 0x374   : > { %3456 = vmatprep.mubr.f32.mxu0 %v9162_v0 }
 0x376   : > { %v3217_v25 = vpop.trf.xlu1 }
 0x377   : > { %5545 = vmatmul.mubr.msk.f32.gmra.mrb[36].mxu0 %vm834_vm1, %v3217_v25  ;;  %v3249_v57 = vpop.trf.xlu0 }
 0x378   : > { %3462 = vmatprep.mubr.f32.mxu0 %v9162_v0 }
 0x37a   : > { %v3218_v26 = vpop.trf.xlu1 }
 0x37b   : > { %5546 = vmatmul.mubr.msk.f32.gmra.mrb[38].mxu0 %vm834_vm1, %v3218_v26  ;;  %v3250_v58 = vpop.trf.xlu0 }
 0x37c   : > { %3468 = vmatprep.mubr.f32.mxu0 %v9162_v0 }
 0x37e   : > { %v3219_v27 = vpop.trf.xlu1 }
 0x37f   : > { %5547 = vmatmul.mubr.msk.f32.gmra.mrb[40].mxu0 %vm834_vm1, %v3219_v27  ;;  %v3251_v59 = vpop.trf.xlu0 }
 0x380   : > { %3474 = vmatprep.mubr.f32.mxu0 %v9162_v0 }
 0x382   : > { %v3220_v28 = vpop.trf.xlu1 }
 0x383   : > { %5548 = vmatmul.mubr.msk.f32.gmra.mrb[42].mxu0 %vm834_vm1, %v3220_v28  ;;  %v3252_v60 = vpop.trf.xlu0 }
 0x384   : > { %3480 = vmatprep.mubr.f32.mxu0 %v9162_v0 }
 0x386   : > { %v3221_v30 = vpop.trf.xlu1 }
 0x387   : > { %5549 = vmatmul.mubr.msk.f32.gmra.mrb[44].mxu0 %vm834_vm1, %v3221_v30  ;;  %v3253_v61 = vpop.trf.xlu0 }
 0x388   : > { %3486 = vmatprep.mubr.f32.mxu0 %v9162_v0 }
 0x38a   : > { %v3222_v31 = vpop.trf.xlu1 }
 0x38b   : > { %5550 = vmatmul.mubr.msk.f32.gmra.mrb[46].mxu0 %vm834_vm1, %v3222_v31  ;;  %v3254_v62 = vpop.trf.xlu0 }
 0x38c   : > { %3492 = vmatprep.mubr.f32.mxu0 %v9162_v0 }
 0x38e   : > { %v3223_v33 = vpop.trf.xlu1 }
 0x38f   : > { %5551 = vmatmul.mubr.msk.f32.gmra.mrb[48].mxu0 %vm834_vm1, %v3223_v33  ;;  %v3255_v63 = vpop.trf.xlu0 }
 0x390   : > { %3498 = vmatprep.mubr.f32.mxu0 %v9162_v0 }
 0x392   : > { %v3224_v35 = vpop.trf.xlu1 }
 0x393   : > { %5552 = vmatmul.mubr.msk.f32.gmra.mrb[50].mxu0 %vm834_vm1, %v3224_v35  ;;  %v3256_v1 = vpop.trf.xlu0 }
 0x394   : > { %3504 = vmatprep.mubr.f32.mxu0 %v9162_v0 }
 0x396   : > { %v3225_v54 = vpop.trf.xlu1 }
 0x397   : > { %5553 = vmatmul.mubr.msk.f32.gmra.mrb[52].mxu0 %vm834_vm1, %v3225_v54  ;;  %v3257_v2 = vpop.trf.xlu0 }
 0x398   : > { %3510 = vmatprep.mubr.f32.mxu0 %v9162_v0 }
 0x39a   : > { %v3226_v21 = vpop.trf.xlu1 }
 0x39b   : > { %5554 = vmatmul.mubr.msk.f32.gmra.mrb[54].mxu0 %vm834_vm1, %v3226_v21  ;;  %v3258_v3 = vpop.trf.xlu0 }
 0x39c   : > { %3516 = vmatprep.mubr.f32.mxu0 %v9162_v0 }
 0x39e   : > { %v3227_v56 = vpop.trf.xlu1 }
 0x39f   : > { %5555 = vmatmul.mubr.msk.f32.gmra.mrb[56].mxu0 %vm834_vm1, %v3227_v56  ;;  %v3259_v6 = vpop.trf.xlu0 }
 0x3a0   : > { %3522 = vmatprep.mubr.f32.mxu0 %v9162_v0 }
 0x3a3   : > { %5556 = vmatmul.mubr.msk.f32.gmra.mrb[58].mxu0 %vm834_vm1, %v3244_v29 }
 0x3a4   : > { %3528 = vmatprep.mubr.f32.mxu0 %v9162_v0 }
 0x3a7   : > { %5557 = vmatmul.mubr.msk.f32.gmra.mrb[60].mxu0 %vm834_vm1, %v3245_v32 }
 0x3a8   : > { %3534 = vmatprep.mubr.f32.mxu0 %v9162_v0 }
 0x3ab   : > { %5558 = vmatmul.mubr.msk.f32.gmra.mrb[62].mxu0 %vm834_vm1, %v3246_v34 }
 0x3ac   : > { %3540 = vmatprep.mubr.f32.mxu0 %v9162_v0 }
 0x3af   : > { %5559 = vmatmul.mubr.msk.f32.gmra.mrb[64].mxu0 %vm834_vm1, %v3247_v23 }
 0x3b0   : > { %3546 = vmatprep.mubr.f32.mxu0 %v9162_v0 }
 0x3b3   : > { %5560 = vmatmul.mubr.msk.f32.gmra.mrb[66].mxu0 %vm834_vm1, %v3248_v55 }
 0x3b4   : > { %3552 = vmatprep.mubr.f32.mxu0 %v9162_v0 }
 0x3b7   : > { %5561 = vmatmul.mubr.msk.f32.gmra.mrb[68].mxu0 %vm834_vm1, %v3249_v57 }
 0x3b8   : > { %3558 = vmatprep.mubr.f32.mxu0 %v9162_v0 }
 0x3bb   : > { %5562 = vmatmul.mubr.msk.f32.gmra.mrb[70].mxu0 %vm834_vm1, %v3250_v58 }
 0x3bc   : > { %3564 = vmatprep.mubr.f32.mxu0 %v9162_v0 }
 0x3bf   : > { %5563 = vmatmul.mubr.msk.f32.gmra.mrb[72].mxu0 %vm834_vm1, %v3251_v59 }
 0x3c0   : > { %3570 = vmatprep.mubr.f32.mxu0 %v9162_v0 }
 0x3c3   : > { %5564 = vmatmul.mubr.msk.f32.gmra.mrb[74].mxu0 %vm834_vm1, %v3252_v60 }
 0x3c4   : > { %3576 = vmatprep.mubr.f32.mxu0 %v9162_v0 }
 0x3c7   : > { %5565 = vmatmul.mubr.msk.f32.gmra.mrb[76].mxu0 %vm834_vm1, %v3253_v61 }
 0x3c8   : > { %3582 = vmatprep.mubr.f32.mxu0 %v9162_v0 }
 0x3cb   : > { %5566 = vmatmul.mubr.msk.f32.gmra.mrb[78].mxu0 %vm834_vm1, %v3254_v62 }
 0x3cc   : > { %3588 = vmatprep.mubr.f32.mxu0 %v9162_v0 }
 0x3cf   : > { %5567 = vmatmul.mubr.msk.f32.gmra.mrb[80].mxu0 %vm834_vm1, %v3255_v63 }
 0x3d0   : > { %3594 = vmatprep.mubr.f32.mxu0 %v9162_v0 }
 0x3d3   : > { %5568 = vmatmul.mubr.msk.f32.gmra.mrb[82].mxu0 %vm834_vm1, %v3256_v1 }
 0x3d4   : > { %3600 = vmatprep.mubr.f32.mxu0 %v9162_v0 }
 0x3d7   : > { %5569 = vmatmul.mubr.msk.f32.gmra.mrb[84].mxu0 %vm834_vm1, %v3257_v2 }
 0x3d8   : > { %3606 = vmatprep.mubr.f32.mxu0 %v9162_v0 }
 0x3db   : > { %5570 = vmatmul.mubr.msk.f32.gmra.mrb[86].mxu0 %vm834_vm1, %v3258_v3 }
 0x3dc   : > { %3612 = vmatprep.mubr.f32.mxu0 %v9162_v0 }
 0x3df   : > { %5571 = vmatmul.mubr.msk.f32.gmra.mrb[88].mxu0 %vm834_vm1, %v3259_v6 }
 0x413   : > { %v7337_v7 = vpop.f32.mrb[24].mxu0 }
 0x414   : > { %9265 = vst [vmem:[#allocation26_spill] sm:$0xff] %v7337_v7  ;;  %v7339_v8 = vpop.f32.mrb[25].mxu0 }
 0x415   : > { %9266 = vst [vmem:[#allocation27_spill] sm:$0xff] %v7339_v8 }
 0x436   : > { %v3428_v9 = vpop.f32.mrb[26].mxu0 }
 0x437   : > { %v7341_v10 = vmul.f32 0.5, %v3428_v9  ;;  %v3430_v12 = vpop.f32.mrb[27].mxu0 }
 0x438   : > { %v7343_v14 = vmul.f32 0.5, %v3430_v12 }
 0x43a   : > { %v3434_v15 = vpop.f32.mrb[28].mxu0  ;;  %v3683_v17 = vmax.f32 %v7341_v10, %v7343_v14 }
 0x43b   : > { %v7347_v19 = vmul.f32 0.5, %v3434_v15  ;;  %v3436_v25 = vpop.f32.mrb[29].mxu0 }
 0x43c   : > { %v7349_v26 = vmul.f32 0.5, %v3436_v25  ;;  %3684 = vmax.xlane.f32.xlu0 %v3683_v17 }
 0x43e   : > { %v3440_v27 = vpop.f32.mrb[30].mxu0  ;;  %v3686_v28 = vmax.f32 %v7347_v19, %v7349_v26 }
 0x43f   : > { %v7353_v29 = vmul.f32 0.5, %v3440_v27  ;;  %v3442_v30 = vpop.f32.mrb[31].mxu0 }
 0x440   : > { %v7355_v31 = vmul.f32 0.5, %v3442_v30  ;;  %3687 = vmax.xlane.f32.xlu1 %v3686_v28 }
 0x442   : > { %v3446_v32 = vpop.f32.mrb[32].mxu0  ;;  %v3689_v33 = vmax.f32 %v7353_v29, %v7355_v31 }
 0x443   : > { %v7359_v34 = vmul.f32 0.5, %v3446_v32  ;;  %v3448_v35 = vpop.f32.mrb[33].mxu0 }
 0x444   : > { %v7361_v54 = vmul.f32 0.5, %v3448_v35  ;;  %3690 = vmax.xlane.f32.xlu1 %v3689_v33 }
 0x446   : > { %v3452_v23 = vpop.f32.mrb[34].mxu0  ;;  %v3692_v21 = vmax.f32 %v7359_v34, %v7361_v54 }
 0x447   : > { %v7365_v55 = vmul.f32 0.5, %v3452_v23  ;;  %v3454_v56 = vpop.f32.mrb[35].mxu0 }
 0x448   : > { %v7367_v57 = vmul.f32 0.5, %v3454_v56  ;;  %3693 = vmax.xlane.f32.xlu0 %v3692_v21 }
 0x44a   : > { %v3458_v58 = vpop.f32.mrb[36].mxu0  ;;  %v3695_v59 = vmax.f32 %v7365_v55, %v7367_v57 }
 0x44b   : > { %v7371_v60 = vmul.f32 0.5, %v3458_v58  ;;  %v3460_v61 = vpop.f32.mrb[37].mxu0 }
 0x44c   : > { %v7373_v62 = vmul.f32 0.5, %v3460_v61  ;;  %3696 = vmax.xlane.f32.xlu1 %v3695_v59 }
 0x44e   : > { %v3464_v63 = vpop.f32.mrb[38].mxu0  ;;  %v3698_v1 = vmax.f32 %v7371_v60, %v7373_v62 }
 0x44f   : > { %v7377_v2 = vmul.f32 0.5, %v3464_v63  ;;  %v3466_v3 = vpop.f32.mrb[39].mxu0 }
 0x450   : > { %v7379_v6 = vmul.f32 0.5, %v3466_v3  ;;  %3699 = vmax.xlane.f32.xlu0 %v3698_v1 }
 0x452   : > { %v3470_v9 = vpop.f32.mrb[40].mxu0  ;;  %v3701_v12 = vmax.f32 %v7377_v2, %v7379_v6 }
 0x453   : > { %v7383_v15 = vmul.f32 0.5, %v3470_v9  ;;  %v3472_v17 = vpop.f32.mrb[41].mxu0 }
 0x454   : > { %v7385_v25 = vmul.f32 0.5, %v3472_v17  ;;  %3702 = vmax.xlane.f32.xlu1 %v3701_v12 }
 0x456   : > { %v3476_v27 = vpop.f32.mrb[42].mxu0  ;;  %v3704_v28 = vmax.f32 %v7383_v15, %v7385_v25 }
 0x457   : > { %v7389_v30 = vmul.f32 0.5, %v3476_v27  ;;  %v3478_v32 = vpop.f32.mrb[43].mxu0 }
 0x458   : > { %v7391_v33 = vmul.f32 0.5, %v3478_v32  ;;  %3705 = vmax.xlane.f32.xlu0 %v3704_v28 }
 0x45a   : > { %v3482_v35 = vpop.f32.mrb[44].mxu0  ;;  %v3707_v23 = vmax.f32 %v7389_v30, %v7391_v33 }
 0x45b   : > { %v7395_v21 = vmul.f32 0.5, %v3482_v35  ;;  %v3484_v56 = vpop.f32.mrb[45].mxu0 }
 0x45c   : > { %v7397_v58 = vmul.f32 0.5, %v3484_v56  ;;  %3708 = vmax.xlane.f32.xlu1 %v3707_v23 }
 0x45e   : > { %v3488_v59 = vpop.f32.mrb[46].mxu0  ;;  %v3710_v61 = vmax.f32 %v7395_v21, %v7397_v58 }
 0x45f   : > { %v7401_v63 = vmul.f32 0.5, %v3488_v59  ;;  %v3490_v1 = vpop.f32.mrb[47].mxu0 }
 0x460   : > { %v7403_v3 = vmul.f32 0.5, %v3490_v1  ;;  %3711 = vmax.xlane.f32.xlu0 %v3710_v61 }
 0x462   : > { %v3494_v9 = vpop.f32.mrb[48].mxu0  ;;  %v3713_v12 = vmax.f32 %v7401_v63, %v7403_v3 }
 0x463   : > { %v7407_v17 = vmul.f32 0.5, %v3494_v9  ;;  %v3496_v27 = vpop.f32.mrb[49].mxu0 }
 0x464   : > { %v7409_v28 = vmul.f32 0.5, %v3496_v27  ;;  %3714 = vmax.xlane.f32.xlu1 %v3713_v12 }
 0x466   : > { %v3500_v32 = vpop.f32.mrb[50].mxu0  ;;  %v3716_v35 = vmax.f32 %v7407_v17, %v7409_v28 }
 0x467   : > { %v7413_v23 = vmul.f32 0.5, %v3500_v32  ;;  %v3502_v56 = vpop.f32.mrb[51].mxu0 }
 0x468   : > { %v7415_v59 = vmul.f32 0.5, %v3502_v56  ;;  %3717 = vmax.xlane.f32.xlu0 %v3716_v35 }
 0x46a   : > { %v3506_v61 = vpop.f32.mrb[52].mxu0  ;;  %v3719_v1 = vmax.f32 %v7413_v23, %v7415_v59 }
 0x46b   : > { %v7419_v9 = vmul.f32 0.5, %v3506_v61  ;;  %v3508_v13 = vpop.f32.mrb[53].mxu0 }
 0x46c   : > { %v7421_v27 = vmul.f32 0.5, %v3508_v13  ;;  %3720 = vmax.xlane.f32.xlu1 %v3719_v1 }
 0x46e   : > { %v3512_v12 = vpop.f32.mrb[54].mxu0  ;;  %v3722_v11 = vmax.f32 %v7419_v9, %v7421_v27 }
 0x46f   : > { %v7425_v32 = vmul.f32 0.5, %v3512_v12  ;;  %v3514_v0 = vpop.f32.mrb[55].mxu0 }
 0x470   : > { %v7427_v56 = vmul.f32 0.5, %v3514_v0  ;;  %3723 = vmax.xlane.f32.xlu0 %v3722_v11 }
 0x472   : > { %v3518_v35 = vpop.f32.mrb[56].mxu0  ;;  %v3725_v22 = vmax.f32 %v7425_v32, %v7427_v56 }
 0x473   : > { %v7431_v61 = vmul.f32 0.5, %v3518_v35  ;;  %v3520_v41 = vpop.f32.mrb[57].mxu0 }
 0x474   : > { %v7433_v13 = vmul.f32 0.5, %v3520_v41  ;;  %3726 = vmax.xlane.f32.xlu1 %v3725_v22 }
 0x476   : > { %v3524_v1 = vpop.f32.mrb[58].mxu0  ;;  %v3728_v40 = vmax.f32 %v7431_v61, %v7433_v13 }
 0x477   : > { %v7437_v12 = vmul.f32 0.5, %v3524_v1  ;;  %v3526_v8 = vpop.f32.mrb[59].mxu0 }
 0x478   : > { %v7439_v0 = vmul.f32 0.5, %v3526_v8  ;;  %3729 = vmax.xlane.f32.xlu0 %v3728_v40 }
 0x47a   : > { %v3530_v11 = vpop.f32.mrb[60].mxu0  ;;  %v3731_v7 = vmax.f32 %v7437_v12, %v7439_v0 }
 0x47b   : > { %v7443_v35 = vmul.f32 0.5, %v3530_v11  ;;  %v3532_v44 = vpop.f32.mrb[61].mxu0 }
 0x47c   : > { %v7445_v41 = vmul.f32 0.5, %v3532_v44  ;;  %3732 = vmax.xlane.f32.xlu1 %v3731_v7 }
 0x47e   : > { %9267 = vst [vmem:[#allocation28_spill] sm:$0xff] %v7445_v41  ;;  %v3536_v22 = vpop.f32.mrb[62].mxu0  ;;  %v3734_v42 = vmax.f32 %v7443_v35, %v7445_v41 }
 0x47f   : > { %v7449_v1 = vmul.f32 0.5, %v3536_v22  ;;  %v3538_v5 = vpop.f32.mrb[63].mxu0 }
 0x480   : > { %v7451_v8 = vmul.f32 0.5, %v3538_v5  ;;  %3735 = vmax.xlane.f32.xlu0 %v3734_v42 }
 0x481   : > { %9268 = vst [vmem:[#allocation29_spill] sm:$0xff] %v7449_v1 }
 0x482   : > { %9269 = vst [vmem:[#allocation30_spill] sm:$0xff] %v7451_v8  ;;  %v3542_v40 = vpop.f32.mrb[64].mxu0  ;;  %v3737_v4 = vmax.f32 %v7449_v1, %v7451_v8 }
 0x483   : > { %v7455_v11 = vmul.f32 0.5, %v3542_v40  ;;  %v3544_v49 = vpop.f32.mrb[65].mxu0 }
 0x484   : > { %v7457_v44 = vmul.f32 0.5, %v3544_v49  ;;  %3738 = vmax.xlane.f32.xlu1 %v3737_v4 }
 0x485   : > { %9270 = vst [vmem:[#allocation31_spill] sm:$0xff] %v7455_v11 }
 0x486   : > { %9271 = vst [vmem:[#allocation32_spill] sm:$0xff] %v7457_v44  ;;  %v3548_v7 = vpop.f32.mrb[66].mxu0  ;;  %v3740_v48 = vmax.f32 %v7455_v11, %v7457_v44 }
 0x487   : > { %v7461_v22 = vmul.f32 0.5, %v3548_v7  ;;  %v3550_v53 = vpop.f32.mrb[67].mxu0 }
 0x488   : > { %v7463_v5 = vmul.f32 0.5, %v3550_v53  ;;  %3741 = vmax.xlane.f32.xlu0 %v3740_v48 }
 0x489   : > { %9272 = vst [vmem:[#allocation33_spill] sm:$0xff] %v7461_v22 }
 0x48a   : > { %9273 = vst [vmem:[#allocation34_spill] sm:$0xff] %v7463_v5  ;;  %v3554_v42 = vpop.f32.mrb[68].mxu0  ;;  %v3743_v52 = vmax.f32 %v7461_v22, %v7463_v5 }
 0x48b   : > { %v7467_v40 = vmul.f32 0.5, %v3554_v42  ;;  %v3556_v51 = vpop.f32.mrb[69].mxu0 }
 0x48c   : > { %v7469_v49 = vmul.f32 0.5, %v3556_v51  ;;  %3744 = vmax.xlane.f32.xlu1 %v3743_v52 }
 0x48d   : > { %9274 = vst [vmem:[#allocation35_spill] sm:$0xff] %v7467_v40 }
 0x48e   : > { %9275 = vst [vmem:[#allocation36_spill] sm:$0xff] %v7469_v49  ;;  %v3560_v4 = vpop.f32.mrb[70].mxu0  ;;  %v3746_v50 = vmax.f32 %v7467_v40, %v7469_v49 }
 0x48f   : > { %v7473_v7 = vmul.f32 0.5, %v3560_v4  ;;  %v3562_v39 = vpop.f32.mrb[71].mxu0 }
 0x490   : > { %v7475_v53 = vmul.f32 0.5, %v3562_v39  ;;  %3747 = vmax.xlane.f32.xlu0 %v3746_v50 }
 0x491   : > { %9276 = vst [vmem:[#allocation37_spill] sm:$0xff] %v7473_v7 }
 0x492   : > { %9277 = vst [vmem:[#allocation38_spill] sm:$0xff] %v7475_v53  ;;  %v3566_v48 = vpop.f32.mrb[72].mxu0  ;;  %v3749_v38 = vmax.f32 %v7473_v7, %v7475_v53 }
 0x493   : > { %v7479_v42 = vmul.f32 0.5, %v3566_v48  ;;  %v3568_v37 = vpop.f32.mrb[73].mxu0 }
 0x494   : > { %v7481_v51 = vmul.f32 0.5, %v3568_v37  ;;  %3750 = vmax.xlane.f32.xlu1 %v3749_v38 }
 0x495   : > { %9278 = vst [vmem:[#allocation39_spill] sm:$0xff] %v7479_v42 }
 0x496   : > { %9279 = vst [vmem:[#allocation40_spill] sm:$0xff] %v7481_v51  ;;  %v3752_v52 = vmax.f32 %v7479_v42, %v7481_v51  ;;  %v3572_v36 = vpop.f32.mrb[74].mxu0 }
 0x497   : > { %v3574_v4 = vpop.f32.mrb[75].mxu0 }
 0x498   : > { %3753 = vmax.xlane.f32.xlu0 %v3752_v52 }
 0x49a   : > { %v3578_v47 = vpop.f32.mrb[76].mxu0 }
 0x49b   : > { %v3580_v39 = vpop.f32.mrb[77].mxu0 }
 0x49e   : > { %v3584_v46 = vpop.f32.mrb[78].mxu0 }
 0x49f   : > { %v3586_v50 = vpop.f32.mrb[79].mxu0 }
 0x4a2   : > { %v7485_v45 = vpop.f32.mrb[80].mxu0 }
 0x4a3   : > { %v7487_v43 = vpop.f32.mrb[81].mxu0 }
 0x4a6   : > { %v7489_v48 = vpop.f32.mrb[82].mxu0 }
 0x4a7   : > { %v7491_v16 = vpop.f32.mrb[83].mxu0 }
 0x4aa   : > { %v7493_v37 = vpop.f32.mrb[84].mxu0 }
 0x4ab   : > { %v7495_v38 = vpop.f32.mrb[85].mxu0 }
 0x4ae   : > { %v7497_v24 = vpop.f32.mrb[86].mxu0 }
 0x4af   : > { %v7499_v20 = vpop.f32.mrb[87].mxu0 }
 0x4b2   : > { %v7501_v52 = vpop.f32.mrb[88].mxu0 }
 0x4b3   : > { %v7503_v18 = vpop.f32.mrb[89].mxu0 }
 0x4c9   : > { %v3685_v51 = vpop.xlane.xlu0 %3684 }
 0x4ca   : > { %v3779_v42 = vsub.f32 %v7341_v10, %v3685_v51  ;;  %v3780_v53 = vsub.f32 %v7343_v14, %v3685_v51 }
 0x4cc   : > { %v3843_v7 = vmul.f32 1.442695, %v3779_v42  ;;  %v3845_v49 = vmul.f32 1.442695, %v3780_v53  ;;  %v7531_v53 = vmul.f32 0.5, %v3580_v39 }
 0x4cd   : > { %v3688_v40 = vpop.xlane.xlu1 %3687 }
 0x4ce   : > { %6120 = vpow2.f32 %v3843_v7  ;;  %v3781_v5 = vsub.f32 %v7347_v19, %v3688_v40  ;;  %v3782_v22 = vsub.f32 %v7349_v26, %v3688_v40  ;;  %v7513_v26 = vmul.f32 0.5, %v3572_v36 }
 0x4cf   : > { %6122 = vpow2.f32 %v3845_v49  ;;  %v7529_v49 = vmul.f32 0.5, %v3578_v47 }
 0x4d0   : > { %v3847_v44 = vmul.f32 1.442695, %v3781_v5  ;;  %v3849_v11 = vmul.f32 1.442695, %v3782_v22  ;;  %v7515_v5 = vmul.f32 0.5, %v3574_v4 }
 0x4d1   : > { %v3691_v8 = vpop.xlane.xlu1 %3690 }
 0x4d2   : > { %6124 = vpow2.f32 %v3847_v44  ;;  %v3783_v1 = vsub.f32 %v7353_v29, %v3691_v8  ;;  %v3784_v41 = vsub.f32 %v7355_v31, %v3691_v8  ;;  %v3755_v36 = vmax.f32 %v7513_v26, %v7515_v5 }
 0x4d3   : > { %6126 = vpow2.f32 %v3849_v11 }
 0x4d4   : > { %v3851_v10 = vmul.f32 1.442695, %v3783_v1  ;;  %v3853_v14 = vmul.f32 1.442695, %v3784_v41 }
 0x4d5   : > { %v3694_v42 = vpop.xlane.xlu0 %3693 }
 0x4d6   : > { %6128 = vpow2.f32 %v3851_v10  ;;  %v3785_v7 = vsub.f32 %v7359_v34, %v3694_v42  ;;  %v3786_v19 = vsub.f32 %v7361_v54, %v3694_v42  ;;  %v7541_v42 = vmul.f32 0.5, %v3586_v50 }
 0x4d7   : > { %6130 = vpow2.f32 %v3853_v14  ;;  %v7539_v14 = vmul.f32 0.5, %v3584_v46 }
 0x4d8   : > { %v7517_v22 = vpop.eup %6120  ;;  %v3855_v44 = vmul.f32 1.442695, %v3785_v7  ;;  %v3857_v29 = vmul.f32 1.442695, %v3786_v19  ;;  %v3758_v19 = vmax.f32 %v7529_v49, %v7531_v53 }
 0x4d9   : > { %v7519_v40 = vpop.eup %6122  ;;  %v3697_v31 = vpop.xlane.xlu1 %3696 }
 0x4da   : > { %6132 = vpow2.f32 %v3855_v44  ;;  %v3787_v41 = vsub.f32 %v7365_v55, %v3697_v31  ;;  %v3788_v1 = vsub.f32 %v7367_v57, %v3697_v31  ;;  %v3971_v34 = vadd.f32 %v7519_v40, %v7517_v22 }
 0x4db   : > { %6134 = vpow2.f32 %v3857_v29  ;;  %v3761_v29 = vmax.f32 %v7539_v14, %v7541_v42 }
 0x4dc   : > { %v7527_v54 = vpop.eup %6124  ;;  %v3859_v8 = vmul.f32 1.442695, %v3787_v41  ;;  %v3861_v11 = vmul.f32 1.442695, %v3788_v1  ;;  %3972 = vadd.xlane.f32.xlu1 %v3971_v34  ;;  %v7558_v34 = vmul.f32 0.5, %v7485_v45  ;;  %v7573_v45 = vmul.f32 0.5, %v7491_v16 }
 0x4dd   : > { %v7533_v51 = vpop.eup %6126  ;;  %v3700_v55 = vpop.xlane.xlu0 %3699 }
 0x4de   : > { %6136 = vpow2.f32 %v3859_v8  ;;  %v3789_v57 = vsub.f32 %v7371_v60, %v3700_v55  ;;  %v3790_v4 = vsub.f32 %v7373_v62, %v3700_v55  ;;  %v3974_v10 = vadd.f32 %v7533_v51, %v7527_v54 }
 0x4df   : > { %6138 = vpow2.f32 %v3861_v11 }
 0x4e0   : > { %v7543_v47 = vpop.eup %6128  ;;  %v3863_v39 = vmul.f32 1.442695, %v3789_v57  ;;  %v3865_v7 = vmul.f32 1.442695, %v3790_v4  ;;  %3975 = vadd.xlane.f32.xlu0 %v3974_v10  ;;  %3756 = vmax.xlane.f32.xlu1 %v3755_v36  ;;  %v7570_v57 = vmul.f32 0.5, %v7489_v48 }
 0x4e1   : > { %v7547_v60 = vpop.eup %6130  ;;  %v3703_v62 = vpop.xlane.xlu1 %3702 }
 0x4e2   : > { %6140 = vpow2.f32 %v3863_v39  ;;  %v3791_v44 = vsub.f32 %v7377_v2, %v3703_v62  ;;  %v3792_v46 = vsub.f32 %v7379_v6, %v3703_v62  ;;  %v3977_v50 = vadd.f32 %v7547_v60, %v7543_v47 }
 0x4e3   : > { %6142 = vpow2.f32 %v3865_v7  ;;  %v7561_v2 = vmul.f32 0.5, %v7487_v43  ;;  %v3767_v62 = vmax.f32 %v7570_v57, %v7573_v45 }
 0x4e4   : > { %v7555_v31 = vpop.eup %6132  ;;  %v3867_v41 = vmul.f32 1.442695, %v3791_v44  ;;  %v3869_v1 = vmul.f32 1.442695, %v3792_v46  ;;  %3978 = vadd.xlane.f32.xlu1 %v3977_v50  ;;  %3759 = vmax.xlane.f32.xlu0 %v3758_v19  ;;  %v3102_v19 = vld [vmem:[%s9155_s18 + $0x10] sm:$0xff] }
 0x4e5   : > { %v7563_v6 = vpop.eup %6134  ;;  %v3706_v36 = vpop.xlane.xlu0 %3705  ;;  %5537 = vmatmul.mubr.msk.f32.gmra.mrb[16].mxu1 %vm3103_vm5, %v3102_v19  ;;  %v7626_v19 = vmul.f32 0.5, %v7501_v52 }
 0x4e6   : > { %6144 = vpow2.f32 %v3867_v41  ;;  %v3793_v8 = vsub.f32 %v7383_v15, %v3706_v36  ;;  %v3794_v11 = vsub.f32 %v7385_v25, %v3706_v36  ;;  %v3980_v55 = vadd.f32 %v7563_v6, %v7555_v31 }
 0x4e7   : > { %6146 = vpow2.f32 %v3869_v1  ;;  %v3764_v15 = vmax.f32 %v7558_v34, %v7561_v2 }
 0x4e8   : > { %v7575_v43 = vpop.eup %6136  ;;  %v3871_v4 = vmul.f32 1.442695, %v3793_v8  ;;  %v3873_v10 = vmul.f32 1.442695, %v3794_v11  ;;  %3981 = vadd.xlane.f32.xlu0 %v3980_v55  ;;  %3762 = vmax.xlane.f32.xlu1 %v3761_v29  ;;  %v7606_v11 = vmul.f32 0.5, %v7497_v24 }
 0x4e9   : > { %v7579_v25 = vpop.eup %6138  ;;  %v3709_v39 = vpop.xlane.xlu1 %3708 }
 0x4ea   : > { %6148 = vpow2.f32 %v3871_v4  ;;  %v3795_v7 = vsub.f32 %v7389_v30, %v3709_v39  ;;  %v3796_v48 = vsub.f32 %v7391_v33, %v3709_v39  ;;  %v3983_v16 = vadd.f32 %v7579_v25, %v7575_v43 }
 0x4eb   : > { %6150 = vpow2.f32 %v3873_v10  ;;  %v7594_v30 = vmul.f32 0.5, %v7493_v37  ;;  %v7597_v33 = vmul.f32 0.5, %v7495_v38  ;;  %v7609_v37 = vmul.f32 0.5, %v7499_v20 }
 0x4ec   : > { %v7591_v44 = vpop.eup %6140  ;;  %v3875_v46 = vmul.f32 1.442695, %v3795_v7  ;;  %v3877_v50 = vmul.f32 1.442695, %v3796_v48  ;;  %3984 = vadd.xlane.f32.xlu1 %v3983_v16  ;;  %3765 = vmax.xlane.f32.xlu0 %v3764_v15 }
 0x4ed   : > { %v7599_v29 = vpop.eup %6142  ;;  %v3712_v41 = vpop.xlane.xlu0 %3711  ;;  %v3773_v39 = vmax.f32 %v7606_v11, %v7609_v37 }
 0x4ee   : > { %6152 = vpow2.f32 %v3875_v46  ;;  %v3797_v1 = vsub.f32 %v7395_v21, %v3712_v41  ;;  %v3798_v36 = vsub.f32 %v7397_v58, %v3712_v41  ;;  %v3986_v8 = vadd.f32 %v7599_v29, %v7591_v44 }
 0x4ef   : > { %6154 = vpow2.f32 %v3877_v50  ;;  %v3770_v21 = vmax.f32 %v7594_v30, %v7597_v33 }
 0x4f0   : > { %v7611_v38 = vpop.eup %6144  ;;  %v3879_v55 = vmul.f32 1.442695, %v3797_v1  ;;  %v3881_v4 = vmul.f32 1.442695, %v3798_v36  ;;  %3987 = vadd.xlane.f32.xlu0 %v3986_v8  ;;  %3768 = vmax.xlane.f32.xlu1 %v3767_v62 }
 0x4f1   : > { %v7615_v58 = vpop.eup %6146  ;;  %v3715_v10 = vpop.xlane.xlu1 %3714 }
 0x4f2   : > { %6156 = vpow2.f32 %v3879_v55  ;;  %v3799_v15 = vsub.f32 %v7401_v63, %v3715_v10  ;;  %v3800_v24 = vsub.f32 %v7403_v3, %v3715_v10  ;;  %v3989_v20 = vadd.f32 %v7615_v58, %v7611_v38 }
 0x4f3   : > { %6158 = vpow2.f32 %v3881_v4  ;;  %v7629_v63 = vmul.f32 0.5, %v7503_v18 }
 0x4f4   : > { %v7623_v7 = vpop.eup %6148  ;;  %v3883_v48 = vmul.f32 1.442695, %v3799_v15  ;;  %v3885_v16 = vmul.f32 1.442695, %v3800_v24  ;;  %3990 = vadd.xlane.f32.xlu1 %v3989_v20  ;;  %3771 = vmax.xlane.f32.xlu0 %v3770_v21 }
 0x4f5   : > { %v7631_v3 = vpop.eup %6150  ;;  %v3718_v62 = vpop.xlane.xlu0 %3717  ;;  %v3776_v18 = vmax.f32 %v7626_v19, %v7629_v63 }
 0x4f6   : > { %6160 = vpow2.f32 %v3883_v48  ;;  %v3801_v46 = vsub.f32 %v7407_v17, %v3718_v62  ;;  %v3802_v50 = vsub.f32 %v7409_v28, %v3718_v62  ;;  %v3992_v41 = vadd.f32 %v7631_v3, %v7623_v7 }
 0x4f7   : > { %6162 = vpow2.f32 %v3885_v16 }
 0x4f8   : > { %v7637_v1 = vpop.eup %6152  ;;  %v3887_v36 = vmul.f32 1.442695, %v3801_v46  ;;  %v3889_v52 = vmul.f32 1.442695, %v3802_v50  ;;  %3993 = vadd.xlane.f32.xlu0 %v3992_v41  ;;  %3774 = vmax.xlane.f32.xlu1 %v3773_v39 }
 0x4f9   : > { %v7641_v8 = vpop.eup %6154  ;;  %v3721_v55 = vpop.xlane.xlu1 %3720 }
 0x4fa   : > { %6164 = vpow2.f32 %v3887_v36  ;;  %v3803_v17 = vsub.f32 %v7413_v23, %v3721_v55  ;;  %v3804_v28 = vsub.f32 %v7415_v59, %v3721_v55  ;;  %v3995_v4 = vadd.f32 %v7641_v8, %v7637_v1 }
 0x4fb   : > { %6166 = vpow2.f32 %v3889_v52 }
 0x4fc   : > { %v7647_v21 = vpop.eup %6156  ;;  %v3891_v10 = vmul.f32 1.442695, %v3803_v17  ;;  %v3893_v15 = vmul.f32 1.442695, %v3804_v28  ;;  %3996 = vadd.xlane.f32.xlu1 %v3995_v4  ;;  %3777 = vmax.xlane.f32.xlu0 %v3776_v18 }
 0x4fd   : > { %v7649_v24 = vpop.eup %6158  ;;  %v3724_v20 = vpop.xlane.xlu0 %3723 }
 0x4fe   : > { %6168 = vpow2.f32 %v3891_v10  ;;  %v3805_v39 = vsub.f32 %v7419_v9, %v3724_v20  ;;  %v3806_v23 = vsub.f32 %v7421_v27, %v3724_v20  ;;  %v3998_v59 = vadd.f32 %v7649_v24, %v7647_v21 }
 0x4ff   : > { %6170 = vpow2.f32 %v3893_v15 }
 0x500   : > { %v7655_v48 = vpop.eup %6160  ;;  %v3895_v16 = vmul.f32 1.442695, %v3805_v39  ;;  %v3897_v62 = vmul.f32 1.442695, %v3806_v23  ;;  %3999 = vadd.xlane.f32.xlu0 %v3998_v59 }
 0x501   : > { %v7657_v46 = vpop.eup %6162  ;;  %v3727_v50 = vpop.xlane.xlu1 %3726 }
 0x502   : > { %6172 = vpow2.f32 %v3895_v16  ;;  %v3807_v41 = vsub.f32 %v7425_v32, %v3727_v50  ;;  %v3808_v36 = vsub.f32 %v7427_v56, %v3727_v50  ;;  %v4001_v9 = vadd.f32 %v7657_v46, %v7655_v48 }
 0x503   : > { %6174 = vpow2.f32 %v3897_v62 }
 0x504   : > { %v7663_v27 = vpop.eup %6164  ;;  %v3899_v52 = vmul.f32 1.442695, %v3807_v41  ;;  %v3901_v18 = vmul.f32 1.442695, %v3808_v36  ;;  %4002 = vadd.xlane.f32.xlu1 %v4001_v9  ;;  %v9280_v9 = vld [vmem:[#allocation28_spill] sm:$0xff] }
 0x505   : > { %v7665_v55 = vpop.eup %6166  ;;  %v3730_v17 = vpop.xlane.xlu0 %3729 }
 0x506   : > { %6176 = vpow2.f32 %v3899_v52  ;;  %v3809_v28 = vsub.f32 %v7431_v61, %v3730_v17  ;;  %v3810_v4 = vsub.f32 %v7433_v13, %v3730_v17  ;;  %v4004_v32 = vadd.f32 %v7665_v55, %v7663_v27 }
 0x507   : > { %6178 = vpow2.f32 %v3901_v18 }
 0x508   : > { %v7671_v56 = vpop.eup %6168  ;;  %v3903_v10 = vmul.f32 1.442695, %v3809_v28  ;;  %v3905_v15 = vmul.f32 1.442695, %v3810_v4  ;;  %4005 = vadd.xlane.f32.xlu0 %v4004_v32  ;;  %v9282_v32 = vld [vmem:[#allocation29_spill] sm:$0xff] }
 0x509   : > { %v7673_v20 = vpop.eup %6170  ;;  %v3733_v39 = vpop.xlane.xlu1 %3732 }
 0x50a   : > { %6180 = vpow2.f32 %v3903_v10  ;;  %v3811_v23 = vsub.f32 %v7437_v12, %v3733_v39  ;;  %v3812_v59 = vsub.f32 %v7439_v0, %v3733_v39  ;;  %v4007_v61 = vadd.f32 %v7673_v20, %v7671_v56 }
 0x50b   : > { %6182 = vpow2.f32 %v3905_v15  ;;  %v9283_v15 = vld [vmem:[#allocation30_spill] sm:$0xff] }
 0x50c   : > { %v7679_v13 = vpop.eup %6172  ;;  %v3907_v16 = vmul.f32 1.442695, %v3811_v23  ;;  %v3909_v62 = vmul.f32 1.442695, %v3812_v59  ;;  %4008 = vadd.xlane.f32.xlu1 %v4007_v61 }
 0x50d   : > { %v7681_v50 = vpop.eup %6174  ;;  %v3736_v41 = vpop.xlane.xlu0 %3735 }
 0x50e   : > { %6184 = vpow2.f32 %v3907_v16  ;;  %v3813_v36 = vsub.f32 %v7443_v35, %v3736_v41  ;;  %v3814_v52 = vsub.f32 %v9280_v9, %v3736_v41  ;;  %v4010_v12 = vadd.f32 %v7681_v50, %v7679_v13  ;;  %v9285_v41 = vld [vmem:[#allocation31_spill] sm:$0xff]  ;;  %v9286_v9 = vld [vmem:[#allocation32_spill] sm:$0xff] }
 0x50f   : > { %6186 = vpow2.f32 %v3909_v62 }
 0x510   : > { %v7687_v0 = vpop.eup %6176  ;;  %v3911_v18 = vmul.f32 1.442695, %v3813_v36  ;;  %v3913_v17 = vmul.f32 1.442695, %v3814_v52  ;;  %4011 = vadd.xlane.f32.xlu0 %v4010_v12 }
 0x511   : > { %9281 = vst [vmem:[#allocation28_spill] sm:$0xff] %v7687_v0  ;;  %v7689_v28 = vpop.eup %6178  ;;  %v3739_v4 = vpop.xlane.xlu1 %3738 }
 0x512   : > { %6188 = vpow2.f32 %v3911_v18  ;;  %v3815_v10 = vsub.f32 %v9282_v32, %v3739_v4  ;;  %v3816_v39 = vsub.f32 %v9283_v15, %v3739_v4  ;;  %v4013_v35 = vadd.f32 %v7689_v28, %v7687_v0  ;;  %v9289_v15 = vld [vmem:[#allocation33_spill] sm:$0xff] }
 0x513   : > { %6190 = vpow2.f32 %v3913_v17 }
 0x514   : > { %v7695_v23 = vpop.eup %6180  ;;  %v3915_v59 = vmul.f32 1.442695, %v3815_v10  ;;  %v3917_v61 = vmul.f32 1.442695, %v3816_v39  ;;  %4014 = vadd.xlane.f32.xlu1 %v4013_v35  ;;  %v9290_v35 = vld [vmem:[#allocation34_spill] sm:$0xff] }
 0x515   : > { %9284 = vst [vmem:[#allocation29_spill] sm:$0xff] %v7695_v23  ;;  %v7697_v16 = vpop.eup %6182  ;;  %v3742_v62 = vpop.xlane.xlu0 %3741 }
 0x516   : > { %6192 = vpow2.f32 %v3915_v59  ;;  %v3817_v36 = vsub.f32 %v9285_v41, %v3742_v62  ;;  %v3818_v52 = vsub.f32 %v9286_v9, %v3742_v62  ;;  %v4016_v12 = vadd.f32 %v7697_v16, %v7695_v23 }
 0x517   : > { %6194 = vpow2.f32 %v3917_v61 }
 0x518   : > { %v7703_v18 = vpop.eup %6184  ;;  %v3919_v17 = vmul.f32 1.442695, %v3817_v36  ;;  %v3921_v4 = vmul.f32 1.442695, %v3818_v52  ;;  %4017 = vadd.xlane.f32.xlu0 %v4016_v12  ;;  %v9293_v12 = vld [vmem:[#allocation35_spill] sm:$0xff] }
 0x519   : > { %9287 = vst [vmem:[#allocation30_spill] sm:$0xff] %v7703_v18  ;;  %v7705_v32 = vpop.eup %6186  ;;  %v3745_v10 = vpop.xlane.xlu1 %3744 }
 0x51a   : > { %9288 = vst [vmem:[#allocation31_spill] sm:$0xff] %v7705_v32  ;;  %6196 = vpow2.f32 %v3919_v17  ;;  %v3819_v39 = vsub.f32 %v9289_v15, %v3745_v10  ;;  %v3820_v59 = vsub.f32 %v9290_v35, %v3745_v10  ;;  %v4019_v62 = vadd.f32 %v7705_v32, %v7703_v18  ;;  %v9294_v17 = vld [vmem:[#allocation36_spill] sm:$0xff] }
 0x51b   : > { %6198 = vpow2.f32 %v3921_v4 }
 0x51c   : > { %v7711_v41 = vpop.eup %6188  ;;  %v3923_v61 = vmul.f32 1.442695, %v3819_v39  ;;  %v3925_v9 = vmul.f32 1.442695, %v3820_v59  ;;  %4020 = vadd.xlane.f32.xlu1 %v4019_v62  ;;  %v9295_v62 = vld [vmem:[#allocation37_spill] sm:$0xff] }
 0x51d   : > { %9291 = vst [vmem:[#allocation32_spill] sm:$0xff] %v7711_v41  ;;  %v7713_v36 = vpop.eup %6190  ;;  %v3748_v52 = vpop.xlane.xlu0 %3747 }
 0x51e   : > { %9292 = vst [vmem:[#allocation33_spill] sm:$0xff] %v7713_v36  ;;  %6200 = vpow2.f32 %v3923_v61  ;;  %v3821_v0 = vsub.f32 %v9293_v12, %v3748_v52  ;;  %v3822_v23 = vsub.f32 %v9294_v17, %v3748_v52  ;;  %v4022_v10 = vadd.f32 %v7713_v36, %v7711_v41  ;;  %v9296_v61 = vld [vmem:[#allocation38_spill] sm:$0xff] }
 0x51f   : > { %6202 = vpow2.f32 %v3925_v9 }
 0x520   : > { %v7719_v15 = vpop.eup %6192  ;;  %v3927_v4 = vmul.f32 1.442695, %v3821_v0  ;;  %v3929_v35 = vmul.f32 1.442695, %v3822_v23  ;;  %4023 = vadd.xlane.f32.xlu0 %v4022_v10  ;;  %v9297_v10 = vld [vmem:[#allocation39_spill] sm:$0xff] }
 0x521   : > { %v7721_v39 = vpop.eup %6194  ;;  %v3751_v59 = vpop.xlane.xlu1 %3750 }
 0x522   : > { %6204 = vpow2.f32 %v3927_v4  ;;  %v3823_v18 = vsub.f32 %v9295_v62, %v3751_v59  ;;  %v3824_v32 = vsub.f32 %v9296_v61, %v3751_v59  ;;  %v4025_v52 = vadd.f32 %v7721_v39, %v7719_v15  ;;  %v9298_v4 = vld [vmem:[#allocation40_spill] sm:$0xff] }
 0x523   : > { %6206 = vpow2.f32 %v3929_v35 }
 0x524   : > { %v7727_v12 = vpop.eup %6196  ;;  %v3931_v9 = vmul.f32 1.442695, %v3823_v18  ;;  %v3933_v17 = vmul.f32 1.442695, %v3824_v32  ;;  %4026 = vadd.xlane.f32.xlu1 %v4025_v52 }
 0x525   : > { %v7729_v0 = vpop.eup %6198  ;;  %v3754_v23 = vpop.xlane.xlu0 %3753 }
 0x526   : > { %6208 = vpow2.f32 %v3931_v9  ;;  %v3825_v41 = vsub.f32 %v9297_v10, %v3754_v23  ;;  %v3826_v36 = vsub.f32 %v9298_v4, %v3754_v23  ;;  %v4028_v59 = vadd.f32 %v7729_v0, %v7727_v12 }
 0x527   : > { %6210 = vpow2.f32 %v3933_v17 }
 0x528   : > { %v7735_v62 = vpop.eup %6200  ;;  %v3935_v35 = vmul.f32 1.442695, %v3825_v41  ;;  %v3937_v61 = vmul.f32 1.442695, %v3826_v36  ;;  %4029 = vadd.xlane.f32.xlu0 %v4028_v59 }
 0x529   : > { %9299 = vst [vmem:[#allocation34_spill] sm:$0xff] %v7735_v62  ;;  %v7737_v18 = vpop.eup %6202 }
 0x52a   : > { %9300 = vst [vmem:[#allocation35_spill] sm:$0xff] %v7737_v18  ;;  %6212 = vpow2.f32 %v3935_v35  ;;  %v4031_v32 = vadd.f32 %v7737_v18, %v7735_v62 }
 0x52b   : > { %6214 = vpow2.f32 %v3937_v61 }
 0x52c   : > { %v7741_v52 = vpop.eup %6204  ;;  %4032 = vadd.xlane.f32.xlu1 %v4031_v32 }
 0x52d   : > { %9301 = vst [vmem:[#allocation36_spill] sm:$0xff] %v7741_v52  ;;  %v7743_v9 = vpop.eup %6206 }
 0x52e   : > { %9302 = vst [vmem:[#allocation37_spill] sm:$0xff] %v7743_v9  ;;  %v4034_v17 = vadd.f32 %v7743_v9, %v7741_v52 }
 0x530   : > { %v7747_v23 = vpop.eup %6208  ;;  %4035 = vadd.xlane.f32.xlu0 %v4034_v17 }
 0x531   : > { %9303 = vst [vmem:[#allocation38_spill] sm:$0xff] %v7747_v23  ;;  %v7749_v41 = vpop.eup %6210 }
 0x532   : > { %9304 = vst [vmem:[#allocation39_spill] sm:$0xff] %v7749_v41  ;;  %v4037_v36 = vadd.f32 %v7749_v41, %v7747_v23 }
 0x534   : > { %v7753_v10 = vpop.eup %6212  ;;  %4038 = vadd.xlane.f32.xlu1 %v4037_v36 }
 0x535   : > { %9305 = vst [vmem:[#allocation40_spill] sm:$0xff] %v7753_v10  ;;  %v7755_v4 = vpop.eup %6214 }
 0x536   : > { %9306 = vst [vmem:[#allocation41_spill] sm:$0xff] %v7755_v4  ;;  %v4040_v59 = vadd.f32 %v7755_v4, %v7753_v10 }
 0x538   : > { %4041 = vadd.xlane.f32.xlu0 %v4040_v59 }
 0x569   : > { %v3973_v35 = vpop.xlane.xlu1 %3972 }
 0x56a   : > { %6216 = vrcp.f32 %v3973_v35 }
 0x56d   : > { %v3976_v61 = vpop.xlane.xlu0 %3975  ;;  %v3757_v32 = vpop.xlane.xlu1 %3756 }
 0x56e   : > { %6218 = vrcp.f32 %v3976_v61  ;;  %v3827_v17 = vsub.f32 %v7513_v26, %v3757_v32  ;;  %v3828_v62 = vsub.f32 %v7515_v5, %v3757_v32 }
 0x570   : > { %v3939_v52 = vmul.f32 1.442695, %v3827_v17  ;;  %v3941_v23 = vmul.f32 1.442695, %v3828_v62 }
 0x571   : > { %v3979_v41 = vpop.xlane.xlu1 %3978  ;;  %v3760_v9 = vpop.xlane.xlu0 %3759 }
 0x572   : > { %6220 = vpow2.f32 %v3939_v52  ;;  %v3829_v36 = vsub.f32 %v7529_v49, %v3760_v9  ;;  %v3830_v18 = vsub.f32 %v7531_v53, %v3760_v9 }
 0x573   : > { %6222 = vpow2.f32 %v3941_v23 }
 0x574   : > { %6224 = vrcp.f32 %v3979_v41  ;;  %v3943_v59 = vmul.f32 1.442695, %v3829_v36  ;;  %v3945_v35 = vmul.f32 1.442695, %v3830_v18  ;;  %v6217_v61 = vpop.eup %6216 }
 0x575   : > { %v3982_v10 = vpop.xlane.xlu0 %3981  ;;  %v3763_v4 = vpop.xlane.xlu1 %3762  ;;  %v4100_v53 = vmul.f32 %v6217_v61, %v7519_v40  ;;  %v4099_v18 = vmul.f32 %v6217_v61, %v7517_v22 }
 0x576   : > { %6226 = vpow2.f32 %v3943_v59  ;;  %v3831_v26 = vsub.f32 %v7539_v14, %v3763_v4  ;;  %v3832_v5 = vsub.f32 %v7541_v42, %v3763_v4 }
 0x577   : > { %6228 = vpow2.f32 %v3945_v35 }
 0x578   : > { %v6219_v62 = vpop.eup %6218  ;;  %6230 = vrcp.f32 %v3982_v10  ;;  %v3947_v52 = vmul.f32 1.442695, %v3831_v26  ;;  %v3949_v32 = vmul.f32 1.442695, %v3832_v5 }
 0x579   : > { %v3985_v49 = vpop.xlane.xlu1 %3984  ;;  %v3766_v17 = vpop.xlane.xlu0 %3765  ;;  %v4102_v9 = vmul.f32 %v6219_v62, %v7533_v51  ;;  %v4101_v23 = vmul.f32 %v6219_v62, %v7527_v54 }
 0x57a   : > { %6232 = vpow2.f32 %v3947_v52  ;;  %v3833_v14 = vsub.f32 %v7558_v34, %v3766_v17  ;;  %v3834_v42 = vsub.f32 %v7561_v2, %v3766_v17 }
 0x57b   : > { %6234 = vpow2.f32 %v3949_v32  ;;  %v5949_v41 = vpack.c.bf16 %v4102_v9, %v4100_v53  ;;  %v5951_v10 = vpack.c.bf16 %v4101_v23, %v4099_v18 }
 0x57c   : > { %v7771_v4 = vpop.eup %6220  ;;  %6236 = vrcp.f32 %v3985_v49  ;;  %v3951_v36 = vmul.f32 1.442695, %v3833_v14  ;;  %v3953_v59 = vmul.f32 1.442695, %v3834_v42 }
 0x57d   : > { %v7773_v40 = vpop.eup %6222  ;;  %5950 = vmatprep.subr.bf16.mxu1 %v5949_v41  ;;  %v3988_v51 = vpop.xlane.xlu0 %3987 }
 0x57e   : > { %v3769_v22 = vpop.xlane.xlu1 %3768  ;;  %v6225_v35 = vpop.eup %6224  ;;  %6238 = vpow2.f32 %v3951_v36  ;;  %5952 = vmatpush1.bf16.xpose.msra.mxu1 %v5951_v10  ;;  %v4043_v2 = vadd.f32 %v7773_v40, %v7771_v4 }
 0x57f   : > { %v3835_v54 = vsub.f32 %v7570_v57, %v3769_v22  ;;  %v3836_v34 = vsub.f32 %v7573_v45, %v3769_v22  ;;  %6240 = vpow2.f32 %v3953_v59  ;;  %v4104_v49 = vmul.f32 %v6225_v35, %v7547_v60 }
 0x580   : > { %v7779_v61 = vpop.eup %6226  ;;  %6242 = vrcp.f32 %v3988_v51  ;;  %4044 = vadd.xlane.f32.xlu1 %v4043_v2  ;;  %v4103_v18 = vmul.f32 %v6225_v35, %v7543_v47 }
 0x581   : > { %v3955_v26 = vmul.f32 1.442695, %v3835_v54  ;;  %v3957_v5 = vmul.f32 1.442695, %v3836_v34  ;;  %v7781_v62 = vpop.eup %6228  ;;  %v3772_v32 = vpop.xlane.xlu0 %3771 }
 0x582   : > { %v3991_v52 = vpop.xlane.xlu1 %3990  ;;  %v6231_v57 = vpop.eup %6230  ;;  %v3837_v45 = vsub.f32 %v7594_v30, %v3772_v32  ;;  %v3838_v17 = vsub.f32 %v7597_v33, %v3772_v32  ;;  %v4046_v53 = vadd.f32 %v7781_v62, %v7779_v61 }
 0x583   : > { %6244 = vpow2.f32 %v3955_v26  ;;  %v4106_v9 = vmul.f32 %v6231_v57, %v7563_v6  ;;  %v4105_v23 = vmul.f32 %v6231_v57, %v7555_v31 }
 0x584   : > { %6246 = vpow2.f32 %v3957_v5  ;;  %v7791_v14 = vpop.eup %6232  ;;  %v3959_v42 = vmul.f32 1.442695, %v3837_v45  ;;  %v3961_v60 = vmul.f32 1.442695, %v3838_v17  ;;  %4047 = vadd.xlane.f32.xlu0 %v4046_v53 }
 0x585   : > { %v7793_v41 = vpop.eup %6234  ;;  %6248 = vrcp.f32 %v3991_v52  ;;  %v5953_v30 = vpack.c.bf16 %v4106_v9, %v4104_v49  ;;  %v3994_v33 = vpop.xlane.xlu0 %3993  ;;  %v5955_v36 = vpack.c.bf16 %v4105_v23, %v4103_v18 }
 0x586   : > { %v3775_v10 = vpop.xlane.xlu1 %3774  ;;  %v6237_v59 = vpop.eup %6236  ;;  %6250 = vpow2.f32 %v3959_v42  ;;  %v4049_v31 = vadd.f32 %v7793_v41, %v7791_v14 }
 0x587   : > { %v3839_v6 = vsub.f32 %v7606_v11, %v3775_v10  ;;  %v3840_v47 = vsub.f32 %v7609_v37, %v3775_v10  ;;  %6252 = vpow2.f32 %v3961_v60  ;;  %5954 = vmatprep.subr.bf16.mxu1 %v5953_v30  ;;  %v4108_v2 = vmul.f32 %v6237_v59, %v7579_v25 }
 0x588   : > { %v7799_v51 = vpop.eup %6238  ;;  %6254 = vrcp.f32 %v3994_v33  ;;  %5956 = vmatpush1.bf16.xpose.msra.mxu1 %v5955_v36  ;;  %4050 = vadd.xlane.f32.xlu1 %v4049_v31  ;;  %v4107_v49 = vmul.f32 %v6237_v59, %v7575_v43 }
 0x589   : > { %v3963_v22 = vmul.f32 1.442695, %v3839_v6  ;;  %v3965_v35 = vmul.f32 1.442695, %v3840_v47  ;;  %v7801_v54 = vpop.eup %6240  ;;  %v3778_v34 = vpop.xlane.xlu0 %3777 }
 0x58a   : > { %v6243_v11 = vpop.eup %6242  ;;  %v3997_v37 = vpop.xlane.xlu1 %3996  ;;  %v3841_v26 = vsub.f32 %v7626_v19, %v3778_v34  ;;  %v3842_v5 = vsub.f32 %v7629_v63, %v3778_v34  ;;  %v4052_v52 = vadd.f32 %v7801_v54, %v7799_v51 }
 0x58b   : > { %6256 = vpow2.f32 %v3963_v22  ;;  %v4110_v32 = vmul.f32 %v6243_v11, %v7599_v29  ;;  %v4109_v57 = vmul.f32 %v6243_v11, %v7591_v44 }
 0x58c   : > { %6258 = vpow2.f32 %v3965_v35  ;;  %v3967_v25 = vmul.f32 1.442695, %v3841_v26  ;;  %v3969_v17 = vmul.f32 1.442695, %v3842_v5  ;;  %4053 = vadd.xlane.f32.xlu0 %v4052_v52 }
 0x58d   : > { %v7811_v45 = vpop.eup %6244  ;;  %6260 = vrcp.f32 %v3997_v37  ;;  %v5957_v19 = vpack.c.bf16 %v4110_v32, %v4108_v2  ;;  %v4000_v63 = vpop.xlane.xlu0 %3999  ;;  %v5959_v9 = vpack.c.bf16 %v4109_v57, %v4107_v49 }
 0x58e   : > { %v7813_v53 = vpop.eup %6246  ;;  %6262 = vpow2.f32 %v3967_v25 }
 0x58f   : > { %v4055_v18 = vadd.f32 %v7813_v53, %v7811_v45  ;;  %v6249_v29 = vpop.eup %6248  ;;  %6264 = vpow2.f32 %v3969_v17  ;;  %5958 = vmatprep.subr.bf16.mxu1 %v5957_v19 }
 0x590   : > { %v7817_v43 = vpop.eup %6250  ;;  %6266 = vrcp.f32 %v4000_v63  ;;  %5960 = vmatpush1.bf16.xpose.msra.mxu1 %v5959_v9  ;;  %v4112_v30 = vmul.f32 %v6249_v29, %v7615_v58  ;;  %v4111_v10 = vmul.f32 %v6249_v29, %v7611_v38 }
 0x591   : > { %4056 = vadd.xlane.f32.xlu1 %v4055_v18  ;;  %v7819_v44 = vpop.eup %6252  ;;  %v4003_v23 = vpop.xlane.xlu1 %4002 }
 0x592   : > { %v6255_v42 = vpop.eup %6254  ;;  %v4058_v60 = vadd.f32 %v7819_v44, %v7817_v43  ;;  %6268 = vrcp.f32 %v4003_v23 }
 0x593   : > { %v4114_v33 = vmul.f32 %v6255_v42, %v7631_v3  ;;  %v4113_v36 = vmul.f32 %v6255_v42, %v7623_v7 }
 0x594   : > { %4059 = vadd.xlane.f32.xlu0 %v4058_v60 }
 0x595   : > { %v7827_v59 = vpop.eup %6256  ;;  %v5961_v47 = vpack.c.bf16 %v4114_v33, %v4112_v30  ;;  %v4006_v31 = vpop.xlane.xlu0 %4005  ;;  %v5963_v22 = vpack.c.bf16 %v4113_v36, %v4111_v10 }
 0x596   : > { %v7829_v6 = vpop.eup %6258  ;;  %6270 = vrcp.f32 %v4006_v31  ;;  %v9307_v31 = vld [vmem:[#allocation29_spill] sm:$0xff] }
 0x597   : > { %v4061_v35 = vadd.f32 %v7829_v6, %v7827_v59  ;;  %v6261_v58 = vpop.eup %6260  ;;  %5962 = vmatprep.subr.bf16.mxu1 %v5961_v47 }
 0x598   : > { %v7833_v3 = vpop.eup %6262  ;;  %5964 = vmatpush1.bf16.xpose.msra.mxu1 %v5963_v22  ;;  %v4116_v11 = vmul.f32 %v6261_v58, %v7641_v8  ;;  %v4115_v26 = vmul.f32 %v6261_v58, %v7637_v1  ;;  %v9308_v22 = vld [vmem:[#allocation28_spill] sm:$0xff] }
 0x599   : > { %4062 = vadd.xlane.f32.xlu1 %v4061_v35  ;;  %v7835_v38 = vpop.eup %6264  ;;  %v4009_v7 = vpop.xlane.xlu1 %4008 }
 0x59a   : > { %v6267_v34 = vpop.eup %6266  ;;  %v4064_v2 = vadd.f32 %v7835_v38, %v7833_v3  ;;  %6272 = vrcp.f32 %v4009_v7 }
 0x59b   : > { %v4118_v37 = vmul.f32 %v6267_v34, %v7649_v24  ;;  %v4117_v5 = vmul.f32 %v6267_v34, %v7647_v21 }
 0x59c   : > { %4065 = vadd.xlane.f32.xlu0 %v4064_v2  ;;  %v6269_v57 = vpop.eup %6268 }
 0x59d   : > { %v5965_v52 = vpack.c.bf16 %v4118_v37, %v4116_v11  ;;  %v4012_v32 = vpop.xlane.xlu0 %4011  ;;  %v5967_v49 = vpack.c.bf16 %v4117_v5, %v4115_v26  ;;  %v4120_v19 = vmul.f32 %v6269_v57, %v7657_v46  ;;  %v4119_v1 = vmul.f32 %v6269_v57, %v7655_v48  ;;  %v9309_v11 = vld [vmem:[#allocation31_spill] sm:$0xff]  ;;  %v9310_v26 = vld [vmem:[#allocation33_spill] sm:$0xff]  ;;  %v9311_v5 = vld [vmem:[#allocation32_spill] sm:$0xff] }
 0x59e   : > { %6274 = vrcp.f32 %v4012_v32 }
 0x59f   : > { %5966 = vmatprep.subr.bf16.mxu1 %v5965_v52  ;;  %v9312_v52 = vld [vmem:[#allocation30_spill] sm:$0xff] }
 0x5a0   : > { %v6271_v25 = vpop.eup %6270  ;;  %5968 = vmatpush1.bf16.xpose.msra.mxu1 %v5967_v49 }
 0x5a1   : > { %v4015_v17 = vpop.xlane.xlu1 %4014  ;;  %v4122_v8 = vmul.f32 %v6271_v25, %v7665_v55  ;;  %v4121_v24 = vmul.f32 %v6271_v25, %v7663_v27 }
 0x5a2   : > { %6276 = vrcp.f32 %v4015_v17 }
 0x5a3   : > { %v5969_v21 = vpack.c.bf16 %v4122_v8, %v4120_v19  ;;  %v5971_v63 = vpack.c.bf16 %v4121_v24, %v4119_v1 }
 0x5a4   : > { %v6273_v18 = vpop.eup %6272 }
 0x5a5   : > { %5970 = vmatprep.subr.bf16.mxu1 %v5969_v21  ;;  %v4018_v9 = vpop.xlane.xlu0 %4017  ;;  %v4124_v42 = vmul.f32 %v6273_v18, %v7673_v20  ;;  %v4123_v27 = vmul.f32 %v6273_v18, %v7671_v56 }
 0x5a6   : > { %6278 = vrcp.f32 %v4018_v9 }
 0x5a8   : > { %v6275_v29 = vpop.eup %6274  ;;  %5972 = vmatpush1.bf16.xpose.msra.mxu1 %v5971_v63 }
 0x5a9   : > { %v4021_v23 = vpop.xlane.xlu1 %4020  ;;  %v4126_v46 = vmul.f32 %v6275_v29, %v7681_v50  ;;  %v4125_v55 = vmul.f32 %v6275_v29, %v7679_v13 }
 0x5aa   : > { %6280 = vrcp.f32 %v4021_v23 }
 0x5ab   : > { %v5973_v60 = vpack.c.bf16 %v4126_v46, %v4124_v42  ;;  %v5975_v48 = vpack.c.bf16 %v4125_v55, %v4123_v27  ;;  %v9314_v27 = vld [vmem:[#allocation23_spill] sm:$0xff] }
 0x5ac   : > { %v6277_v33 = vpop.eup %6276 }
 0x5ad   : > { %5974 = vmatprep.subr.bf16.mxu1 %v5973_v60  ;;  %v4024_v30 = vpop.xlane.xlu0 %4023  ;;  %v4128_v47 = vmul.f32 %v6277_v33, %v7689_v28  ;;  %v4127_v13 = vmul.f32 %v6277_v33, %v9308_v22  ;;  %v4237_v60 = vrot.slane %v9314_v27, 4 }
 0x5ae   : > { %6282 = vrcp.f32 %v4024_v30  ;;  %v9315_v30 = vld [vmem:[#allocation22_spill] sm:$0xff] }
 0x5b0   : > { %v6279_v10 = vpop.eup %6278  ;;  %5976 = vmatpush1.bf16.xpose.msra.mxu1 %v5975_v48 }
 0x5b1   : > { %v4027_v36 = vpop.xlane.xlu1 %4026  ;;  %v4130_v20 = vmul.f32 %v6279_v10, %v7697_v16  ;;  %v4129_v50 = vmul.f32 %v6279_v10, %v9307_v31 }
 0x5b2   : > { %6284 = vrcp.f32 %v4027_v36 }
 0x5b3   : > { %v5977_v35 = vpack.c.bf16 %v4130_v20, %v4128_v47  ;;  %v5979_v56 = vpack.c.bf16 %v4129_v50, %v4127_v13  ;;  %v9319_v47 = vld [vmem:[#allocation34_spill] sm:$0xff] }
 0x5b4   : > { %v6281_v7 = vpop.eup %6280 }
 0x5b5   : > { %5978 = vmatprep.subr.bf16.mxu1 %v5977_v35  ;;  %v4030_v58 = vpop.xlane.xlu0 %4029  ;;  %v4132_v37 = vmul.f32 %v6281_v7, %v9309_v11  ;;  %v4131_v32 = vmul.f32 %v6281_v7, %v9312_v52  ;;  %v9320_v35 = vld [vmem:[#allocation39_spill] sm:$0xff]  ;;  %v9323_v11 = vld [vmem:[#allocation38_spill] sm:$0xff] }
 0x5b6   : > { %6286 = vrcp.f32 %v4030_v58  ;;  %v9321_v58 = vld [vmem:[#allocation41_spill] sm:$0xff] }
 0x5b8   : > { %v6283_v34 = vpop.eup %6282  ;;  %5980 = vmatpush1.bf16.xpose.msra.mxu1 %v5979_v56  ;;  %v7859_v19 = vpop.f32.mrb[16].mxu1 }
 0x5b9   : > { %v4033_v2 = vpop.xlane.xlu1 %4032  ;;  %v4134_v28 = vmul.f32 %v6283_v34, %v9310_v26  ;;  %v4133_v16 = vmul.f32 %v6283_v34, %v9311_v5  ;;  %9313 = vst [vmem:[#allocation29_spill] sm:$0xff] %v7859_v19  ;;  %v3193_v8 = vpop.f32.mrb[17].mxu1  ;;  %v9322_v34 = vld [vmem:[#allocation40_spill] sm:$0xff]  ;;  %v9324_v5 = vmov 0  }
 0x5ba   : > { %6288 = vrcp.f32 %v4033_v2  ;;  %v5210_v1 = vrot.slane %v3193_v8, 4  ;;  %4227 = vmatprep.mubr.f32.mxu1 %v3193_v8 }
 0x5bb   : > { %v5981_v49 = vpack.c.bf16 %v4134_v28, %v4132_v37  ;;  %v5983_v57 = vpack.c.bf16 %v4133_v16, %v4131_v32 }
 0x5bc   : > { %v6285_v17 = vpop.eup %6284  ;;  %5277 = vmatprep.mubr.f32.mxu0 %v5210_v1 }
 0x5bd   : > { %5982 = vmatprep.subr.bf16.mxu1 %v5981_v49  ;;  %v4036_v25 = vpop.xlane.xlu0 %4035  ;;  %v4136_v63 = vmul.f32 %v6285_v17, %v7721_v39  ;;  %v4135_v29 = vmul.f32 %v6285_v17, %v7719_v15  ;;  %v4236_v39 = vrot.slane %v9315_v30, 4  ;;  %v9318_v15 = vld [vmem:[#allocation36_spill] sm:$0xff] }
 0x5be   : > { %6290 = vrcp.f32 %v4036_v25 }
 0x5c0   : > { %v6287_v24 = vpop.eup %6286  ;;  %5984 = vmatpush1.bf16.xpose.msra.mxu1 %v5983_v57 }
 0x5c1   : > { %v4039_v21 = vpop.xlane.xlu1 %4038  ;;  %v4138_v9 = vmul.f32 %v6287_v24, %v7729_v0  ;;  %v4137_v18 = vmul.f32 %v6287_v24, %v7727_v12  ;;  %v9316_v0 = vld [vmem:[#allocation35_spill] sm:$0xff]  ;;  %v9317_v12 = vld [vmem:[#allocation37_spill] sm:$0xff] }
 0x5c2   : > { %6292 = vrcp.f32 %v4039_v21 }
 0x5c3   : > { %v5985_v23 = vpack.c.bf16 %v4138_v9, %v4136_v63  ;;  %v5987_v42 = vpack.c.bf16 %v4137_v18, %v4135_v29 }
 0x5c4   : > { %v6289_v55 = vpop.eup %6288 }
 0x5c5   : > { %5986 = vmatprep.subr.bf16.mxu1 %v5985_v23  ;;  %v4042_v46 = vpop.xlane.xlu0 %4041  ;;  %v4140_v33 = vmul.f32 %v6289_v55, %v9316_v0  ;;  %v4139_v20 = vmul.f32 %v6289_v55, %v9319_v47  ;;  %v9325_v47 = vld [vmem:[#allocation25_spill] sm:$0xff] }
 0x5c6   : > { %6294 = vrcp.f32 %v4042_v46 }
 0x5c8   : > { %v6291_v48 = vpop.eup %6290  ;;  %5988 = vmatpush1.bf16.xpose.msra.mxu1 %v5987_v42 }
 0x5c9   : > { %4272 = vxpose.xlu0.b32.start.end [1/1] (short) %v4237_v60, 128  ;;  %v4142_v10 = vmul.f32 %v6291_v48, %v9317_v12  ;;  %v4141_v36 = vmul.f32 %v6291_v48, %v9318_v15 }
 0x5cb   : > { %v5989_v31 = vpack.c.bf16 %v4142_v10, %v4140_v33  ;;  %v5991_v50 = vpack.c.bf16 %v4141_v36, %v4139_v20 }
 0x5cc   : > { %4240 = vxpose.xlu1.b32.start.end [1/1] (short) %v4236_v39, 128  ;;  %v6293_v22 = vpop.eup %6292 }
 0x5cd   : > { %5990 = vmatprep.subr.bf16.mxu1 %v5989_v31  ;;  %v4144_v56 = vmul.f32 %v6293_v22, %v9320_v35  ;;  %v4143_v37 = vmul.f32 %v6293_v22, %v9323_v11 }
 0x5d0   : > { %v6295_v13 = vpop.eup %6294  ;;  %5992 = vmatpush1.bf16.xpose.msra.mxu1 %v5991_v50 }
 0x5d1   : > { %v4146_v7 = vmul.f32 %v6295_v13, %v9321_v58  ;;  %v4145_v2 = vmul.f32 %v6295_v13, %v9322_v34 }
 0x5d3   : > { %v5993_v26 = vpack.c.bf16 %v4146_v7, %v4144_v56  ;;  %v5995_v28 = vpack.c.bf16 %v4145_v2, %v4143_v37 }
 0x5d5   : > { %5994 = vmatprep.subr.bf16.mxu1 %v5993_v26 }
 0x5d8   : > { %5996 = vmatpush1.bf16.xpose.msra.mxu1 %v5995_v28 }
 0x5ea   : > { %6105 = vset.pattern.permute.xlu1 %v9324_v5 }
 0x60d   : > { %v4045_v16 = vpop.xlane.xlu1 %4044 }
 0x60e   : > { %6296 = vrcp.f32 %v4045_v16 }
 0x611   : > { %v4048_v52 = vpop.xlane.xlu0 %4047 }
 0x612   : > { %6298 = vrcp.f32 %v4048_v52 }
 0x615   : > { %v4051_v32 = vpop.xlane.xlu1 %4050 }
 0x616   : > { %6300 = vrcp.f32 %v4051_v32 }
 0x618   : > { %v6297_v57 = vpop.eup %6296 }
 0x619   : > { %v4054_v49 = vpop.xlane.xlu0 %4053  ;;  %v4148_v8 = vmul.f32 %v6297_v57, %v7773_v40  ;;  %v4147_v1 = vmul.f32 %v6297_v57, %v7771_v4 }
 0x61a   : > { %6302 = vrcp.f32 %v4054_v49 }
 0x61c   : > { %v6299_v25 = vpop.eup %6298 }
 0x61d   : > { %v4150_v24 = vmul.f32 %v6299_v25, %v7781_v62  ;;  %v4149_v21 = vmul.f32 %v6299_v25, %v7779_v61 }
 0x61e   : > { %v4057_v17 = vpop.xlane.xlu1 %4056 }
 0x61f   : > { %v5997_v63 = vpack.c.bf16 %v4150_v24, %v4148_v8  ;;  %v5999_v9 = vpack.c.bf16 %v4149_v21, %v4147_v1  ;;  %6304 = vrcp.f32 %v4057_v17 }
 0x620   : > { %v6301_v29 = vpop.eup %6300 }
 0x621   : > { %5998 = vmatprep.subr.bf16.mxu1 %v5997_v63  ;;  %v4060_v18 = vpop.xlane.xlu0 %4059  ;;  %v4152_v46 = vmul.f32 %v6301_v29, %v7793_v41  ;;  %v4151_v62 = vmul.f32 %v6301_v29, %v7791_v14 }
 0x622   : > { %6306 = vrcp.f32 %v4060_v18  ;;  %6000 = vmatpush1.bf16.xpose.msra.mxu1 %v5999_v9 }
 0x624   : > { %v6303_v23 = vpop.eup %6302 }
 0x625   : > { %v4154_v40 = vmul.f32 %v6303_v23, %v7801_v54  ;;  %v4153_v4 = vmul.f32 %v6303_v23, %v7799_v51 }
 0x626   : > { %v4063_v42 = vpop.xlane.xlu1 %4062 }
 0x627   : > { %v6001_v55 = vpack.c.bf16 %v4154_v40, %v4152_v46  ;;  %v6003_v61 = vpack.c.bf16 %v4153_v4, %v4151_v62  ;;  %6308 = vrcp.f32 %v4063_v42 }
 0x629   : > { %6002 = vmatprep.subr.bf16.mxu1 %v6001_v55  ;;  %v4066_v27 = vpop.xlane.xlu0 %4065  ;;  %v6305_v60 = vpop.eup %6304 }
 0x62a   : > { %6310 = vrcp.f32 %v4066_v27  ;;  %6004 = vmatpush1.bf16.xpose.msra.mxu1 %v6003_v61  ;;  %v4156_v30 = vmul.f32 %v6305_v60, %v7813_v53  ;;  %v4155_v41 = vmul.f32 %v6305_v60, %v7811_v45  ;;  %v4305_v45 = vrot.slane %v9325_v47, 4 }
 0x62c   : > { %v6307_v48 = vpop.eup %6306 }
 0x62d   : > { %v4158_v39 = vmul.f32 %v6307_v48, %v7819_v44  ;;  %v4157_v54 = vmul.f32 %v6307_v48, %v7817_v43  ;;  %v9326_v43 = vld [vmem:[#allocation24_spill] sm:$0xff] }
 0x62e   : > { %v4304_v20 = vrot.slane %v9326_v43, 4 }
 0x62f   : > { %v6005_v14 = vpack.c.bf16 %v4158_v39, %v4156_v30  ;;  %v6007_v0 = vpack.c.bf16 %v4157_v54, %v4155_v41 }
 0x631   : > { %6006 = vmatprep.subr.bf16.mxu1 %v6005_v14  ;;  %v6309_v51 = vpop.eup %6308 }
 0x632   : > { %6008 = vmatpush1.bf16.xpose.msra.mxu1 %v6007_v0  ;;  %v4160_v12 = vmul.f32 %v6309_v51, %v7829_v6  ;;  %v4159_v15 = vmul.f32 %v6309_v51, %v7827_v59  ;;  %v9327_v6 = vmov 0.0  }
 0x634   : > { %v6311_v33 = vpop.eup %6310 }
 0x635   : > { %v4162_v10 = vmul.f32 %v6311_v33, %v7835_v38  ;;  %v4161_v53 = vmul.f32 %v6311_v33, %v7833_v3 }
 0x637   : > { %v6009_v36 = vpack.c.bf16 %v4162_v10, %v4160_v12  ;;  %v6011_v44 = vpack.c.bf16 %v4161_v53, %v4159_v15 }
 0x639   : > { %6010 = vmatprep.subr.bf16.mxu1 %v6009_v36 }
 0x63a   : > { %6012 = vmatpush1.bf16.xpose.msra.mxu1 %v6011_v44 }
 0x63b   : > { %5572 = vmatprep.subr.msk.mxu1 %vm749_vm0, %v4305_v45 }
 0x641   : > { %4228 = vmatmul.mubr.f32.vlgmr.msra.gmra.mrb[18].mxu1 %v7859_v19 }
 0x642   : > { %5573 = vmatpush1.msk.msra.mxu1 %vm749_vm0, %v4304_v20  ;;  %4470 = vmatprep.mubr.f32.mxu1 %v9327_v6 }
 0x649   : > { %v4288_v58 = vpop.trf.xlu0 }
 0x64c   : > { %v4256_v38 = vpop.trf.xlu1 }
 0x64d   : > { %5574 = vmatmul.mubr.msk.f32.vlgmr.msra.gmra.mrb[20].mxu1 %vm834_vm1, %v4256_v38  ;;  %v4289_v2 = vpop.trf.xlu0 }
 0x64e   : > { %4476 = vmatprep.mubr.f32.mxu1 %v9327_v6 }
 0x650   : > { %v4257_v59 = vpop.trf.xlu1 }
 0x651   : > { %5575 = vmatmul.mubr.msk.f32.gmra.mrb[22].mxu1 %vm834_vm1, %v4257_v59  ;;  %v4290_v37 = vpop.trf.xlu0 }
 0x652   : > { %4482 = vmatprep.mubr.f32.mxu1 %v9327_v6 }
 0x654   : > { %v4258_v3 = vpop.trf.xlu1 }
 0x655   : > { %5576 = vmatmul.mubr.msk.f32.gmra.mrb[24].mxu1 %vm834_vm1, %v4258_v3  ;;  %v4291_v16 = vpop.trf.xlu0 }
 0x656   : > { %4488 = vmatprep.mubr.f32.mxu1 %v9327_v6 }
 0x658   : > { %v4259_v31 = vpop.trf.xlu1 }
 0x659   : > { %5577 = vmatmul.mubr.msk.f32.gmra.mrb[26].mxu1 %vm834_vm1, %v4259_v31  ;;  %v4292_v32 = vpop.trf.xlu0 }
 0x65a   : > { %4494 = vmatprep.mubr.f32.mxu1 %v9327_v6 }
 0x65c   : > { %v4260_v50 = vpop.trf.xlu1 }
 0x65d   : > { %5578 = vmatmul.mubr.msk.f32.gmra.mrb[28].mxu1 %vm834_vm1, %v4260_v50  ;;  %v4293_v57 = vpop.trf.xlu0 }
 0x65e   : > { %4500 = vmatprep.mubr.f32.mxu1 %v9327_v6 }
 0x660   : > { %v4261_v22 = vpop.trf.xlu1 }
 0x661   : > { %5579 = vmatmul.mubr.msk.f32.gmra.mrb[30].mxu1 %vm834_vm1, %v4261_v22  ;;  %v4294_v25 = vpop.trf.xlu0 }
 0x662   : > { %4506 = vmatprep.mubr.f32.mxu1 %v9327_v6 }
 0x664   : > { %v4262_v13 = vpop.trf.xlu1 }
 0x665   : > { %5580 = vmatmul.mubr.msk.f32.gmra.mrb[32].mxu1 %vm834_vm1, %v4262_v13  ;;  %v4295_v17 = vpop.trf.xlu0 }
 0x666   : > { %4512 = vmatprep.mubr.f32.mxu1 %v9327_v6 }
 0x668   : > { %v4263_v35 = vpop.trf.xlu1 }
 0x669   : > { %5581 = vmatmul.mubr.msk.f32.gmra.mrb[34].mxu1 %vm834_vm1, %v4263_v35  ;;  %v4296_v8 = vpop.trf.xlu0 }
 0x66a   : > { %4518 = vmatprep.mubr.f32.mxu1 %v9327_v6 }
 0x66c   : > { %v4264_v56 = vpop.trf.xlu1 }
 0x66d   : > { %5582 = vmatmul.mubr.msk.f32.gmra.mrb[36].mxu1 %vm834_vm1, %v4264_v56  ;;  %v4297_v24 = vpop.trf.xlu0 }
 0x66e   : > { %4524 = vmatprep.mubr.f32.mxu1 %v9327_v6 }
 0x670   : > { %v4265_v7 = vpop.trf.xlu1 }
 0x671   : > { %5583 = vmatmul.mubr.msk.f32.gmra.mrb[38].mxu1 %vm834_vm1, %v4265_v7  ;;  %v4298_v1 = vpop.trf.xlu0 }
 0x672   : > { %4530 = vmatprep.mubr.f32.mxu1 %v9327_v6 }
 0x674   : > { %v4266_v34 = vpop.trf.xlu1 }
 0x675   : > { %5584 = vmatmul.mubr.msk.f32.gmra.mrb[40].mxu1 %vm834_vm1, %v4266_v34  ;;  %v4299_v21 = vpop.trf.xlu0 }
 0x676   : > { %4536 = vmatprep.mubr.f32.mxu1 %v9327_v6 }
 0x678   : > { %v4267_v11 = vpop.trf.xlu1 }
 0x679   : > { %5585 = vmatmul.mubr.msk.f32.gmra.mrb[42].mxu1 %vm834_vm1, %v4267_v11  ;;  %v4300_v63 = vpop.trf.xlu0 }
 0x67a   : > { %4542 = vmatprep.mubr.f32.mxu1 %v9327_v6 }
 0x67c   : > { %v4268_v26 = vpop.trf.xlu1 }
 0x67d   : > { %5586 = vmatmul.mubr.msk.f32.gmra.mrb[44].mxu1 %vm834_vm1, %v4268_v26  ;;  %v4301_v9 = vpop.trf.xlu0 }
 0x67e   : > { %4548 = vmatprep.mubr.f32.mxu1 %v9327_v6 }
 0x680   : > { %v4269_v28 = vpop.trf.xlu1 }
 0x681   : > { %5587 = vmatmul.mubr.msk.f32.gmra.mrb[46].mxu1 %vm834_vm1, %v4269_v28  ;;  %v4302_v18 = vpop.trf.xlu0 }
 0x682   : > { %4554 = vmatprep.mubr.f32.mxu1 %v9327_v6 }
 0x684   : > { %v4270_v52 = vpop.trf.xlu1 }
 0x685   : > { %5588 = vmatmul.mubr.msk.f32.gmra.mrb[48].mxu1 %vm834_vm1, %v4270_v52  ;;  %v4303_v29 = vpop.trf.xlu0 }
 0x686   : > { %4560 = vmatprep.mubr.f32.mxu1 %v9327_v6 }
 0x688   : > { %v4271_v49 = vpop.trf.xlu1 }
 0x689   : > { %5589 = vmatmul.mubr.msk.f32.gmra.mrb[50].mxu1 %vm834_vm1, %v4271_v49 }
 0x68a   : > { %4566 = vmatprep.mubr.f32.mxu1 %v9327_v6 }
 0x68d   : > { %5590 = vmatmul.mubr.msk.f32.gmra.mrb[52].mxu1 %vm834_vm1, %v4288_v58 }
 0x68e   : > { %4572 = vmatprep.mubr.f32.mxu1 %v9327_v6 }
 0x691   : > { %5591 = vmatmul.mubr.msk.f32.gmra.mrb[54].mxu1 %vm834_vm1, %v4289_v2 }
 0x692   : > { %4578 = vmatprep.mubr.f32.mxu1 %v9327_v6 }
 0x695   : > { %5592 = vmatmul.mubr.msk.f32.gmra.mrb[56].mxu1 %vm834_vm1, %v4290_v37 }
 0x696   : > { %4584 = vmatprep.mubr.f32.mxu1 %v9327_v6 }
 0x699   : > { %5593 = vmatmul.mubr.msk.f32.gmra.mrb[58].mxu1 %vm834_vm1, %v4291_v16 }
 0x69a   : > { %4590 = vmatprep.mubr.f32.mxu1 %v9327_v6 }
 0x69d   : > { %5594 = vmatmul.mubr.msk.f32.gmra.mrb[60].mxu1 %vm834_vm1, %v4292_v32 }
 0x69e   : > { %4596 = vmatprep.mubr.f32.mxu1 %v9327_v6 }
 0x6a1   : > { %5595 = vmatmul.mubr.msk.f32.gmra.mrb[62].mxu1 %vm834_vm1, %v4293_v57 }
 0x6a2   : > { %4602 = vmatprep.mubr.f32.mxu1 %v9327_v6 }
 0x6a5   : > { %5596 = vmatmul.mubr.msk.f32.gmra.mrb[64].mxu1 %vm834_vm1, %v4294_v25 }
 0x6a6   : > { %4608 = vmatprep.mubr.f32.mxu1 %v9327_v6 }
 0x6a9   : > { %5597 = vmatmul.mubr.msk.f32.gmra.mrb[66].mxu1 %vm834_vm1, %v4295_v17 }
 0x6aa   : > { %4614 = vmatprep.mubr.f32.mxu1 %v9327_v6 }
 0x6ad   : > { %5598 = vmatmul.mubr.msk.f32.gmra.mrb[68].mxu1 %vm834_vm1, %v4296_v8 }
 0x6ae   : > { %4620 = vmatprep.mubr.f32.mxu1 %v9327_v6 }
 0x6b1   : > { %5599 = vmatmul.mubr.msk.f32.gmra.mrb[70].mxu1 %vm834_vm1, %v4297_v24 }
 0x6b2   : > { %4626 = vmatprep.mubr.f32.mxu1 %v9327_v6 }
 0x6b5   : > { %5600 = vmatmul.mubr.msk.f32.gmra.mrb[72].mxu1 %vm834_vm1, %v4298_v1 }
 0x6b6   : > { %4632 = vmatprep.mubr.f32.mxu1 %v9327_v6 }
 0x6b9   : > { %5601 = vmatmul.mubr.msk.f32.gmra.mrb[74].mxu1 %vm834_vm1, %v4299_v21 }
 0x6ba   : > { %4638 = vmatprep.mubr.f32.mxu1 %v9327_v6 }
 0x6bd   : > { %5602 = vmatmul.mubr.msk.f32.gmra.mrb[76].mxu1 %vm834_vm1, %v4300_v63 }
 0x6be   : > { %4644 = vmatprep.mubr.f32.mxu1 %v9327_v6 }
 0x6c1   : > { %5603 = vmatmul.mubr.msk.f32.gmra.mrb[78].mxu1 %vm834_vm1, %v4301_v9 }
 0x6c2   : > { %4650 = vmatprep.mubr.f32.mxu1 %v9327_v6 }
 0x6c5   : > { %5604 = vmatmul.mubr.msk.f32.gmra.mrb[80].mxu1 %vm834_vm1, %v4302_v18 }
 0x6c6   : > { %4656 = vmatprep.mubr.f32.mxu1 %v9327_v6 }
 0x6c9   : > { %5605 = vmatmul.mubr.msk.f32.gmra.mrb[82].mxu1 %vm834_vm1, %v4303_v29 }
 0x714   : > { %v7961_v23 = vpop.f32.mrb[18].mxu1 }
 0x715   : > { %9328 = vst [vmem:[#allocation28_spill] sm:$0xff] %v7961_v23  ;;  %v7963_v42 = vpop.f32.mrb[19].mxu1 }
 0x716   : > { %9329 = vst [vmem:[#allocation31_spill] sm:$0xff] %v7963_v42 }
 0x720   : > { %v4472_v46 = vpop.f32.mrb[20].mxu1 }
 0x721   : > { %v7965_v40 = vmul.f32 0.5, %v4472_v46  ;;  %v4474_v62 = vpop.f32.mrb[21].mxu1 }
 0x722   : > { %v7967_v4 = vmul.f32 0.5, %v4474_v62 }
 0x724   : > { %v4727_v55 = vmax.f32 %v7965_v40, %v7967_v4  ;;  %v4478_v61 = vpop.f32.mrb[22].mxu1 }
 0x725   : > { %v7971_v27 = vmul.f32 0.5, %v4478_v61  ;;  %v4480_v60 = vpop.f32.mrb[23].mxu1 }
 0x726   : > { %v7973_v48 = vmul.f32 0.5, %v4480_v60  ;;  %4728 = vmax.xlane.f32.xlu0 %v4727_v55 }
 0x728   : > { %v4730_v30 = vmax.f32 %v7971_v27, %v7973_v48  ;;  %v4484_v39 = vpop.f32.mrb[24].mxu1 }
 0x729   : > { %v7977_v41 = vmul.f32 0.5, %v4484_v39  ;;  %v4486_v54 = vpop.f32.mrb[25].mxu1 }
 0x72a   : > { %v7979_v14 = vmul.f32 0.5, %v4486_v54  ;;  %4731 = vmax.xlane.f32.xlu1 %v4730_v30 }
 0x72c   : > { %v4733_v0 = vmax.f32 %v7977_v41, %v7979_v14  ;;  %v4490_v51 = vpop.f32.mrb[26].mxu1 }
 0x72d   : > { %v7983_v33 = vmul.f32 0.5, %v4490_v51  ;;  %v4492_v12 = vpop.f32.mrb[27].mxu1 }
 0x72e   : > { %v7985_v10 = vmul.f32 0.5, %v4492_v12  ;;  %4734 = vmax.xlane.f32.xlu1 %v4733_v0 }
 0x730   : > { %v4736_v15 = vmax.f32 %v7983_v33, %v7985_v10  ;;  %v4496_v53 = vpop.f32.mrb[28].mxu1 }
 0x731   : > { %v7989_v36 = vmul.f32 0.5, %v4496_v53  ;;  %v4498_v44 = vpop.f32.mrb[29].mxu1 }
 0x732   : > { %v7991_v47 = vmul.f32 0.5, %v4498_v44  ;;  %4737 = vmax.xlane.f32.xlu0 %v4736_v15 }
 0x734   : > { %v4739_v45 = vmax.f32 %v7989_v36, %v7991_v47  ;;  %v4502_v43 = vpop.f32.mrb[30].mxu1 }
 0x735   : > { %v7995_v20 = vmul.f32 0.5, %v4502_v43  ;;  %v4504_v38 = vpop.f32.mrb[31].mxu1 }
 0x736   : > { %v7997_v59 = vmul.f32 0.5, %v4504_v38  ;;  %4740 = vmax.xlane.f32.xlu1 %v4739_v45 }
 0x738   : > { %v4742_v3 = vmax.f32 %v7995_v20, %v7997_v59  ;;  %v4508_v31 = vpop.f32.mrb[32].mxu1 }
 0x739   : > { %v8001_v50 = vmul.f32 0.5, %v4508_v31  ;;  %v4510_v22 = vpop.f32.mrb[33].mxu1 }
 0x73a   : > { %v8003_v13 = vmul.f32 0.5, %v4510_v22  ;;  %4743 = vmax.xlane.f32.xlu0 %v4742_v3 }
 0x73c   : > { %v4745_v35 = vmax.f32 %v8001_v50, %v8003_v13  ;;  %v4514_v56 = vpop.f32.mrb[34].mxu1 }
 0x73d   : > { %v8007_v58 = vmul.f32 0.5, %v4514_v56  ;;  %v4516_v7 = vpop.f32.mrb[35].mxu1 }
 0x73e   : > { %v8009_v34 = vmul.f32 0.5, %v4516_v7  ;;  %4746 = vmax.xlane.f32.xlu1 %v4745_v35 }
 0x740   : > { %v4748_v2 = vmax.f32 %v8007_v58, %v8009_v34  ;;  %v4520_v11 = vpop.f32.mrb[36].mxu1 }
 0x741   : > { %v8013_v37 = vmul.f32 0.5, %v4520_v11  ;;  %v4522_v26 = vpop.f32.mrb[37].mxu1 }
 0x742   : > { %v8015_v28 = vmul.f32 0.5, %v4522_v26  ;;  %4749 = vmax.xlane.f32.xlu0 %v4748_v2 }
 0x744   : > { %v4751_v16 = vmax.f32 %v8013_v37, %v8015_v28  ;;  %v4526_v52 = vpop.f32.mrb[38].mxu1 }
 0x745   : > { %v8019_v32 = vmul.f32 0.5, %v4526_v52  ;;  %v4528_v49 = vpop.f32.mrb[39].mxu1 }
 0x746   : > { %v8021_v57 = vmul.f32 0.5, %v4528_v49  ;;  %4752 = vmax.xlane.f32.xlu1 %v4751_v16 }
 0x748   : > { %v4754_v25 = vmax.f32 %v8019_v32, %v8021_v57  ;;  %v4532_v17 = vpop.f32.mrb[40].mxu1 }
 0x749   : > { %v8025_v8 = vmul.f32 0.5, %v4532_v17  ;;  %v4534_v24 = vpop.f32.mrb[41].mxu1 }
 0x74a   : > { %v8027_v1 = vmul.f32 0.5, %v4534_v24  ;;  %4755 = vmax.xlane.f32.xlu0 %v4754_v25 }
 0x74c   : > { %v4757_v21 = vmax.f32 %v8025_v8, %v8027_v1  ;;  %v4538_v63 = vpop.f32.mrb[42].mxu1 }
 0x74d   : > { %v8031_v9 = vmul.f32 0.5, %v4538_v63  ;;  %v4540_v18 = vpop.f32.mrb[43].mxu1 }
 0x74e   : > { %v8033_v29 = vmul.f32 0.5, %v4540_v18  ;;  %4758 = vmax.xlane.f32.xlu1 %v4757_v21 }
 0x750   : > { %v4760_v46 = vmax.f32 %v8031_v9, %v8033_v29  ;;  %v4544_v62 = vpop.f32.mrb[44].mxu1 }
 0x751   : > { %v8037_v55 = vmul.f32 0.5, %v4544_v62  ;;  %v4546_v61 = vpop.f32.mrb[45].mxu1 }
 0x752   : > { %v8039_v60 = vmul.f32 0.5, %v4546_v61  ;;  %4761 = vmax.xlane.f32.xlu0 %v4760_v46 }
 0x754   : > { %v4763_v30 = vmax.f32 %v8037_v55, %v8039_v60  ;;  %v4550_v39 = vpop.f32.mrb[46].mxu1 }
 0x755   : > { %v8043_v54 = vmul.f32 0.5, %v4550_v39  ;;  %v4552_v0 = vpop.f32.mrb[47].mxu1 }
 0x756   : > { %v8045_v51 = vmul.f32 0.5, %v4552_v0  ;;  %4764 = vmax.xlane.f32.xlu1 %v4763_v30 }
 0x758   : > { %v4766_v12 = vmax.f32 %v8043_v54, %v8045_v51  ;;  %v4556_v15 = vpop.f32.mrb[48].mxu1 }
 0x759   : > { %v8049_v53 = vmul.f32 0.5, %v4556_v15  ;;  %v4558_v44 = vpop.f32.mrb[49].mxu1 }
 0x75a   : > { %v8051_v45 = vmul.f32 0.5, %v4558_v44  ;;  %4767 = vmax.xlane.f32.xlu0 %v4766_v12 }
 0x75c   : > { %v4769_v43 = vmax.f32 %v8049_v53, %v8051_v45  ;;  %v4562_v38 = vpop.f32.mrb[50].mxu1 }
 0x75d   : > { %v8055_v3 = vmul.f32 0.5, %v4562_v38  ;;  %v4564_v31 = vpop.f32.mrb[51].mxu1 }
 0x75e   : > { %v8057_v22 = vmul.f32 0.5, %v4564_v31  ;;  %4770 = vmax.xlane.f32.xlu1 %v4769_v43 }
 0x760   : > { %v4772_v35 = vmax.f32 %v8055_v3, %v8057_v22  ;;  %v4568_v56 = vpop.f32.mrb[52].mxu1 }
 0x761   : > { %v8061_v7 = vmul.f32 0.5, %v4568_v56  ;;  %v4570_v2 = vpop.f32.mrb[53].mxu1 }
 0x762   : > { %v8063_v11 = vmul.f32 0.5, %v4570_v2  ;;  %4773 = vmax.xlane.f32.xlu0 %v4772_v35 }
 0x764   : > { %v4775_v26 = vmax.f32 %v8061_v7, %v8063_v11  ;;  %v4574_v16 = vpop.f32.mrb[54].mxu1 }
 0x765   : > { %v8067_v52 = vmul.f32 0.5, %v4574_v16  ;;  %v4576_v49 = vpop.f32.mrb[55].mxu1 }
 0x766   : > { %v8069_v25 = vmul.f32 0.5, %v4576_v49  ;;  %4776 = vmax.xlane.f32.xlu1 %v4775_v26 }
 0x768   : > { %9330 = vst [vmem:[#allocation33_spill] sm:$0xff] %v8069_v25  ;;  %v4778_v17 = vmax.f32 %v8067_v52, %v8069_v25  ;;  %v4580_v24 = vpop.f32.mrb[56].mxu1 }
 0x769   : > { %v8073_v21 = vmul.f32 0.5, %v4580_v24  ;;  %v4582_v63 = vpop.f32.mrb[57].mxu1 }
 0x76a   : > { %v8075_v18 = vmul.f32 0.5, %v4582_v63  ;;  %4779 = vmax.xlane.f32.xlu0 %v4778_v17 }
 0x76b   : > { %9331 = vst [vmem:[#allocation32_spill] sm:$0xff] %v8073_v21 }
 0x76c   : > { %9332 = vst [vmem:[#allocation30_spill] sm:$0xff] %v8075_v18  ;;  %v4781_v46 = vmax.f32 %v8073_v21, %v8075_v18  ;;  %v4586_v62 = vpop.f32.mrb[58].mxu1 }
 0x76d   : > { %v8079_v61 = vmul.f32 0.5, %v4586_v62  ;;  %v4588_v30 = vpop.f32.mrb[59].mxu1 }
 0x76e   : > { %v8081_v39 = vmul.f32 0.5, %v4588_v30  ;;  %4782 = vmax.xlane.f32.xlu1 %v4781_v46 }
 0x76f   : > { %9333 = vst [vmem:[#allocation23_spill] sm:$0xff] %v8079_v61 }
 0x770   : > { %9334 = vst [vmem:[#allocation22_spill] sm:$0xff] %v8081_v39  ;;  %v4784_v0 = vmax.f32 %v8079_v61, %v8081_v39  ;;  %v4592_v12 = vpop.f32.mrb[60].mxu1 }
 0x771   : > { %v8085_v15 = vmul.f32 0.5, %v4592_v12  ;;  %v4594_v44 = vpop.f32.mrb[61].mxu1 }
 0x772   : > { %v8087_v43 = vmul.f32 0.5, %v4594_v44  ;;  %4785 = vmax.xlane.f32.xlu0 %v4784_v0 }
 0x773   : > { %9335 = vst [vmem:[#allocation35_spill] sm:$0xff] %v8085_v15 }
 0x774   : > { %9336 = vst [vmem:[#allocation37_spill] sm:$0xff] %v8087_v43  ;;  %v4787_v38 = vmax.f32 %v8085_v15, %v8087_v43  ;;  %v4598_v31 = vpop.f32.mrb[62].mxu1 }
 0x775   : > { %v8091_v35 = vmul.f32 0.5, %v4598_v31  ;;  %v4600_v56 = vpop.f32.mrb[63].mxu1 }
 0x776   : > { %v8093_v2 = vmul.f32 0.5, %v4600_v56  ;;  %4788 = vmax.xlane.f32.xlu1 %v4787_v38 }
 0x777   : > { %9337 = vst [vmem:[#allocation36_spill] sm:$0xff] %v8091_v35 }
 0x778   : > { %9338 = vst [vmem:[#allocation34_spill] sm:$0xff] %v8093_v2  ;;  %v4790_v26 = vmax.f32 %v8091_v35, %v8093_v2  ;;  %v4604_v16 = vpop.f32.mrb[64].mxu1 }
 0x779   : > { %v8097_v49 = vmul.f32 0.5, %v4604_v16  ;;  %v4606_v17 = vpop.f32.mrb[65].mxu1 }
 0x77a   : > { %v8099_v24 = vmul.f32 0.5, %v4606_v17  ;;  %4791 = vmax.xlane.f32.xlu0 %v4790_v26 }
 0x77b   : > { %9339 = vst [vmem:[#allocation39_spill] sm:$0xff] %v8097_v49 }
 0x77c   : > { %9340 = vst [vmem:[#allocation41_spill] sm:$0xff] %v8099_v24  ;;  %v4793_v63 = vmax.f32 %v8097_v49, %v8099_v24  ;;  %v4610_v46 = vpop.f32.mrb[66].mxu1 }
 0x77d   : > { %v8103_v62 = vmul.f32 0.5, %v4610_v46  ;;  %v4612_v30 = vpop.f32.mrb[67].mxu1 }
 0x77e   : > { %v8105_v0 = vmul.f32 0.5, %v4612_v30  ;;  %4794 = vmax.xlane.f32.xlu1 %v4793_v63 }
 0x77f   : > { %9341 = vst [vmem:[#allocation40_spill] sm:$0xff] %v8103_v62 }
 0x780   : > { %9342 = vst [vmem:[#allocation38_spill] sm:$0xff] %v8105_v0  ;;  %v4796_v12 = vmax.f32 %v8103_v62, %v8105_v0  ;;  %v4616_v44 = vpop.f32.mrb[68].mxu1 }
 0x781   : > { %v4618_v38 = vpop.f32.mrb[69].mxu1 }
 0x782   : > { %4797 = vmax.xlane.f32.xlu0 %v4796_v12 }
 0x784   : > { %v4622_v31 = vpop.f32.mrb[70].mxu1 }
 0x785   : > { %v4624_v56 = vpop.f32.mrb[71].mxu1 }
 0x788   : > { %v4628_v16 = vpop.f32.mrb[72].mxu1 }
 0x789   : > { %v4630_v26 = vpop.f32.mrb[73].mxu1 }
 0x78c   : > { %v8109_v17 = vpop.f32.mrb[74].mxu1 }
 0x78d   : > { %v8111_v42 = vpop.f32.mrb[75].mxu1 }
 0x790   : > { %v8113_v46 = vpop.f32.mrb[76].mxu1 }
 0x791   : > { %v8115_v23 = vpop.f32.mrb[77].mxu1 }
 0x794   : > { %v8117_v30 = vpop.f32.mrb[78].mxu1 }
 0x795   : > { %v8119_v63 = vpop.f32.mrb[79].mxu1 }
 0x798   : > { %v8121_v6 = vpop.f32.mrb[80].mxu1 }
 0x799   : > { %v8123_v19 = vpop.f32.mrb[81].mxu1 }
 0x79c   : > { %v8125_v12 = vpop.f32.mrb[82].mxu1 }
 0x79d   : > { %v8127_v5 = vpop.f32.mrb[83].mxu1 }
 0x7b3   : > { %v4729_v0 = vpop.xlane.xlu0 %4728 }
 0x7b4   : > { %v4823_v62 = vsub.f32 %v7965_v40, %v4729_v0  ;;  %v4824_v24 = vsub.f32 %v7967_v4, %v4729_v0  ;;  %v8155_v0 = vmul.f32 0.5, %v4624_v56 }
 0x7b6   : > { %v4887_v49 = vmul.f32 1.442695, %v4823_v62  ;;  %v4889_v2 = vmul.f32 1.442695, %v4824_v24  ;;  %v8153_v24 = vmul.f32 0.5, %v4622_v31 }
 0x7b7   : > { %v4732_v35 = vpop.xlane.xlu1 %4731 }
 0x7b8   : > { %6312 = vpow2.f32 %v4887_v49  ;;  %v4825_v43 = vsub.f32 %v7971_v27, %v4732_v35  ;;  %v4826_v15 = vsub.f32 %v7973_v48, %v4732_v35  ;;  %v8137_v48 = vmul.f32 0.5, %v4616_v44 }
 0x7b9   : > { %6314 = vpow2.f32 %v4889_v2 }
 0x7ba   : > { %v4891_v39 = vmul.f32 1.442695, %v4825_v43  ;;  %v4893_v61 = vmul.f32 1.442695, %v4826_v15  ;;  %v8139_v43 = vmul.f32 0.5, %v4618_v38 }
 0x7bb   : > { %v4735_v18 = vpop.xlane.xlu1 %4734 }
 0x7bc   : > { %6316 = vpow2.f32 %v4891_v39  ;;  %v4827_v21 = vsub.f32 %v7977_v41, %v4735_v18  ;;  %v4828_v25 = vsub.f32 %v7979_v14, %v4735_v18 }
 0x7bd   : > { %6318 = vpow2.f32 %v4893_v61 }
 0x7be   : > { %v4895_v40 = vmul.f32 1.442695, %v4827_v21  ;;  %v4897_v4 = vmul.f32 1.442695, %v4828_v25 }
 0x7bf   : > { %v4738_v62 = vpop.xlane.xlu0 %4737 }
 0x7c0   : > { %6320 = vpow2.f32 %v4895_v40  ;;  %v4829_v49 = vsub.f32 %v7983_v33, %v4738_v62  ;;  %v4830_v27 = vsub.f32 %v7985_v10, %v4738_v62  ;;  %v4799_v10 = vmax.f32 %v8137_v48, %v8139_v43 }
 0x7c1   : > { %6322 = vpow2.f32 %v4897_v4  ;;  %v8163_v4 = vmul.f32 0.5, %v4628_v16  ;;  %v8165_v62 = vmul.f32 0.5, %v4630_v26 }
 0x7c2   : > { %v8141_v15 = vpop.eup %6312  ;;  %v4899_v39 = vmul.f32 1.442695, %v4829_v49  ;;  %v4901_v41 = vmul.f32 1.442695, %v4830_v27  ;;  %v4802_v27 = vmax.f32 %v8153_v24, %v8155_v0 }
 0x7c3   : > { %v8143_v35 = vpop.eup %6314  ;;  %v4741_v14 = vpop.xlane.xlu1 %4740 }
 0x7c4   : > { %6324 = vpow2.f32 %v4899_v39  ;;  %v4831_v25 = vsub.f32 %v7989_v36, %v4741_v14  ;;  %v4832_v21 = vsub.f32 %v7991_v47, %v4741_v14  ;;  %v5015_v33 = vadd.f32 %v8143_v35, %v8141_v15 }
 0x7c5   : > { %6326 = vpow2.f32 %v4901_v41  ;;  %v4805_v41 = vmax.f32 %v8163_v4, %v8165_v62 }
 0x7c6   : > { %v8151_v18 = vpop.eup %6316  ;;  %v4903_v61 = vmul.f32 1.442695, %v4831_v25  ;;  %v4905_v2 = vmul.f32 1.442695, %v4832_v21  ;;  %5016 = vadd.xlane.f32.xlu1 %v5015_v33  ;;  %v8182_v33 = vmul.f32 0.5, %v8109_v17  ;;  %v8197_v17 = vmul.f32 0.5, %v8115_v23 }
 0x7c7   : > { %v8157_v44 = vpop.eup %6318  ;;  %v4744_v36 = vpop.xlane.xlu0 %4743 }
 0x7c8   : > { %6328 = vpow2.f32 %v4903_v61  ;;  %v4833_v47 = vsub.f32 %v7995_v20, %v4744_v36  ;;  %v4834_v38 = vsub.f32 %v7997_v59, %v4744_v36  ;;  %v5018_v40 = vadd.f32 %v8157_v44, %v8151_v18 }
 0x7c9   : > { %6330 = vpow2.f32 %v4905_v2 }
 0x7ca   : > { %v8167_v31 = vpop.eup %6320  ;;  %v4907_v56 = vmul.f32 1.442695, %v4833_v47  ;;  %v4909_v49 = vmul.f32 1.442695, %v4834_v38  ;;  %5019 = vadd.xlane.f32.xlu0 %v5018_v40  ;;  %4800 = vmax.xlane.f32.xlu1 %v4799_v10  ;;  %v8194_v47 = vmul.f32 0.5, %v8113_v46 }
 0x7cb   : > { %v8171_v20 = vpop.eup %6322  ;;  %v4747_v59 = vpop.xlane.xlu1 %4746 }
 0x7cc   : > { %6332 = vpow2.f32 %v4907_v56  ;;  %v4835_v39 = vsub.f32 %v8001_v50, %v4747_v59  ;;  %v4836_v16 = vsub.f32 %v8003_v13, %v4747_v59  ;;  %v5021_v26 = vadd.f32 %v8171_v20, %v8167_v31 }
 0x7cd   : > { %6334 = vpow2.f32 %v4909_v49  ;;  %v8185_v50 = vmul.f32 0.5, %v8111_v42 }
 0x7ce   : > { %v8179_v14 = vpop.eup %6324  ;;  %v4911_v25 = vmul.f32 1.442695, %v4835_v39  ;;  %v4913_v21 = vmul.f32 1.442695, %v4836_v16  ;;  %5022 = vadd.xlane.f32.xlu1 %v5021_v26  ;;  %4803 = vmax.xlane.f32.xlu0 %v4802_v27  ;;  %v4811_v27 = vmax.f32 %v8194_v47, %v8197_v17  ;;  %v8214_v26 = vmul.f32 0.5, %v8117_v30 }
 0x7cf   : > { %v8187_v13 = vpop.eup %6326  ;;  %v4750_v10 = vpop.xlane.xlu0 %4749  ;;  %v4808_v56 = vmax.f32 %v8182_v33, %v8185_v50  ;;  %v8229_v30 = vmul.f32 0.5, %v8123_v19 }
 0x7d0   : > { %6336 = vpow2.f32 %v4911_v25  ;;  %v4837_v61 = vsub.f32 %v8007_v58, %v4750_v10  ;;  %v4838_v2 = vsub.f32 %v8009_v34, %v4750_v10  ;;  %v5024_v36 = vadd.f32 %v8187_v13, %v8179_v14 }
 0x7d1   : > { %6338 = vpow2.f32 %v4913_v21 }
 0x7d2   : > { %v8199_v42 = vpop.eup %6328  ;;  %v4915_v38 = vmul.f32 1.442695, %v4837_v61  ;;  %v4917_v40 = vmul.f32 1.442695, %v4838_v2  ;;  %5025 = vadd.xlane.f32.xlu0 %v5024_v36  ;;  %4806 = vmax.xlane.f32.xlu1 %v4805_v41  ;;  %v8226_v61 = vmul.f32 0.5, %v8121_v6 }
 0x7d3   : > { %v8203_v58 = vpop.eup %6330  ;;  %v4753_v34 = vpop.xlane.xlu1 %4752 }
 0x7d4   : > { %6340 = vpow2.f32 %v4915_v38  ;;  %v4839_v49 = vsub.f32 %v8013_v37, %v4753_v34  ;;  %v4840_v46 = vsub.f32 %v8015_v28, %v4753_v34  ;;  %v5027_v23 = vadd.f32 %v8203_v58, %v8199_v42 }
 0x7d5   : > { %6342 = vpow2.f32 %v4917_v40  ;;  %v8217_v37 = vmul.f32 0.5, %v8119_v63 }
 0x7d6   : > { %v8211_v59 = vpop.eup %6332  ;;  %v4919_v39 = vmul.f32 1.442695, %v4839_v49  ;;  %v4921_v16 = vmul.f32 1.442695, %v4840_v46  ;;  %5028 = vadd.xlane.f32.xlu1 %v5027_v23  ;;  %4809 = vmax.xlane.f32.xlu0 %v4808_v56  ;;  %v4817_v56 = vmax.f32 %v8226_v61, %v8229_v30  ;;  %v8246_v23 = vmul.f32 0.5, %v8125_v12 }
 0x7d7   : > { %v8219_v28 = vpop.eup %6334  ;;  %v4756_v41 = vpop.xlane.xlu0 %4755  ;;  %v4814_v38 = vmax.f32 %v8214_v26, %v8217_v37 }
 0x7d8   : > { %6344 = vpow2.f32 %v4919_v39  ;;  %v4841_v25 = vsub.f32 %v8019_v32, %v4756_v41  ;;  %v4842_v21 = vsub.f32 %v8021_v57, %v4756_v41  ;;  %v5030_v10 = vadd.f32 %v8219_v28, %v8211_v59 }
 0x7d9   : > { %6346 = vpow2.f32 %v4921_v16 }
 0x7da   : > { %v8231_v63 = vpop.eup %6336  ;;  %v4923_v2 = vmul.f32 1.442695, %v4841_v25  ;;  %v4925_v36 = vmul.f32 1.442695, %v4842_v21  ;;  %5031 = vadd.xlane.f32.xlu0 %v5030_v10  ;;  %4812 = vmax.xlane.f32.xlu1 %v4811_v27 }
 0x7db   : > { %v8235_v32 = vpop.eup %6338  ;;  %v4759_v57 = vpop.xlane.xlu1 %4758 }
 0x7dc   : > { %6348 = vpow2.f32 %v4923_v2  ;;  %v4843_v40 = vsub.f32 %v8025_v8, %v4759_v57  ;;  %v4844_v6 = vsub.f32 %v8027_v1, %v4759_v57  ;;  %v5033_v19 = vadd.f32 %v8235_v32, %v8231_v63 }
 0x7dd   : > { %6350 = vpow2.f32 %v4925_v36  ;;  %v8249_v8 = vmul.f32 0.5, %v8127_v5 }
 0x7de   : > { %v8243_v34 = vpop.eup %6340  ;;  %v4927_v49 = vmul.f32 1.442695, %v4843_v40  ;;  %v4929_v46 = vmul.f32 1.442695, %v4844_v6  ;;  %5034 = vadd.xlane.f32.xlu1 %v5033_v19  ;;  %4815 = vmax.xlane.f32.xlu0 %v4814_v38 }
 0x7df   : > { %v8251_v1 = vpop.eup %6342  ;;  %v4762_v27 = vpop.xlane.xlu0 %4761  ;;  %v4820_v5 = vmax.f32 %v8246_v23, %v8249_v8 }
 0x7e0   : > { %6352 = vpow2.f32 %v4927_v49  ;;  %v4845_v39 = vsub.f32 %v8031_v9, %v4762_v27  ;;  %v4846_v16 = vsub.f32 %v8033_v29, %v4762_v27  ;;  %v5036_v41 = vadd.f32 %v8251_v1, %v8243_v34 }
 0x7e1   : > { %6354 = vpow2.f32 %v4929_v46 }
 0x7e2   : > { %v8257_v25 = vpop.eup %6344  ;;  %v4931_v21 = vmul.f32 1.442695, %v4845_v39  ;;  %v4933_v12 = vmul.f32 1.442695, %v4846_v16  ;;  %5037 = vadd.xlane.f32.xlu0 %v5036_v41  ;;  %4818 = vmax.xlane.f32.xlu1 %v4817_v56 }
 0x7e3   : > { %v8261_v10 = vpop.eup %6346  ;;  %v4765_v2 = vpop.xlane.xlu1 %4764 }
 0x7e4   : > { %6356 = vpow2.f32 %v4931_v21  ;;  %v4847_v9 = vsub.f32 %v8037_v55, %v4765_v2  ;;  %v4848_v29 = vsub.f32 %v8039_v60, %v4765_v2  ;;  %v5039_v36 = vadd.f32 %v8261_v10, %v8257_v25 }
 0x7e5   : > { %6358 = vpow2.f32 %v4933_v12 }
 0x7e6   : > { %v8267_v38 = vpop.eup %6348  ;;  %v4935_v57 = vmul.f32 1.442695, %v4847_v9  ;;  %v4937_v40 = vmul.f32 1.442695, %v4848_v29  ;;  %5040 = vadd.xlane.f32.xlu1 %v5039_v36  ;;  %4821 = vmax.xlane.f32.xlu0 %v4820_v5 }
 0x7e7   : > { %v8269_v6 = vpop.eup %6350  ;;  %v4768_v19 = vpop.xlane.xlu0 %4767 }
 0x7e8   : > { %6360 = vpow2.f32 %v4935_v57  ;;  %v4849_v56 = vsub.f32 %v8043_v54, %v4768_v19  ;;  %v4850_v55 = vsub.f32 %v8045_v51, %v4768_v19  ;;  %v5042_v60 = vadd.f32 %v8269_v6, %v8267_v38 }
 0x7e9   : > { %6362 = vpow2.f32 %v4937_v40 }
 0x7ea   : > { %v8275_v49 = vpop.eup %6352  ;;  %v4939_v46 = vmul.f32 1.442695, %v4849_v56  ;;  %v4941_v27 = vmul.f32 1.442695, %v4850_v55  ;;  %5043 = vadd.xlane.f32.xlu0 %v5042_v60 }
 0x7eb   : > { %v8277_v39 = vpop.eup %6354  ;;  %v4771_v16 = vpop.xlane.xlu1 %4770 }
 0x7ec   : > { %6364 = vpow2.f32 %v4939_v46  ;;  %v4851_v41 = vsub.f32 %v8049_v53, %v4771_v16  ;;  %v4852_v21 = vsub.f32 %v8051_v45, %v4771_v16  ;;  %v5045_v54 = vadd.f32 %v8277_v39, %v8275_v49 }
 0x7ed   : > { %6366 = vpow2.f32 %v4941_v27 }
 0x7ee   : > { %v8283_v51 = vpop.eup %6356  ;;  %v4943_v12 = vmul.f32 1.442695, %v4851_v41  ;;  %v4945_v5 = vmul.f32 1.442695, %v4852_v21  ;;  %5046 = vadd.xlane.f32.xlu1 %v5045_v54  ;;  %v9343_v54 = vld [vmem:[#allocation33_spill] sm:$0xff] }
 0x7ef   : > { %v8285_v2 = vpop.eup %6358  ;;  %v4774_v9 = vpop.xlane.xlu0 %4773 }
 0x7f0   : > { %6368 = vpow2.f32 %v4943_v12  ;;  %v4853_v29 = vsub.f32 %v8055_v3, %v4774_v9  ;;  %v4854_v36 = vsub.f32 %v8057_v22, %v4774_v9  ;;  %v5048_v53 = vadd.f32 %v8285_v2, %v8283_v51 }
 0x7f1   : > { %6370 = vpow2.f32 %v4945_v5 }
 0x7f2   : > { %v8291_v45 = vpop.eup %6360  ;;  %v4947_v57 = vmul.f32 1.442695, %v4853_v29  ;;  %v4949_v40 = vmul.f32 1.442695, %v4854_v36  ;;  %5049 = vadd.xlane.f32.xlu0 %v5048_v53  ;;  %v9345_v53 = vld [vmem:[#allocation32_spill] sm:$0xff] }
 0x7f3   : > { %v8293_v19 = vpop.eup %6362  ;;  %v4777_v56 = vpop.xlane.xlu1 %4776 }
 0x7f4   : > { %6372 = vpow2.f32 %v4947_v57  ;;  %v4855_v55 = vsub.f32 %v8061_v7, %v4777_v56  ;;  %v4856_v60 = vsub.f32 %v8063_v11, %v4777_v56  ;;  %v5051_v3 = vadd.f32 %v8293_v19, %v8291_v45 }
 0x7f5   : > { %6374 = vpow2.f32 %v4949_v40  ;;  %v9346_v40 = vld [vmem:[#allocation30_spill] sm:$0xff] }
 0x7f6   : > { %v8299_v22 = vpop.eup %6364  ;;  %v4951_v46 = vmul.f32 1.442695, %v4855_v55  ;;  %v4953_v27 = vmul.f32 1.442695, %v4856_v60  ;;  %5052 = vadd.xlane.f32.xlu1 %v5051_v3 }
 0x7f7   : > { %v8301_v16 = vpop.eup %6366  ;;  %v4780_v41 = vpop.xlane.xlu0 %4779 }
 0x7f8   : > { %6376 = vpow2.f32 %v4951_v46  ;;  %v4857_v21 = vsub.f32 %v8067_v52, %v4780_v41  ;;  %v4858_v12 = vsub.f32 %v9343_v54, %v4780_v41  ;;  %v5054_v7 = vadd.f32 %v8301_v16, %v8299_v22  ;;  %v9348_v41 = vld [vmem:[#allocation23_spill] sm:$0xff]  ;;  %v9349_v54 = vld [vmem:[#allocation22_spill] sm:$0xff] }
 0x7f9   : > { %6378 = vpow2.f32 %v4953_v27 }
 0x7fa   : > { %v8307_v11 = vpop.eup %6368  ;;  %v4955_v5 = vmul.f32 1.442695, %v4857_v21  ;;  %v4957_v9 = vmul.f32 1.442695, %v4858_v12  ;;  %5055 = vadd.xlane.f32.xlu0 %v5054_v7 }
 0x7fb   : > { %9344 = vst [vmem:[#allocation25_spill] sm:$0xff] %v8307_v11  ;;  %v8309_v29 = vpop.eup %6370  ;;  %v4783_v36 = vpop.xlane.xlu1 %4782 }
 0x7fc   : > { %6380 = vpow2.f32 %v4955_v5  ;;  %v4859_v57 = vsub.f32 %v9345_v53, %v4783_v36  ;;  %v4860_v56 = vsub.f32 %v9346_v40, %v4783_v36  ;;  %v5057_v52 = vadd.f32 %v8309_v29, %v8307_v11  ;;  %v9352_v40 = vld [vmem:[#allocation35_spill] sm:$0xff] }
 0x7fd   : > { %6382 = vpow2.f32 %v4957_v9 }
 0x7fe   : > { %v8315_v55 = vpop.eup %6372  ;;  %v4959_v60 = vmul.f32 1.442695, %v4859_v57  ;;  %v4961_v3 = vmul.f32 1.442695, %v4860_v56  ;;  %5058 = vadd.xlane.f32.xlu1 %v5057_v52  ;;  %v9353_v52 = vld [vmem:[#allocation37_spill] sm:$0xff] }
 0x7ff   : > { %9347 = vst [vmem:[#allocation24_spill] sm:$0xff] %v8315_v55  ;;  %v8317_v46 = vpop.eup %6374  ;;  %v4786_v27 = vpop.xlane.xlu0 %4785 }
 0x800   : > { %6384 = vpow2.f32 %v4959_v60  ;;  %v4861_v21 = vsub.f32 %v9348_v41, %v4786_v27  ;;  %v4862_v12 = vsub.f32 %v9349_v54, %v4786_v27  ;;  %v5060_v7 = vadd.f32 %v8317_v46, %v8315_v55 }
 0x801   : > { %6386 = vpow2.f32 %v4961_v3 }
 0x802   : > { %v8323_v5 = vpop.eup %6376  ;;  %v4963_v9 = vmul.f32 1.442695, %v4861_v21  ;;  %v4965_v36 = vmul.f32 1.442695, %v4862_v12  ;;  %5061 = vadd.xlane.f32.xlu0 %v5060_v7  ;;  %v9356_v7 = vld [vmem:[#allocation36_spill] sm:$0xff] }
 0x803   : > { %9350 = vst [vmem:[#allocation33_spill] sm:$0xff] %v8323_v5  ;;  %v8325_v53 = vpop.eup %6378  ;;  %v4789_v57 = vpop.xlane.xlu1 %4788 }
 0x804   : > { %9351 = vst [vmem:[#allocation32_spill] sm:$0xff] %v8325_v53  ;;  %6388 = vpow2.f32 %v4963_v9  ;;  %v4863_v56 = vsub.f32 %v9352_v40, %v4789_v57  ;;  %v4864_v60 = vsub.f32 %v9353_v52, %v4789_v57  ;;  %v5063_v27 = vadd.f32 %v8325_v53, %v8323_v5  ;;  %v9357_v9 = vld [vmem:[#allocation34_spill] sm:$0xff] }
 0x805   : > { %6390 = vpow2.f32 %v4965_v36 }
 0x806   : > { %v8331_v41 = vpop.eup %6380  ;;  %v4967_v3 = vmul.f32 1.442695, %v4863_v56  ;;  %v4969_v54 = vmul.f32 1.442695, %v4864_v60  ;;  %5064 = vadd.xlane.f32.xlu1 %v5063_v27  ;;  %v9358_v27 = vld [vmem:[#allocation39_spill] sm:$0xff] }
 0x807   : > { %9354 = vst [vmem:[#allocation30_spill] sm:$0xff] %v8331_v41  ;;  %v8333_v21 = vpop.eup %6382  ;;  %v4792_v12 = vpop.xlane.xlu0 %4791 }
 0x808   : > { %9355 = vst [vmem:[#allocation23_spill] sm:$0xff] %v8333_v21  ;;  %6392 = vpow2.f32 %v4967_v3  ;;  %v4865_v11 = vsub.f32 %v9356_v7, %v4792_v12  ;;  %v4866_v55 = vsub.f32 %v9357_v9, %v4792_v12  ;;  %v5066_v57 = vadd.f32 %v8333_v21, %v8331_v41  ;;  %v9359_v3 = vld [vmem:[#allocation41_spill] sm:$0xff] }
 0x809   : > { %6394 = vpow2.f32 %v4969_v54 }
 0x80a   : > { %v8339_v40 = vpop.eup %6384  ;;  %v4971_v36 = vmul.f32 1.442695, %v4865_v11  ;;  %v4973_v52 = vmul.f32 1.442695, %v4866_v55  ;;  %5067 = vadd.xlane.f32.xlu0 %v5066_v57  ;;  %v9360_v57 = vld [vmem:[#allocation40_spill] sm:$0xff] }
 0x80b   : > { %v8341_v56 = vpop.eup %6386  ;;  %v4795_v60 = vpop.xlane.xlu1 %4794 }
 0x80c   : > { %6396 = vpow2.f32 %v4971_v36  ;;  %v4867_v5 = vsub.f32 %v9358_v27, %v4795_v60  ;;  %v4868_v53 = vsub.f32 %v9359_v3, %v4795_v60  ;;  %v5069_v12 = vadd.f32 %v8341_v56, %v8339_v40  ;;  %v9361_v36 = vld [vmem:[#allocation38_spill] sm:$0xff] }
 0x80d   : > { %6398 = vpow2.f32 %v4973_v52 }
 0x80e   : > { %v8347_v7 = vpop.eup %6388  ;;  %v4975_v54 = vmul.f32 1.442695, %v4867_v5  ;;  %v4977_v9 = vmul.f32 1.442695, %v4868_v53  ;;  %5070 = vadd.xlane.f32.xlu1 %v5069_v12 }
 0x80f   : > { %v8349_v11 = vpop.eup %6390  ;;  %v4798_v55 = vpop.xlane.xlu0 %4797 }
 0x810   : > { %6400 = vpow2.f32 %v4975_v54  ;;  %v4869_v41 = vsub.f32 %v9360_v57, %v4798_v55  ;;  %v4870_v21 = vsub.f32 %v9361_v36, %v4798_v55  ;;  %v5072_v60 = vadd.f32 %v8349_v11, %v8347_v7 }
 0x811   : > { %6402 = vpow2.f32 %v4977_v9 }
 0x812   : > { %v8355_v27 = vpop.eup %6392  ;;  %v4979_v52 = vmul.f32 1.442695, %v4869_v41  ;;  %v4981_v3 = vmul.f32 1.442695, %v4870_v21  ;;  %5073 = vadd.xlane.f32.xlu0 %v5072_v60 }
 0x813   : > { %9362 = vst [vmem:[#allocation22_spill] sm:$0xff] %v8355_v27  ;;  %v8357_v5 = vpop.eup %6394 }
 0x814   : > { %9363 = vst [vmem:[#allocation35_spill] sm:$0xff] %v8357_v5  ;;  %6404 = vpow2.f32 %v4979_v52  ;;  %v5075_v53 = vadd.f32 %v8357_v5, %v8355_v27 }
 0x815   : > { %6406 = vpow2.f32 %v4981_v3 }
 0x816   : > { %v8361_v12 = vpop.eup %6396  ;;  %5076 = vadd.xlane.f32.xlu1 %v5075_v53 }
 0x817   : > { %9364 = vst [vmem:[#allocation37_spill] sm:$0xff] %v8361_v12  ;;  %v8363_v54 = vpop.eup %6398 }
 0x818   : > { %9365 = vst [vmem:[#allocation36_spill] sm:$0xff] %v8363_v54  ;;  %v5078_v9 = vadd.f32 %v8363_v54, %v8361_v12 }
 0x81a   : > { %v8367_v55 = vpop.eup %6400  ;;  %5079 = vadd.xlane.f32.xlu0 %v5078_v9 }
 0x81b   : > { %9366 = vst [vmem:[#allocation34_spill] sm:$0xff] %v8367_v55  ;;  %v8369_v41 = vpop.eup %6402 }
 0x81c   : > { %9367 = vst [vmem:[#allocation39_spill] sm:$0xff] %v8369_v41  ;;  %v5081_v21 = vadd.f32 %v8369_v41, %v8367_v55 }
 0x81e   : > { %v8373_v57 = vpop.eup %6404  ;;  %5082 = vadd.xlane.f32.xlu1 %v5081_v21 }
 0x81f   : > { %9368 = vst [vmem:[#allocation41_spill] sm:$0xff] %v8373_v57  ;;  %v8375_v36 = vpop.eup %6406 }
 0x820   : > { %9369 = vst [vmem:[#allocation40_spill] sm:$0xff] %v8375_v36  ;;  %v5084_v60 = vadd.f32 %v8375_v36, %v8373_v57 }
 0x822   : > { %5085 = vadd.xlane.f32.xlu0 %v5084_v60 }
 0x853   : > { %v5017_v52 = vpop.xlane.xlu1 %5016 }
 0x854   : > { %6408 = vrcp.f32 %v5017_v52 }
 0x857   : > { %v5020_v3 = vpop.xlane.xlu0 %5019  ;;  %v4801_v53 = vpop.xlane.xlu1 %4800 }
 0x858   : > { %6410 = vrcp.f32 %v5020_v3  ;;  %v4871_v9 = vsub.f32 %v8137_v48, %v4801_v53  ;;  %v4872_v27 = vsub.f32 %v8139_v43, %v4801_v53 }
 0x85a   : > { %v4983_v12 = vmul.f32 1.442695, %v4871_v9  ;;  %v4985_v55 = vmul.f32 1.442695, %v4872_v27 }
 0x85b   : > { %v5023_v41 = vpop.xlane.xlu1 %5022  ;;  %v4804_v54 = vpop.xlane.xlu0 %4803 }
 0x85c   : > { %6412 = vpow2.f32 %v4983_v12  ;;  %v4873_v21 = vsub.f32 %v8153_v24, %v4804_v54  ;;  %v4874_v5 = vsub.f32 %v8155_v0, %v4804_v54 }
 0x85d   : > { %6414 = vpow2.f32 %v4985_v55 }
 0x85e   : > { %6416 = vrcp.f32 %v5023_v41  ;;  %v4987_v60 = vmul.f32 1.442695, %v4873_v21  ;;  %v4989_v52 = vmul.f32 1.442695, %v4874_v5  ;;  %v6409_v3 = vpop.eup %6408 }
 0x85f   : > { %v5026_v57 = vpop.xlane.xlu0 %5025  ;;  %v4807_v36 = vpop.xlane.xlu1 %4806  ;;  %v5144_v0 = vmul.f32 %v6409_v3, %v8143_v35  ;;  %v5143_v5 = vmul.f32 %v6409_v3, %v8141_v15 }
 0x860   : > { %6418 = vpow2.f32 %v4987_v60  ;;  %v4875_v48 = vsub.f32 %v8163_v4, %v4807_v36  ;;  %v4876_v43 = vsub.f32 %v8165_v62, %v4807_v36 }
 0x861   : > { %6420 = vpow2.f32 %v4989_v52 }
 0x862   : > { %v6411_v27 = vpop.eup %6410  ;;  %6422 = vrcp.f32 %v5026_v57  ;;  %v4991_v12 = vmul.f32 1.442695, %v4875_v48  ;;  %v4993_v53 = vmul.f32 1.442695, %v4876_v43 }
 0x863   : > { %v5029_v24 = vpop.xlane.xlu1 %5028  ;;  %v4810_v9 = vpop.xlane.xlu0 %4809  ;;  %v5146_v54 = vmul.f32 %v6411_v27, %v8157_v44  ;;  %v5145_v55 = vmul.f32 %v6411_v27, %v8151_v18 }
 0x864   : > { %6424 = vpow2.f32 %v4991_v12  ;;  %v4877_v4 = vsub.f32 %v8182_v33, %v4810_v9  ;;  %v4878_v62 = vsub.f32 %v8185_v50, %v4810_v9 }
 0x865   : > { %6426 = vpow2.f32 %v4993_v53  ;;  %v6013_v41 = vpack.c.bf16 %v5146_v54, %v5144_v0  ;;  %v6015_v57 = vpack.c.bf16 %v5145_v55, %v5143_v5 }
 0x866   : > { %v8391_v36 = vpop.eup %6412  ;;  %6428 = vrcp.f32 %v5029_v24  ;;  %v4995_v21 = vmul.f32 1.442695, %v4877_v4  ;;  %v4997_v60 = vmul.f32 1.442695, %v4878_v62 }
 0x867   : > { %v8393_v35 = vpop.eup %6414  ;;  %6014 = vmatprep.subr.bf16.mxu0 %v6013_v41  ;;  %v5032_v44 = vpop.xlane.xlu0 %5031 }
 0x868   : > { %v4813_v15 = vpop.xlane.xlu1 %4812  ;;  %v6417_v52 = vpop.eup %6416  ;;  %6430 = vpow2.f32 %v4995_v21  ;;  %6016 = vmatpush1.bf16.xpose.msra.mxu0 %v6015_v57  ;;  %v5087_v50 = vadd.f32 %v8393_v35, %v8391_v36 }
 0x869   : > { %v4879_v18 = vsub.f32 %v8194_v47, %v4813_v15  ;;  %v4880_v33 = vsub.f32 %v8197_v17, %v4813_v15  ;;  %6432 = vpow2.f32 %v4997_v60  ;;  %v5148_v24 = vmul.f32 %v6417_v52, %v8171_v20 }
 0x86a   : > { %v8399_v3 = vpop.eup %6418  ;;  %6434 = vrcp.f32 %v5032_v44  ;;  %5088 = vadd.xlane.f32.xlu1 %v5087_v50  ;;  %v5147_v5 = vmul.f32 %v6417_v52, %v8167_v31 }
 0x86b   : > { %v4999_v48 = vmul.f32 1.442695, %v4879_v18  ;;  %v5001_v43 = vmul.f32 1.442695, %v4880_v33  ;;  %v8401_v27 = vpop.eup %6420  ;;  %v4816_v53 = vpop.xlane.xlu0 %4815 }
 0x86c   : > { %v5035_v12 = vpop.xlane.xlu1 %5034  ;;  %v6423_v47 = vpop.eup %6422  ;;  %v4881_v17 = vsub.f32 %v8214_v26, %v4816_v53  ;;  %v4882_v9 = vsub.f32 %v8217_v37, %v4816_v53  ;;  %v5090_v0 = vadd.f32 %v8401_v27, %v8399_v3 }
 0x86d   : > { %6436 = vpow2.f32 %v4999_v48  ;;  %v5150_v54 = vmul.f32 %v6423_v47, %v8187_v13  ;;  %v5149_v55 = vmul.f32 %v6423_v47, %v8179_v14 }
 0x86e   : > { %6438 = vpow2.f32 %v5001_v43  ;;  %v8411_v4 = vpop.eup %6424  ;;  %v5003_v62 = vmul.f32 1.442695, %v4881_v17  ;;  %v5005_v20 = vmul.f32 1.442695, %v4882_v9  ;;  %5091 = vadd.xlane.f32.xlu0 %v5090_v0 }
 0x86f   : > { %v8413_v41 = vpop.eup %6426  ;;  %6440 = vrcp.f32 %v5035_v12  ;;  %v6017_v26 = vpack.c.bf16 %v5150_v54, %v5148_v24  ;;  %v5038_v37 = vpop.xlane.xlu0 %5037  ;;  %v6019_v21 = vpack.c.bf16 %v5149_v55, %v5147_v5 }
 0x870   : > { %v4819_v57 = vpop.xlane.xlu1 %4818  ;;  %v6429_v60 = vpop.eup %6428  ;;  %6442 = vpow2.f32 %v5003_v62  ;;  %v5093_v14 = vadd.f32 %v8413_v41, %v8411_v4 }
 0x871   : > { %v4883_v13 = vsub.f32 %v8226_v61, %v4819_v57  ;;  %v4884_v31 = vsub.f32 %v8229_v30, %v4819_v57  ;;  %6444 = vpow2.f32 %v5005_v20  ;;  %6018 = vmatprep.subr.bf16.mxu0 %v6017_v26  ;;  %v5152_v50 = vmul.f32 %v6429_v60, %v8203_v58 }
 0x872   : > { %v8419_v44 = vpop.eup %6430  ;;  %6446 = vrcp.f32 %v5038_v37  ;;  %6020 = vmatpush1.bf16.xpose.msra.mxu0 %v6019_v21  ;;  %5094 = vadd.xlane.f32.xlu1 %v5093_v14  ;;  %v5151_v24 = vmul.f32 %v6429_v60, %v8199_v42 }
 0x873   : > { %v5007_v15 = vmul.f32 1.442695, %v4883_v13  ;;  %v5009_v52 = vmul.f32 1.442695, %v4884_v31  ;;  %v8421_v18 = vpop.eup %6432  ;;  %v4822_v33 = vpop.xlane.xlu0 %4821 }
 0x874   : > { %v6435_v61 = vpop.eup %6434  ;;  %v5041_v30 = vpop.xlane.xlu1 %5040  ;;  %v4885_v48 = vsub.f32 %v8246_v23, %v4822_v33  ;;  %v4886_v43 = vsub.f32 %v8249_v8, %v4822_v33  ;;  %v5096_v12 = vadd.f32 %v8421_v18, %v8419_v44 }
 0x875   : > { %6448 = vpow2.f32 %v5007_v15  ;;  %v5154_v53 = vmul.f32 %v6435_v61, %v8219_v28  ;;  %v5153_v47 = vmul.f32 %v6435_v61, %v8211_v59 }
 0x876   : > { %6450 = vpow2.f32 %v5009_v52  ;;  %v5011_v58 = vmul.f32 1.442695, %v4885_v48  ;;  %v5013_v9 = vmul.f32 1.442695, %v4886_v43  ;;  %5097 = vadd.xlane.f32.xlu0 %v5096_v12 }
 0x877   : > { %v8431_v17 = vpop.eup %6436  ;;  %6452 = vrcp.f32 %v5041_v30  ;;  %v6021_v23 = vpack.c.bf16 %v5154_v53, %v5152_v50  ;;  %v5044_v8 = vpop.xlane.xlu0 %5043  ;;  %v6023_v54 = vpack.c.bf16 %v5153_v47, %v5151_v24 }
 0x878   : > { %v8433_v0 = vpop.eup %6438  ;;  %6454 = vpow2.f32 %v5011_v58 }
 0x879   : > { %v5099_v5 = vadd.f32 %v8433_v0, %v8431_v17  ;;  %v6441_v28 = vpop.eup %6440  ;;  %6456 = vpow2.f32 %v5013_v9  ;;  %6022 = vmatprep.subr.bf16.mxu0 %v6021_v23 }
 0x87a   : > { %v8437_v42 = vpop.eup %6442  ;;  %6458 = vrcp.f32 %v5044_v8  ;;  %6024 = vmatpush1.bf16.xpose.msra.mxu0 %v6023_v54  ;;  %v5156_v26 = vmul.f32 %v6441_v28, %v8235_v32  ;;  %v5155_v57 = vmul.f32 %v6441_v28, %v8231_v63  ;;  %v828_v28 = vld [vmem:[%s9370_s26] sm:$0x3] }
 0x87b   : > { %5100 = vadd.xlane.f32.xlu1 %v5099_v5  ;;  %v8439_v59 = vpop.eup %6444  ;;  %v5047_v55 = vpop.xlane.xlu1 %5046 }
 0x87c   : > { %v6447_v62 = vpop.eup %6446  ;;  %v5102_v20 = vadd.f32 %v8439_v59, %v8437_v42  ;;  %6460 = vrcp.f32 %v5047_v55 }
 0x87d   : > { %v5158_v37 = vmul.f32 %v6447_v62, %v8251_v1  ;;  %v5157_v21 = vmul.f32 %v6447_v62, %v8243_v34 }
 0x87e   : > { %5103 = vadd.xlane.f32.xlu0 %v5102_v20 }
 0x87f   : > { %v8447_v60 = vpop.eup %6448  ;;  %v6025_v31 = vpack.c.bf16 %v5158_v37, %v5156_v26  ;;  %v5050_v14 = vpop.xlane.xlu0 %5049  ;;  %v6027_v15 = vpack.c.bf16 %v5157_v21, %v5155_v57  ;;  %v8477_v57 = vld [vmem:[%s9371_s29] sm:$0x3]  ;;  %v9372_v21 = vmov 1  }
 0x880   : > { %v8449_v13 = vpop.eup %6450  ;;  %6462 = vrcp.f32 %v5050_v14  ;;  %v9373_v14 = vld [vmem:[#allocation24_spill] sm:$0xff] }
 0x881   : > { %v5105_v52 = vadd.f32 %v8449_v13, %v8447_v60  ;;  %v6453_v32 = vpop.eup %6452  ;;  %6026 = vmatprep.subr.bf16.mxu0 %v6025_v31 }
 0x882   : > { %v8453_v1 = vpop.eup %6454  ;;  %6028 = vmatpush1.bf16.xpose.msra.mxu0 %v6027_v15  ;;  %v5160_v61 = vmul.f32 %v6453_v32, %v8261_v10  ;;  %v5159_v48 = vmul.f32 %v6453_v32, %v8257_v25 }
 0x883   : > { %5106 = vadd.xlane.f32.xlu1 %v5105_v52  ;;  %v8455_v63 = vpop.eup %6456  ;;  %v5053_v34 = vpop.xlane.xlu1 %5052  ;;  %v9374_v52 = vld [vmem:[#allocation25_spill] sm:$0xff] }
 0x884   : > { %v6459_v33 = vpop.eup %6458  ;;  %v5108_v50 = vadd.f32 %v8455_v63, %v8453_v1  ;;  %6464 = vrcp.f32 %v5053_v34  ;;  %v9375_v34 = vmov 2  }
 0x885   : > { %v5162_v30 = vmul.f32 %v6459_v33, %v8269_v6  ;;  %v5161_v43 = vmul.f32 %v6459_v33, %v8267_v38 }
 0x886   : > { %5109 = vadd.xlane.f32.xlu0 %v5108_v50  ;;  %v6461_v47 = vpop.eup %6460 }
 0x887   : > { %v6029_v12 = vpack.c.bf16 %v5162_v30, %v5160_v61  ;;  %v5056_v53 = vpop.xlane.xlu0 %5055  ;;  %v6031_v24 = vpack.c.bf16 %v5161_v43, %v5159_v48  ;;  %v5164_v23 = vmul.f32 %v6461_v47, %v8277_v39  ;;  %v5163_v25 = vmul.f32 %v6461_v47, %v8275_v49 }
 0x888   : > { %6466 = vrcp.f32 %v5056_v53 }
 0x889   : > { %6030 = vmatprep.subr.bf16.mxu0 %v6029_v12  ;;  %v9376_v12 = vld [vmem:[#allocation32_spill] sm:$0xff] }
 0x88a   : > { %v6463_v58 = vpop.eup %6462  ;;  %6032 = vmatpush1.bf16.xpose.msra.mxu0 %v6031_v24  ;;  %v9377_v24 = vld [vmem:[#allocation23_spill] sm:$0xff] }
 0x88b   : > { %v5059_v9 = vpop.xlane.xlu1 %5058  ;;  %v5166_v10 = vmul.f32 %v6463_v58, %v8285_v2  ;;  %v5165_v6 = vmul.f32 %v6463_v58, %v8283_v51  ;;  %v9378_v58 = vld [vmem:[#allocation30_spill] sm:$0xff] }
 0x88c   : > { %6468 = vrcp.f32 %v5059_v9 }
 0x88d   : > { %v6033_v38 = vpack.c.bf16 %v5166_v10, %v5164_v23  ;;  %v6035_v8 = vpack.c.bf16 %v5165_v6, %v5163_v25  ;;  %v9379_v23 = vld [vmem:[#allocation33_spill] sm:$0xff]  ;;  %v6602_v25 = vmov 6  }
 0x88e   : > { %v6465_v5 = vpop.eup %6464 }
 0x88f   : > { %6034 = vmatprep.subr.bf16.mxu0 %v6033_v38  ;;  %v5062_v54 = vpop.xlane.xlu0 %5061  ;;  %v5168_v2 = vmul.f32 %v6465_v5, %v8293_v19  ;;  %v5167_v62 = vmul.f32 %v6465_v5, %v8291_v45 }
 0x890   : > { %6470 = vrcp.f32 %v5062_v54 }
 0x892   : > { %v6467_v55 = vpop.eup %6466  ;;  %6036 = vmatpush1.bf16.xpose.msra.mxu0 %v6035_v8  ;;  %v6603_v8 = vmov 5  }
 0x893   : > { %v5065_v39 = vpop.xlane.xlu1 %5064  ;;  %v5170_v51 = vmul.f32 %v6467_v55, %v8301_v16  ;;  %v5169_v49 = vmul.f32 %v6467_v55, %v8299_v22 }
 0x894   : > { %831 = vperm.xlu1 %6105, %v828_v28   ;;  %6472 = vrcp.f32 %v5065_v39  ;;  %v2225_v28 = vld [vmem:[%s9144_s7] sm:$0x3]  ;;  %v9380_v39 = vmov 0  }
 0x895   : > { %v6037_v20 = vpack.c.bf16 %v5170_v51, %v5168_v2  ;;  %v6039_v26 = vpack.c.bf16 %v5169_v49, %v5167_v62 }
 0x896   : > { %v6469_v31 = vpop.eup %6468 }
 0x897   : > { %6038 = vmatprep.subr.bf16.mxu0 %v6037_v20  ;;  %v5068_v37 = vpop.xlane.xlu0 %5067  ;;  %v5172_v45 = vmul.f32 %v6469_v31, %v8309_v29  ;;  %v5171_v32 = vmul.f32 %v6469_v31, %v9374_v52  ;;  %v6600_v29 = vmov 3   ;;  %v6604_v20 = vmov 7  }
 0x898   : > { %6106 = vset.pattern.permute.xlu1 %v9372_v21  ;;  %6474 = vrcp.f32 %v5068_v37 }
 0x899   : > { %1140 = vperm.xlu1 %6106, %v8477_v57  }
 0x89a   : > { %v6471_v19 = vpop.eup %6470  ;;  %6040 = vmatpush1.bf16.xpose.msra.mxu0 %v6039_v26 }
 0x89b   : > { %v5071_v22 = vpop.xlane.xlu1 %5070  ;;  %v5174_v16 = vmul.f32 %v6471_v19, %v8317_v46  ;;  %v5173_v15 = vmul.f32 %v6471_v19, %v9373_v14  ;;  %v6601_v46 = vmov 4  }
 0x89c   : > { %986 = vperm.xlu0 %6104, %v8477_v57   ;;  %6476 = vrcp.f32 %v5071_v22  ;;  %v6605_v22 = vmov 8  }
 0x89d   : > { %6107 = vset.pattern.permute.xlu1 %v9375_v34  ;;  %v6041_v33 = vpack.c.bf16 %v5174_v16, %v5172_v45  ;;  %v6043_v50 = vpack.c.bf16 %v5173_v15, %v5171_v32  ;;  %v9382_v45 = vld [vmem:[#allocation36_spill] sm:$0xff]  ;;  %v9384_v15 = vld [vmem:[#allocation22_spill] sm:$0xff] }
 0x89e   : > { %1294 = vperm.xlu1 %6107, %v8477_v57   ;;  %v6473_v30 = vpop.eup %6472 }
 0x89f   : > { %6042 = vmatprep.subr.bf16.mxu0 %v6041_v33  ;;  %v5074_v61 = vpop.xlane.xlu0 %5073  ;;  %v5176_v53 = vmul.f32 %v6473_v30, %v9376_v12  ;;  %v5175_v10 = vmul.f32 %v6473_v30, %v9379_v23  ;;  %v9386_v30 = vld [vmem:[#allocation40_spill] sm:$0xff] }
 0x8a0   : > { %6478 = vrcp.f32 %v5074_v61  ;;  %6108 = vset.pattern.permute.xlu0 %v6600_v29  ;;  %v9385_v61 = vld [vmem:[#allocation39_spill] sm:$0xff] }
 0x8a1   : > { %1448 = vperm.xlu0 %6108, %v8477_v57  }
 0x8a2   : > { %6109 = vset.pattern.permute.xlu1 %v6601_v46  ;;  %v6475_v48 = vpop.eup %6474  ;;  %6044 = vmatpush1.bf16.xpose.msra.mxu0 %v6043_v50  ;;  %v9387_v46 = vld [vmem:[#allocation41_spill] sm:$0xff] }
 0x8a3   : > { %1602 = vperm.xlu1 %6109, %v8477_v57   ;;  %v5077_v43 = vpop.xlane.xlu1 %5076  ;;  %v5178_v47 = vmul.f32 %v6475_v48, %v9377_v24  ;;  %v5177_v9 = vmul.f32 %v6475_v48, %v9378_v58 }
 0x8a4   : > { %6480 = vrcp.f32 %v5077_v43  ;;  %v9388_v43 = vld [vmem:[#allocation34_spill] sm:$0xff] }
 0x8a5   : > { %v6045_v6 = vpack.c.bf16 %v5178_v47, %v5176_v53  ;;  %6111 = vset.pattern.permute.xlu0 %v6602_v25  ;;  %v6047_v38 = vpack.c.bf16 %v5177_v9, %v5175_v10 }
 0x8a6   : > { %1910 = vperm.xlu0 %6111, %v8477_v57   ;;  %v6477_v5 = vpop.eup %6476 }
 0x8a7   : > { %6110 = vset.pattern.permute.xlu1 %v6603_v8  ;;  %6046 = vmatprep.subr.bf16.mxu0 %v6045_v6  ;;  %v5080_v54 = vpop.xlane.xlu0 %5079  ;;  %v5180_v51 = vmul.f32 %v6477_v5, %v8341_v56  ;;  %v5179_v26 = vmul.f32 %v6477_v5, %v8339_v40  ;;  %v9383_v40 = vld [vmem:[#allocation37_spill] sm:$0xff] }
 0x8a8   : > { %1756 = vperm.xlu1 %6110, %v8477_v57   ;;  %6482 = vrcp.f32 %v5080_v54 }
 0x8aa   : > { %v6479_v55 = vpop.eup %6478  ;;  %6048 = vmatpush1.bf16.xpose.msra.mxu0 %v6047_v38  ;;  %6114 = vset.pattern.permute.xlu0 %v9380_v39 }
 0x8ab   : > { %v5083_v2 = vpop.xlane.xlu1 %5082  ;;  %v5182_v49 = vmul.f32 %v6479_v55, %v8349_v11  ;;  %v5181_v62 = vmul.f32 %v6479_v55, %v8347_v7  ;;  %2228 = vperm.xlu0 %6114, %v2225_v28   ;;  %v9381_v7 = vld [vmem:[#allocation35_spill] sm:$0xff] }
 0x8ac   : > { %6112 = vset.pattern.permute.xlu1 %v6604_v20  ;;  %6484 = vrcp.f32 %v5083_v2 }
 0x8ad   : > { %2064 = vperm.xlu1 %6112, %v8477_v57   ;;  %v6049_v37 = vpack.c.bf16 %v5182_v49, %v5180_v51  ;;  %v6051_v21 = vpack.c.bf16 %v5181_v62, %v5179_v26  ;;  %v972_v26 = vlaneseq }
 0x8ae   : > { %v6481_v19 = vpop.eup %6480 }
 0x8af   : > { %6050 = vmatprep.subr.bf16.mxu0 %v6049_v37  ;;  %v5086_v31 = vpop.xlane.xlu0 %5085  ;;  %v5184_v11 = vmul.f32 %v6481_v19, %v9381_v7  ;;  %v5183_v52 = vmul.f32 %v6481_v19, %v9384_v15  ;;  %v9389_v19 = vld [vmem:[#allocation9_spill] sm:$0xff] }
 0x8b0   : > { %6486 = vrcp.f32 %v5086_v31 }
 0x8b1   : > { %6113 = vset.pattern.permute.xlu1 %v6605_v22 }
 0x8b2   : > { %2218 = vperm.xlu1 %6113, %v8477_v57   ;;  %v6483_v56 = vpop.eup %6482  ;;  %6052 = vmatpush1.bf16.xpose.msra.mxu0 %v6051_v21 }
 0x8b3   : > { %v5186_v16 = vmul.f32 %v6483_v56, %v9382_v45  ;;  %v5185_v14 = vmul.f32 %v6483_v56, %v9383_v40 }
 0x8b5   : > { %v6053_v32 = vpack.c.bf16 %v5186_v16, %v5184_v11  ;;  %v6055_v34 = vpack.c.bf16 %v5185_v14, %v5183_v52  ;;  %v9391_v14 = vld [vmem:[#allocation12_spill] sm:$0xff]  ;;  %v9392_v52 = vld [vmem:[#allocation13_spill] sm:$0xff] }
 0x8b6   : > { %6115 = vset.pattern.permute.xlu1 %v9380_v39  ;;  %v6485_v33 = vpop.eup %6484 }
 0x8b7   : > { %6054 = vmatprep.subr.bf16.mxu0 %v6053_v32  ;;  %v5188_v57 = vmul.f32 %v6485_v33, %v9385_v61  ;;  %v5187_v12 = vmul.f32 %v6485_v33, %v9388_v43 }
 0x8ba   : > { %v6487_v50 = vpop.eup %6486  ;;  %6056 = vmatpush1.bf16.xpose.msra.mxu0 %v6055_v34 }
 0x8bb   : > { %v5190_v29 = vmul.f32 %v6487_v50, %v9386_v30  ;;  %v5189_v48 = vmul.f32 %v6487_v50, %v9387_v46  ;;  %v8549_v50 = vld [vmem:[%s9145_s8] ss:$8 sm:$0x3]  ;;  %v9393_v30 = vld [vmem:[#allocation29_spill] sm:$0xff] }
 0x8bd   : > { %v6057_v53 = vpack.c.bf16 %v5190_v29, %v5188_v57  ;;  %v6059_v24 = vpack.c.bf16 %v5189_v48, %v5187_v12  ;;  %v5209_v29 = vrot.slane %v9393_v30, 4 }
 0x8bf   : > { %6058 = vmatprep.subr.bf16.mxu0 %v6057_v53 }
 0x8c2   : > { %6060 = vmatpush1.bf16.xpose.msra.mxu0 %v6059_v24 }
 0x8f7   : > { %v5089_v47 = vpop.xlane.xlu1 %5088 }
 0x8f8   : > { %6488 = vrcp.f32 %v5089_v47 }
 0x8fb   : > { %v5092_v58 = vpop.xlane.xlu0 %5091 }
 0x8fc   : > { %6490 = vrcp.f32 %v5092_v58 }
 0x8ff   : > { %v5095_v9 = vpop.xlane.xlu1 %5094 }
 0x900   : > { %6492 = vrcp.f32 %v5095_v9  ;;  %v9394_v9 = vld [vmem:[#allocation2_spill] sm:$0xff] }
 0x902   : > { %v6489_v10 = vpop.eup %6488 }
 0x903   : > { %v5098_v23 = vpop.xlane.xlu0 %5097  ;;  %v5192_v38 = vmul.f32 %v6489_v10, %v8393_v35  ;;  %v5191_v54 = vmul.f32 %v6489_v10, %v8391_v36 }
 0x904   : > { %6494 = vrcp.f32 %v5098_v23 }
 0x906   : > { %v6491_v6 = vpop.eup %6490 }
 0x907   : > { %v5194_v8 = vmul.f32 %v6491_v6, %v8401_v27  ;;  %v5193_v5 = vmul.f32 %v6491_v6, %v8399_v3 }
 0x908   : > { %v5101_v25 = vpop.xlane.xlu1 %5100 }
 0x909   : > { %6496 = vrcp.f32 %v5101_v25  ;;  %v6061_v28 = vpack.c.bf16 %v5194_v8, %v5192_v38  ;;  %v6063_v55 = vpack.c.bf16 %v5193_v5, %v5191_v54  ;;  %v8574_v38 = vld [vmem:[%s9145_s8 + $0x1] ss:$8 sm:$0x3] }
 0x90a   : > { %v6493_v2 = vpop.eup %6492  ;;  %v9395_v8 = vld [vmem:[#allocation3_spill] sm:$0xff] }
 0x90b   : > { %6062 = vmatprep.subr.bf16.mxu0 %v6061_v28  ;;  %v5104_v39 = vpop.xlane.xlu0 %5103  ;;  %v5196_v62 = vmul.f32 %v6493_v2, %v8413_v41  ;;  %v5195_v27 = vmul.f32 %v6493_v2, %v8411_v4  ;;  %v973_v4 = vshrl.u32 %v972_v26, 7 }
 0x90c   : > { %6498 = vrcp.f32 %v5104_v39  ;;  %6064 = vmatpush1.bf16.xpose.msra.mxu0 %v6063_v55 }
 0x90d   : > { %v8558_v53 = vsub.s32 1, %v973_v4 }
 0x90e   : > { %v6495_v51 = vpop.eup %6494 }
 0x90f   : > { %v5198_v35 = vmul.f32 %v6495_v51, %v8421_v18  ;;  %v5197_v36 = vmul.f32 %v6495_v51, %v8419_v44  ;;  %v9390_v18 = vld [vmem:[#allocation11_spill] sm:$0xff]  ;;  %v979_v2 = vrot.slane %v8549_v50, %v8558_v53 }
 0x910   : > { %v5107_v49 = vpop.xlane.xlu1 %5106 }
 0x911   : > { %6500 = vrcp.f32 %v5107_v49  ;;  %v6065_v3 = vpack.c.bf16 %v5198_v35, %v5196_v62  ;;  %v6067_v20 = vpack.c.bf16 %v5197_v36, %v5195_v27 }
 0x913   : > { %v6497_v37 = vpop.eup %6496  ;;  %6066 = vmatprep.subr.bf16.mxu0 %v6065_v3  ;;  %v5110_v31 = vpop.xlane.xlu0 %5109  ;;  %v9396_v3 = vld [vmem:[#allocation4_spill] sm:$0xff] }
 0x914   : > { %v8523_v21 = vpop.permute.xlu1 %831  ;;  %6502 = vrcp.f32 %v5110_v31  ;;  %6068 = vmatpush1.bf16.xpose.msra.mxu0 %v6067_v20  ;;  %v5200_v56 = vmul.f32 %v6497_v37, %v8433_v0  ;;  %v5199_v45 = vmul.f32 %v6497_v37, %v8431_v17  ;;  %v8551_v17 = vsub.s32 0, %v973_v4 }
 0x915   : > { %v911_v41 = vadd.f32 %v9389_v19, %v8523_v21  ;;  %v8529_v22 = vadd.f32 %v9390_v18, %v8523_v21  ;;  %v1066_v15 = vadd.f32 %v9391_v14, %v8523_v21  ;;  %v1068_v32 = vadd.f32 %v9392_v52, %v8523_v21 }
 0x916   : > { %v6499_v44 = vpop.eup %6498  ;;  %v975_v24 = vrot.slane %v8549_v50, %v8551_v17  ;;  %v8568_v23 = vadd.f32 %v9394_v9, %v8523_v21  ;;  %v8578_v54 = vadd.f32 %v9395_v8, %v8523_v21  ;;  %v8599_v20 = vadd.f32 %v9396_v3, %v8523_v21 }
 0x917   : > { %v8532_v7 = vmul.f32 0.70710677, %v911_v41  ;;  %v8535_v11 = vmul.f32 0.70710677, %v8529_v22  ;;  %v5202_v16 = vmul.f32 %v6499_v44, %v8439_v59  ;;  %v5201_v40 = vmul.f32 %v6499_v44, %v8437_v42 }
 0x918   : > { %v8554_v46 = vmul.f32 0.70710677, %v1066_v15  ;;  %v8556_v48 = vmul.f32 0.70710677, %v1068_v32  ;;  %v8603_v37 = vmul.f32 0.70710677, %v8568_v23 }
 0x919   : > { %v923_v34 = vand.u32 2147483647, %v8532_v7  ;;  %v924_v0 = vand.u32 2147483647, %v8535_v11  ;;  %v6069_v33 = vpack.c.bf16 %v5202_v16, %v5200_v56  ;;  %v6071_v59 = vpack.c.bf16 %v5201_v40, %v5199_v45 }
 0x91a   : > { %v1078_v47 = vand.u32 2147483647, %v8554_v46  ;;  %v8564_v58 = vand.u32 2147483647, %v8556_v48  ;;  %vm919_vm6 = vcmp.ge.f32.partialorder %v8532_v7, 0.0  ;;  %v8608_v19 = vmul.f32 0.5, %v911_v41 }
 0x91b   : > { %v925_v42 = vmul.f32 0.3275911, %v923_v34  ;;  %v926_v61 = vmul.f32 0.3275911, %v924_v0  ;;  %v6501_v57 = vpop.eup %6500  ;;  %6070 = vmatprep.subr.bf16.mxu0 %v6069_v33  ;;  %v951_v6 = vsub.f32 0.0, %v923_v34  ;;  %v952_v39 = vsub.f32 0.0, %v924_v0 }
 0x91c   : > { %6072 = vmatpush1.bf16.xpose.msra.mxu0 %v6071_v59  ;;  %v5204_v25 = vmul.f32 %v6501_v57, %v8449_v13  ;;  %v5203_v28 = vmul.f32 %v6501_v57, %v8447_v60  ;;  %v8586_v13 = vld [vmem:[%s9145_s8 + $0x2] ss:$8 sm:$0x3]  ;;  %v1080_v51 = vmul.f32 0.3275911, %v1078_v47  ;;  %v1134_v60 = vrot.slane %v8574_v38, %v8558_v53 }
 0x91d   : > { %v927_v43 = vadd.f32 1.0, %v925_v42  ;;  %v928_v12 = vadd.f32 1.0, %v926_v61  ;;  %v1081_v49 = vmul.f32 0.3275911, %v8564_v58  ;;  %v1284_v36 = vrot.slane %v8586_v13, %v8551_v17 }
 0x91e   : > { %v6503_v10 = vpop.eup %6502  ;;  %v953_v26 = vmul.f32 %v951_v6, %v923_v34  ;;  %v8606_v31 = vmul.f32 0.70710677, %v8578_v54  ;;  %vm920_vm7 = vcmp.ge.f32.partialorder %v8535_v11, 0.0  ;;  %v954_v18 = vmul.f32 %v952_v39, %v924_v0  ;;  %v9397_v11 = vld [vmem:[#allocation5_spill] sm:$0xff] }
 0x91f   : > { %6504 = vrcp.f32 %v927_v43  ;;  %v5206_v5 = vmul.f32 %v6503_v10, %v8455_v63  ;;  %v5205_v55 = vmul.f32 %v6503_v10, %v8453_v1  ;;  %v1130_v63 = vrot.slane %v8574_v38, %v8551_v17 }
 0x920   : > { %6506 = vrcp.f32 %v928_v12  ;;  %v1082_v1 = vadd.f32 1.0, %v1080_v51  ;;  %v1083_v27 = vadd.f32 1.0, %v1081_v49  ;;  %v8612_v4 = vmul.f32 0.5, %v8529_v22 }
 0x921   : > { %v6073_v62 = vpack.c.bf16 %v5206_v5, %v5204_v25  ;;  %v6075_v35 = vpack.c.bf16 %v5205_v55, %v5203_v28  ;;  %v8614_v44 = vmul.f32 0.5, %v1066_v15  ;;  %v8616_v56 = vmul.f32 0.5, %v1068_v32 }
 0x922   : > { %6508 = vrcp.f32 %v1082_v1  ;;  %v9227_v7 = vmov -1.0   ;;  %v1106_v16 = vsub.f32 0.0, %v1078_v47  ;;  %v1232_v41 = vand.u32 2147483647, %v8603_v37 }
 0x923   : > { %6074 = vmatprep.subr.bf16.mxu0 %v6073_v62  ;;  %6510 = vrcp.f32 %v1083_v27  ;;  %v8619_v45 = vsel %vm919_vm6, 1.0, %v9227_v7  ;;  %v8624_v40 = vadd.f32 %v9397_v11, %v8523_v21  ;;  %v8627_v14 = vsel %vm920_vm7, 1.0, %v9227_v7 }
 0x924   : > { %6076 = vmatpush1.bf16.xpose.msra.mxu0 %v6075_v35  ;;  %v955_v22 = vmul.f32 1.442695, %v953_v26  ;;  %vm1074_vm8 = vcmp.ge.f32.partialorder %v8554_v46, 0.0  ;;  %v8631_v15 = vand.u32 2147483647, %v8606_v31  ;;  %vm1075_vm9 = vcmp.ge.f32.partialorder %v8556_v48, 0.0 }
 0x925   : > { %v957_v32 = vmul.f32 1.442695, %v954_v18  ;;  %v1107_v34 = vsub.f32 0.0, %v8564_v58  ;;  %v1234_v0 = vmul.f32 0.3275911, %v1232_v41  ;;  %v1288_v61 = vrot.slane %v8586_v13, %v8558_v53 }
 0x926   : > { %v1235_v42 = vmul.f32 0.3275911, %v8631_v15  ;;  %v8644_v57 = vmul.f32 0.70710677, %v8599_v20  ;;  %v1108_v12 = vmul.f32 %v1106_v16, %v1078_v47  ;;  %v8648_v48 = vmul.f32 0.70710677, %v8624_v40 }
 0x927   : > { %v1236_v9 = vadd.f32 1.0, %v1234_v0  ;;  %v8655_v6 = vsel %vm1074_vm8, 1.0, %v9227_v7  ;;  %v8658_v25 = vsel %vm1075_vm9, 1.0, %v9227_v7  ;;  %v1109_v47 = vmul.f32 %v1107_v34, %v8564_v58 }
 0x928   : > { %v1237_v8 = vadd.f32 1.0, %v1235_v42  ;;  %v8662_v28 = vmul.f32 0.5, %v8568_v23  ;;  %v9398_v55 = vmov 0.0   ;;  %v8670_v46 = vand.u32 2147483647, %v8644_v57 }
 0x929   : > { %v8633_v52 = vpop.eup %6504  ;;  %6512 = vrcp.f32 %v1236_v9  ;;  %v1110_v58 = vmul.f32 1.442695, %v1108_v12  ;;  %v1260_v49 = vsub.f32 0.0, %v1232_v41  ;;  %v8676_v23 = vand.u32 2147483647, %v8648_v48 }
 0x92a   : > { %v8637_v33 = vpop.eup %6506  ;;  %v933_v59 = vmul.f32 1.0614054, %v8633_v52  ;;  %6514 = vrcp.f32 %v1237_v8  ;;  %v1542_v1 = vmul.f32 0.3275911, %v8670_v46  ;;  %v1112_v11 = vmul.f32 1.442695, %v1109_v47 }
 0x92b   : > { %v934_v43 = vmul.f32 1.0614054, %v8637_v33  ;;  %5278 = vmatmul.mubr.f32.vlgmr.msra.gmra.mrb[90].mxu0 %v5209_v29  ;;  %v8667_v29 = vmul.f32 0.5, %v8578_v54  ;;  %6516 = vpow2.f32 %v955_v22  ;;  %v1543_v26 = vmul.f32 0.3275911, %v8676_v23 }
 0x92c   : > { %v935_v10 = vadd.f32 -1.4531521, %v933_v59  ;;  %5360 = vmatprep.mubr.f32.mxu0 %v9398_v55  ;;  %v8672_v39 = vpop.eup %6508  ;;  %6518 = vpow2.f32 %v957_v32  ;;  %v1544_v34 = vadd.f32 1.0, %v1542_v1  ;;  %v1261_v22 = vsub.f32 0.0, %v8631_v15 }
 0x92d   : > { %v936_v5 = vadd.f32 -1.4531521, %v934_v43  ;;  %v8678_v62 = vpop.eup %6510  ;;  %v1088_v54 = vmul.f32 1.0614054, %v8672_v39  ;;  %v1545_v42 = vadd.f32 1.0, %v1543_v26  ;;  %vm1228_vm10 = vcmp.ge.f32.partialorder %v8603_v37, 0.0 }
 0x92e   : > { %v937_v30 = vmul.f32 %v8633_v52, %v935_v10  ;;  %v1089_v3 = vmul.f32 1.0614054, %v8678_v62  ;;  %6520 = vrcp.f32 %v1544_v34  ;;  %v1262_v10 = vmul.f32 %v1260_v49, %v1232_v41 }
 0x92f   : > { %v938_v51 = vmul.f32 %v8637_v33, %v936_v5  ;;  %v1090_v16 = vadd.f32 -1.4531521, %v1088_v54  ;;  %6522 = vrcp.f32 %v1545_v42  ;;  %vm1229_vm11 = vcmp.ge.f32.partialorder %v8606_v31, 0.0 }
 0x930   : > { %v939_v35 = vadd.f32 1.4214138, %v937_v30  ;;  %v1091_v59 = vadd.f32 -1.4531521, %v1089_v3  ;;  %6524 = vpow2.f32 %v1110_v58  ;;  %v1263_v37 = vmul.f32 %v1261_v22, %v8631_v15 }
 0x931   : > { %v940_v27 = vadd.f32 1.4214138, %v938_v51  ;;  %v1092_v12 = vmul.f32 %v8672_v39, %v1090_v16  ;;  %v8696_v51 = vsel %vm1228_vm10, 1.0, %v9227_v7  ;;  %6526 = vpow2.f32 %v1112_v11 }
 0x932   : > { %v941_v18 = vmul.f32 %v8633_v52, %v939_v35  ;;  %v1093_v9 = vmul.f32 %v8678_v62, %v1091_v59  ;;  %v1264_v3 = vmul.f32 1.442695, %v1262_v10  ;;  %v8709_v15 = vsel %vm1229_vm11, 1.0, %v9227_v7 }
 0x933   : > { %v942_v0 = vmul.f32 %v8637_v33, %v940_v27  ;;  %v1094_v5 = vadd.f32 1.4214138, %v1092_v12  ;;  %v8692_v47 = vpop.eup %6512  ;;  %v1266_v42 = vmul.f32 1.442695, %v1263_v37  ;;  %v9400_v37 = vld [vmem:[#allocation17_spill] sm:$0xff]  ;;  %vm1536_vm12 = vcmp.ge.f32.partialorder %v8644_v57, 0.0 }
 0x934   : > { %v943_v43 = vadd.f32 -0.28449672, %v941_v18  ;;  %v1095_v30 = vadd.f32 1.4214138, %v1093_v9  ;;  %v8699_v35 = vpop.eup %6514  ;;  %v1242_v58 = vmul.f32 1.0614054, %v8692_v47  ;;  %6528 = vpow2.f32 %v1264_v3 }
 0x935   : > { %v944_v32 = vadd.f32 -0.28449672, %v942_v0  ;;  %v1096_v49 = vmul.f32 %v8672_v39, %v1094_v5  ;;  %v1243_v27 = vmul.f32 1.0614054, %v8699_v35  ;;  %v6517_v26 = vpop.eup %6516  ;;  %6530 = vpow2.f32 %v1266_v42 }
 0x936   : > { %v945_v8 = vmul.f32 %v8633_v52, %v943_v43  ;;  %v1097_v1 = vmul.f32 %v8678_v62, %v1095_v30  ;;  %v1244_v34 = vadd.f32 -1.4531521, %v1242_v58  ;;  %v6519_v0 = vpop.eup %6518  ;;  %vm1537_vm13 = vcmp.ge.f32.partialorder %v8648_v48, 0.0  ;;  %v9405_v48 = vld [vmem:[#allocation20_spill] sm:$0xff] }
 0x937   : > { %v946_v55 = vmul.f32 %v8637_v33, %v944_v32  ;;  %v1098_v16 = vadd.f32 -0.28449672, %v1096_v49  ;;  %v1245_v22 = vadd.f32 -1.4531521, %v1243_v27 }
 0x938   : > { %v947_v41 = vadd.f32 0.2548296, %v945_v8  ;;  %v1099_v59 = vadd.f32 -0.28449672, %v1097_v1  ;;  %v1246_v32 = vmul.f32 %v8692_v47, %v1244_v34  ;;  %v8720_v5 = vpop.eup %6520 }
 0x939   : > { %v948_v54 = vadd.f32 0.2548296, %v946_v55  ;;  %v1100_v12 = vmul.f32 %v8672_v39, %v1098_v16  ;;  %v1247_v8 = vmul.f32 %v8699_v35, %v1245_v22  ;;  %v8726_v49 = vpop.eup %6522  ;;  %v1550_v16 = vmul.f32 1.0614054, %v8720_v5 }
 0x93a   : > { %v949_v18 = vmul.f32 %v8633_v52, %v947_v41  ;;  %v9399_v52 = vld [vmem:[#allocation16_spill] sm:$0xff]  ;;  %v1101_v31 = vmul.f32 %v8678_v62, %v1099_v59  ;;  %v1248_v30 = vadd.f32 1.4214138, %v1246_v32  ;;  %v8724_v41 = vadd.f32 %v9400_v37, %v8523_v21  ;;  %v6525_v27 = vpop.eup %6524 }
 0x93b   : > { %v950_v11 = vmul.f32 %v8637_v33, %v948_v54  ;;  %v8716_v9 = vadd.f32 %v9399_v52, %v8523_v21  ;;  %v1102_v55 = vadd.f32 0.2548296, %v1100_v12  ;;  %v1249_v1 = vadd.f32 1.4214138, %v1247_v8  ;;  %v6527_v22 = vpop.eup %6526 }
 0x93c   : > { %v959_v43 = vmul.f32 %v6517_v26, %v949_v18  ;;  %v1103_v54 = vadd.f32 0.2548296, %v1101_v31  ;;  %v1250_v18 = vmul.f32 %v8692_v47, %v1248_v30  ;;  %v1551_v59 = vmul.f32 1.0614054, %v8726_v49 }
 0x93d   : > { %v960_v10 = vmul.f32 %v6519_v0, %v950_v11  ;;  %v1104_v3 = vmul.f32 %v8672_v39, %v1102_v55  ;;  %v1251_v11 = vmul.f32 %v8699_v35, %v1249_v1  ;;  %v1552_v32 = vadd.f32 -1.4531521, %v1550_v16 }
 0x93e   : > { %v961_v33 = vsub.f32 1.0, %v959_v43  ;;  %v1105_v0 = vmul.f32 %v8678_v62, %v1103_v54  ;;  %v1252_v12 = vadd.f32 -0.28449672, %v1250_v18  ;;  %v1568_v37 = vsub.f32 0.0, %v8670_v46 }
 0x93f   : > { %v962_v58 = vsub.f32 1.0, %v960_v10  ;;  %v1114_v42 = vmul.f32 %v6525_v27, %v1104_v3  ;;  %v1253_v39 = vadd.f32 -0.28449672, %v1251_v11  ;;  %v1553_v10 = vadd.f32 -1.4531521, %v1551_v59 }
 0x940   : > { %v963_v26 = vmul.f32 %v961_v33, %v8619_v45  ;;  %v1115_v52 = vmul.f32 %v6527_v22, %v1105_v0  ;;  %v1554_v62 = vmul.f32 %v8720_v5, %v1552_v32  ;;  %v8745_v27 = vmul.f32 0.70710677, %v8716_v9 }
 0x941   : > { %v964_v34 = vmul.f32 %v962_v58, %v8627_v14  ;;  %v1116_v8 = vsub.f32 1.0, %v1114_v42  ;;  %v1254_v14 = vmul.f32 %v8692_v47, %v1252_v12  ;;  %v1255_v30 = vmul.f32 %v8699_v35, %v1253_v39 }
 0x942   : > { %v965_v43 = vadd.f32 1.0, %v963_v26  ;;  %v1117_v55 = vsub.f32 1.0, %v1115_v52  ;;  %v1555_v1 = vmul.f32 %v8726_v49, %v1553_v10  ;;  %v8752_v18 = vmul.f32 0.70710677, %v8724_v41 }
 0x943   : > { %v966_v45 = vadd.f32 1.0, %v964_v34  ;;  %v1118_v58 = vmul.f32 %v1116_v8, %v8655_v6  ;;  %v1256_v54 = vadd.f32 0.2548296, %v1254_v14  ;;  %v1257_v3 = vadd.f32 0.2548296, %v1255_v30  ;;  %v1141_v8 = vpop.permute.xlu1 %1140 }
 0x944   : > { %v967_v31 = vmul.f32 %v965_v43, %v8608_v19  ;;  %v6529_v19 = vpop.eup %6528  ;;  %v1556_v34 = vadd.f32 1.4214138, %v1554_v62  ;;  %v1569_v0 = vsub.f32 0.0, %v8676_v23  ;;  %v987_v43 = vpop.permute.xlu0 %986  ;;  %v1557_v32 = vadd.f32 1.4214138, %v1555_v1 }
 0x945   : > { %v968_v33 = vmul.f32 %v966_v45, %v8612_v4  ;;  %v1119_v4 = vmul.f32 %v1117_v55, %v8658_v25  ;;  %v1120_v16 = vadd.f32 1.0, %v1118_v58  ;;  %v1258_v6 = vmul.f32 %v8692_v47, %v1256_v54  ;;  %v6531_v11 = vpop.eup %6530 }
 0x946   : > { %v982_v26 = vmul.f32 %v975_v24, %v967_v31  ;;  %v1259_v24 = vmul.f32 %v8699_v35, %v1257_v3  ;;  %v1570_v25 = vmul.f32 %v1568_v37, %v8670_v46  ;;  %v8763_v47 = vand.u32 2147483647, %v8745_v27 }
 0x947   : > { %v983_v59 = vmul.f32 %v979_v2, %v968_v33  ;;  %v1121_v22 = vadd.f32 1.0, %v1119_v4  ;;  %v1122_v42 = vmul.f32 %v1120_v16, %v8614_v44  ;;  %v1268_v12 = vmul.f32 %v6529_v19, %v1258_v6 }
 0x948   : > { %v989_v45 = vmul.f32 %v987_v43, %v982_v26  ;;  %v1269_v39 = vmul.f32 %v6531_v11, %v1259_v24  ;;  %v8767_v50 = vand.u32 2147483647, %v8752_v18  ;;  %v1558_v35 = vmul.f32 %v8720_v5, %v1556_v34  ;;  %v9401_v34 = vld [vmem:[#allocation18_spill] sm:$0xff] }
 0x949   : > { %v1123_v52 = vmul.f32 %v1121_v22, %v8616_v56  ;;  %v1137_v2 = vmul.f32 %v1130_v63, %v1122_v42  ;;  %v1270_v46 = vsub.f32 1.0, %v1268_v12  ;;  %v1696_v44 = vmul.f32 0.3275911, %v8763_v47 }
 0x94a   : > { %v990_v10 = vmul.f32 %v987_v43, %v983_v59  ;;  %v1271_v56 = vsub.f32 1.0, %v1269_v39  ;;  %v1697_v14 = vmul.f32 0.3275911, %v8767_v50  ;;  %v1559_v55 = vmul.f32 %v8726_v49, %v1557_v32  ;;  %v1295_v59 = vpop.permute.xlu1 %1294 }
 0x94b   : > { %v1138_v31 = vmul.f32 %v1134_v60, %v1123_v52  ;;  %v1143_v62 = vmul.f32 %v1141_v8, %v1137_v2  ;;  %v1272_v33 = vmul.f32 %v1270_v46, %v8696_v51  ;;  %v1698_v63 = vadd.f32 1.0, %v1696_v44 }
 0x94c   : > { %v1273_v37 = vmul.f32 %v1271_v56, %v8709_v15  ;;  %v1571_v58 = vmul.f32 %v1569_v0, %v8676_v23  ;;  %v1699_v54 = vadd.f32 1.0, %v1697_v14  ;;  %v1560_v38 = vadd.f32 -0.28449672, %v1558_v35  ;;  %v9404_v14 = vld [vmem:[#allocation15_spill] sm:$0xff] }
 0x94d   : > { %v1144_v30 = vmul.f32 %v1141_v8, %v1138_v31  ;;  %v1145_v1 = vadd.f32 %v1143_v62, %v989_v45  ;;  %v1274_v19 = vadd.f32 1.0, %v1272_v33  ;;  %6532 = vrcp.f32 %v1698_v63  ;;  %v9403_v8 = vld [vmem:[#allocation14_spill] sm:$0xff] }
 0x94e   : > { %v1275_v26 = vadd.f32 1.0, %v1273_v37  ;;  %v1572_v4 = vmul.f32 1.442695, %v1570_v25  ;;  %6534 = vrcp.f32 %v1699_v54  ;;  %v1561_v51 = vadd.f32 -0.28449672, %v1559_v55 }
 0x94f   : > { %v1146_v60 = vadd.f32 %v1144_v30, %v990_v10  ;;  %v1276_v3 = vmul.f32 %v1274_v19, %v8662_v28  ;;  %v1574_v6 = vmul.f32 1.442695, %v1571_v58  ;;  %v8786_v15 = vadd.f32 %v9401_v34, %v8523_v21  ;;  %v9402_v28 = vld [vmem:[#allocation19_spill] sm:$0xff] }
 0x950   : > { %v1277_v16 = vmul.f32 %v1275_v26, %v8667_v29  ;;  %v1562_v0 = vmul.f32 %v8720_v5, %v1560_v38  ;;  %6536 = vpow2.f32 %v1572_v4  ;;  %v8797_v29 = vadd.f32 %v9402_v28, %v8523_v21 }
 0x951   : > { %v1291_v23 = vmul.f32 %v1284_v36, %v1276_v3  ;;  %v1563_v24 = vmul.f32 %v8726_v49, %v1561_v51  ;;  %6538 = vpow2.f32 %v1574_v6  ;;  %v8801_v43 = vmul.f32 0.70710677, %v8786_v15 }
 0x952   : > { %v1292_v11 = vmul.f32 %v1288_v61, %v1277_v16  ;;  %v1564_v42 = vadd.f32 0.2548296, %v1562_v0  ;;  %v8808_v13 = vmul.f32 0.70710677, %v8797_v29  ;;  %v8826_v56 = vadd.f32 %v9403_v8, %v8523_v21 }
 0x953   : > { %v1297_v22 = vmul.f32 %v1295_v59, %v1291_v23  ;;  %v1565_v32 = vadd.f32 0.2548296, %v1563_v24  ;;  %v8816_v39 = vand.u32 2147483647, %v8801_v43  ;;  %v8830_v62 = vadd.f32 %v9404_v14, %v8523_v21 }
 0x954   : > { %v1298_v25 = vmul.f32 %v1295_v59, %v1292_v11  ;;  %v1566_v2 = vmul.f32 %v8720_v5, %v1564_v42  ;;  %v8821_v44 = vand.u32 2147483647, %v8808_v13  ;;  %v1723_v54 = vsub.f32 0.0, %v8767_v50  ;;  %v8875_v42 = vld [vmem:[%s9145_s8 + $0x5] ss:$8 sm:$0x3] }
 0x955   : > { %v8803_v36 = vadd.f32 %v1297_v22, %v1145_v1  ;;  %v1567_v10 = vmul.f32 %v8726_v49, %v1565_v32  ;;  %v2004_v55 = vmul.f32 0.3275911, %v8816_v39  ;;  %v1722_v49 = vsub.f32 0.0, %v8763_v47 }
 0x956   : > { %v8805_v12 = vadd.f32 %v1298_v25, %v1146_v60  ;;  %v2005_v1 = vmul.f32 0.3275911, %v8821_v44  ;;  %v8839_v60 = vmul.f32 0.70710677, %v8826_v56  ;;  %v8842_v26 = vmul.f32 0.70710677, %v8830_v62 }
 0x957   : > { %v8810_v61 = vpop.eup %6532  ;;  %v2006_v4 = vadd.f32 1.0, %v2004_v55  ;;  %v1724_v16 = vmul.f32 %v1722_v49, %v8763_v47  ;;  %v1725_v6 = vmul.f32 %v1723_v54, %v8767_v50  ;;  %v8859_v28 = vadd.f32 %v9405_v48, %v8523_v21  ;;  %v9406_v47 = vld [vmem:[#allocation21_spill] sm:$0xff]  ;;  %v8870_v25 = vld [vmem:[%s9145_s8 + $0x4] ss:$8 sm:$0x3] }
 0x958   : > { %v8812_v45 = vpop.eup %6534  ;;  %v1704_v52 = vmul.f32 1.0614054, %v8810_v61  ;;  %v8850_v34 = vand.u32 2147483647, %v8839_v60  ;;  %v2007_v11 = vadd.f32 1.0, %v2005_v1  ;;  %v8863_v50 = vadd.f32 %v9406_v47, %v8523_v21 }
 0x959   : > { %v1705_v46 = vmul.f32 1.0614054, %v8812_v45  ;;  %v8854_v59 = vand.u32 2147483647, %v8842_v26  ;;  %6540 = vrcp.f32 %v2006_v4  ;;  %v1538_v22 = vsel %vm1536_vm12, 1.0, %v9227_v7 }
 0x95a   : > { %v1706_v35 = vadd.f32 -1.4531521, %v1704_v52  ;;  %v6537_v33 = vpop.eup %6536  ;;  %v1388_v57 = vmul.f32 0.3275911, %v8850_v34  ;;  %v1539_v24 = vsel %vm1537_vm13, 1.0, %v9227_v7  ;;  %6542 = vrcp.f32 %v2007_v11 }
 0x95b   : > { %v1707_v31 = vadd.f32 -1.4531521, %v1705_v46  ;;  %v1576_v63 = vmul.f32 %v6537_v33, %v1566_v2  ;;  %v6539_v37 = vpop.eup %6538  ;;  %v1389_v32 = vmul.f32 0.3275911, %v8854_v59  ;;  %v1726_v46 = vmul.f32 1.442695, %v1724_v16 }
 0x95c   : > { %v1708_v5 = vmul.f32 %v8810_v61, %v1706_v35  ;;  %v1577_v19 = vmul.f32 %v6539_v37, %v1567_v10  ;;  %v1390_v35 = vadd.f32 1.0, %v1388_v57  ;;  %v8879_v33 = vmul.f32 0.70710677, %v8859_v28  ;;  %v8897_v1 = vld [vmem:[%s9145_s8 + $0x3] ss:$8 sm:$0x3] }
 0x95d   : > { %v1709_v30 = vmul.f32 %v8812_v45, %v1707_v31  ;;  %v1578_v3 = vsub.f32 1.0, %v1576_v63  ;;  %v1728_v31 = vmul.f32 1.442695, %v1725_v6  ;;  %v1391_v8 = vadd.f32 1.0, %v1389_v32 }
 0x95e   : > { %v1710_v58 = vadd.f32 1.4214138, %v1708_v5  ;;  %v1579_v23 = vsub.f32 1.0, %v1577_v19  ;;  %6544 = vrcp.f32 %v1390_v35  ;;  %v8882_v5 = vmul.f32 0.70710677, %v8863_v50 }
 0x95f   : > { %v1711_v38 = vadd.f32 1.4214138, %v1709_v30  ;;  %v1580_v52 = vmul.f32 %v1578_v3, %v1538_v22  ;;  %6546 = vrcp.f32 %v1391_v8  ;;  %v1592_v55 = vrot.slane %v8870_v25, %v8551_v17 }
 0x960   : > { %v1712_v51 = vmul.f32 %v8810_v61, %v1710_v58  ;;  %v1581_v14 = vmul.f32 %v1579_v23, %v1539_v24  ;;  %v1596_v63 = vrot.slane %v8870_v25, %v8558_v53  ;;  %6548 = vpow2.f32 %v1726_v46 }
 0x961   : > { %v1713_v0 = vmul.f32 %v8812_v45, %v1711_v38  ;;  %v1582_v58 = vadd.f32 1.0, %v1580_v52  ;;  %6550 = vpow2.f32 %v1728_v31  ;;  %v8900_v38 = vand.u32 2147483647, %v8879_v33 }
 0x962   : > { %v1714_v2 = vadd.f32 -0.28449672, %v1712_v51  ;;  %v1583_v19 = vadd.f32 1.0, %v1581_v14  ;;  %v8903_v4 = vand.u32 2147483647, %v8882_v5  ;;  %v1532_v3 = vmul.f32 0.5, %v8599_v20 }
 0x963   : > { %v1715_v10 = vadd.f32 -0.28449672, %v1713_v0  ;;  %v1533_v51 = vmul.f32 0.5, %v8624_v40  ;;  %vm1690_vm14 = vcmp.ge.f32.partialorder %v8745_v27, 0.0  ;;  %v1414_v16 = vsub.f32 0.0, %v8850_v34  ;;  %v8909_v6 = vpop.eup %6540 }
 0x964   : > { %v1716_v30 = vmul.f32 %v8810_v61, %v1714_v2  ;;  %v2158_v11 = vmul.f32 0.3275911, %v8900_v38  ;;  %v2159_v57 = vmul.f32 0.3275911, %v8903_v4  ;;  %vm1691_vm15 = vcmp.ge.f32.partialorder %v8752_v18, 0.0  ;;  %v8923_v32 = vpop.eup %6542 }
 0x965   : > { %v1717_v49 = vmul.f32 %v8812_v45, %v1715_v10  ;;  %v1415_v20 = vsub.f32 0.0, %v8854_v59  ;;  %v8919_v47 = vmul.f32 %v1582_v58, %v1532_v3  ;;  %v8921_v22 = vmul.f32 %v1583_v19, %v1533_v51 }
 0x966   : > { %v1718_v23 = vadd.f32 0.2548296, %v1716_v30  ;;  %v2160_v24 = vadd.f32 1.0, %v2158_v11  ;;  %v2161_v25 = vadd.f32 1.0, %v2159_v57  ;;  %v8926_v52 = vmul.f32 0.5, %v8716_v9  ;;  %v9407_v57 = vld [vmem:[#allocation8_spill] sm:$0xff] }
 0x967   : > { %v1719_v48 = vadd.f32 0.2548296, %v1717_v49  ;;  %v8929_v2 = vmul.f32 0.5, %v8724_v41  ;;  %v1692_v18 = vsel %vm1690_vm14, 1.0, %v9227_v7  ;;  %v2012_v46 = vmul.f32 1.0614054, %v8909_v6 }
 0x968   : > { %v8935_v35 = vpop.eup %6544  ;;  %v1693_v10 = vsel %vm1691_vm15, 1.0, %v9227_v7  ;;  %v1720_v31 = vmul.f32 %v8810_v61, %v1718_v23  ;;  %v1416_v8 = vmul.f32 %v1414_v16, %v8850_v34  ;;  %6552 = vrcp.f32 %v2160_v24 }
 0x969   : > { %v8940_v9 = vpop.eup %6546  ;;  %v1721_v41 = vmul.f32 %v8812_v45, %v1719_v48  ;;  %v1396_v14 = vmul.f32 1.0614054, %v8935_v35  ;;  %v1417_v27 = vmul.f32 %v1415_v20, %v8854_v59  ;;  %6554 = vrcp.f32 %v2161_v25  ;;  %v9408_v25 = vld [vmem:[#allocation10_spill] sm:$0xff] }
 0x96a   : > { %v1599_v30 = vmul.f32 %v1592_v55, %v8919_v47  ;;  %v1600_v58 = vmul.f32 %v1596_v63, %v8921_v22  ;;  %v2013_v49 = vmul.f32 1.0614054, %v8923_v32  ;;  %v1397_v61 = vmul.f32 1.0614054, %v8940_v9  ;;  %v6549_v19 = vpop.eup %6548  ;;  %v1603_v63 = vpop.permute.xlu1 %1602 }
 0x96b   : > { %v2014_v34 = vadd.f32 -1.4531521, %v2012_v46  ;;  %v2030_v3 = vsub.f32 0.0, %v8816_v39  ;;  %v2031_v51 = vsub.f32 0.0, %v8821_v44  ;;  %v1398_v45 = vadd.f32 -1.4531521, %v1396_v14  ;;  %v6551_v16 = vpop.eup %6550 }
 0x96c   : > { %v1730_v23 = vmul.f32 %v6549_v19, %v1720_v31  ;;  %v1399_v11 = vadd.f32 -1.4531521, %v1397_v61  ;;  %v1418_v59 = vmul.f32 1.442695, %v1416_v8  ;;  %v8953_v55 = vadd.f32 %v9407_v57, %v8523_v21 }
 0x96d   : > { %v1731_v48 = vmul.f32 %v6551_v16, %v1721_v41  ;;  %v1400_v20 = vmul.f32 %v8935_v35, %v1398_v45  ;;  %v1420_v24 = vmul.f32 1.442695, %v1417_v27  ;;  %v8958_v46 = vadd.f32 %v9408_v25, %v8523_v21 }
 0x96e   : > { %v8960_v54 = vmul.f32 %v1603_v63, %v1599_v30  ;;  %v8962_v14 = vmul.f32 %v1603_v63, %v1600_v58  ;;  %v2015_v31 = vadd.f32 -1.4531521, %v2013_v49  ;;  %v1401_v8 = vmul.f32 %v8940_v9, %v1399_v11 }
 0x96f   : > { %v2016_v61 = vmul.f32 %v8909_v6, %v2014_v34  ;;  %v2032_v19 = vmul.f32 %v2030_v3, %v8816_v39  ;;  %v8968_v41 = vmul.f32 0.5, %v8826_v56  ;;  %v1402_v45 = vadd.f32 1.4214138, %v1400_v20 }
 0x970   : > { %v1732_v27 = vsub.f32 1.0, %v1730_v23  ;;  %v1403_v16 = vadd.f32 1.4214138, %v1401_v8  ;;  %6556 = vpow2.f32 %v1418_v59  ;;  %v8971_v21 = vmul.f32 0.70710677, %v8953_v55 }
 0x971   : > { %v1733_v30 = vsub.f32 1.0, %v1731_v48  ;;  %v1404_v58 = vmul.f32 %v8935_v35, %v1402_v45  ;;  %6558 = vpow2.f32 %v1420_v24  ;;  %v8975_v49 = vmul.f32 0.70710677, %v8958_v46 }
 0x972   : > { %v8977_v34 = vpop.eup %6552  ;;  %v2017_v39 = vmul.f32 %v8923_v32, %v2015_v31  ;;  %v8981_v56 = vmul.f32 0.5, %v8830_v62  ;;  %vm1382_vm1 = vcmp.ge.f32.partialorder %v8839_v60, 0.0  ;;  %v1405_v3 = vmul.f32 %v8940_v9, %v1403_v16 }
 0x973   : > { %v8985_v23 = vpop.eup %6554  ;;  %v2018_v11 = vadd.f32 1.4214138, %v2016_v61  ;;  %v2033_v59 = vmul.f32 %v2031_v51, %v8821_v44  ;;  %vm1383_vm2 = vcmp.ge.f32.partialorder %v8842_v26, 0.0  ;;  %v1406_v57 = vadd.f32 -0.28449672, %v1404_v58 }
 0x974   : > { %v2166_v63 = vmul.f32 1.0614054, %v8977_v34  ;;  %v1734_v48 = vmul.f32 %v1732_v27, %v1692_v18  ;;  %v1407_v20 = vadd.f32 -0.28449672, %v1405_v3  ;;  %v2167_v24 = vmul.f32 1.0614054, %v8985_v23 }
 0x975   : > { %v8992_v62 = vand.u32 2147483647, %v8971_v21  ;;  %v1735_v25 = vmul.f32 %v1733_v30, %v1693_v10  ;;  %v1408_v31 = vmul.f32 %v8935_v35, %v1406_v57  ;;  %v8996_v61 = vand.u32 2147483647, %v8975_v49 }
 0x976   : > { %v2168_v8 = vadd.f32 -1.4531521, %v2166_v63  ;;  %v2019_v44 = vadd.f32 1.4214138, %v2017_v39  ;;  %v1409_v51 = vmul.f32 %v8940_v9, %v1407_v20  ;;  %v2169_v45 = vadd.f32 -1.4531521, %v2167_v24 }
 0x977   : > { %v1850_v16 = vmul.f32 0.3275911, %v8992_v62  ;;  %v2020_v18 = vmul.f32 %v8909_v6, %v2018_v11  ;;  %v1410_v27 = vadd.f32 0.2548296, %v1408_v31  ;;  %v1851_v3 = vmul.f32 0.3275911, %v8996_v61 }
 0x978   : > { %v2170_v58 = vmul.f32 %v8977_v34, %v2168_v8  ;;  %v1411_v10 = vadd.f32 0.2548296, %v1409_v51  ;;  %v2171_v30 = vmul.f32 %v8985_v23, %v2169_v45  ;;  %v2184_v57 = vsub.f32 0.0, %v8900_v38  ;;  %v5367_v11 = vld [vmem:[%s9157_s20] sm:$0xff] }
 0x979   : > { %v1852_v63 = vadd.f32 1.0, %v1850_v16  ;;  %v1412_v39 = vmul.f32 %v8935_v35, %v1410_v27  ;;  %v2185_v20 = vsub.f32 0.0, %v8903_v4  ;;  %v1853_v24 = vadd.f32 1.0, %v1851_v3  ;;  %5372 = vperm.xlu1 %6115, %v5367_v11   ;;  %v5377_v27 = vld [vmem:[%s9158_s21] sm:$0xff] }
 0x97a   : > { %v2172_v40 = vadd.f32 1.4214138, %v2170_v58  ;;  %v6557_v31 = vpop.eup %6556  ;;  %v2021_v8 = vmul.f32 %v8923_v32, %v2019_v44  ;;  %v1413_v51 = vmul.f32 %v8940_v9, %v1411_v10  ;;  %v2173_v37 = vadd.f32 1.4214138, %v2171_v30 }
 0x97b   : > { %6560 = vrcp.f32 %v1852_v63  ;;  %v6559_v45 = vpop.eup %6558  ;;  %v2022_v16 = vadd.f32 -0.28449672, %v2020_v18  ;;  %v1422_v0 = vmul.f32 %v6557_v31, %v1412_v39  ;;  %v2034_v58 = vmul.f32 1.442695, %v2032_v19 }
 0x97c   : > { %v2174_v35 = vmul.f32 %v8977_v34, %v2172_v40  ;;  %6562 = vrcp.f32 %v1853_v24  ;;  %v1423_v3 = vmul.f32 %v6559_v45, %v1413_v51  ;;  %v2175_v7 = vmul.f32 %v8985_v23, %v2173_v37 }
 0x97d   : > { %v2186_v44 = vmul.f32 %v2184_v57, %v8900_v38  ;;  %v2036_v9 = vmul.f32 1.442695, %v2033_v59  ;;  %v9409_v10 = vmov -1.0   ;;  %v1424_v18 = vsub.f32 1.0, %v1422_v0  ;;  %5380 = vperm.xlu1 %6115, %v5377_v27  }
 0x97e   : > { %v1384_v30 = vsel %vm1382_vm1, 1.0, %v9409_v10  ;;  %v2187_v63 = vmul.f32 %v2185_v20, %v8903_v4  ;;  %v1736_v40 = vadd.f32 1.0, %v1734_v48  ;;  %v2023_v39 = vadd.f32 -0.28449672, %v2021_v8 }
 0x97f   : > { %v1385_v24 = vsel %vm1383_vm2, 1.0, %v9409_v10  ;;  %v1425_v19 = vsub.f32 1.0, %v1423_v3  ;;  %v1737_v11 = vadd.f32 1.0, %v1735_v25  ;;  %v2024_v37 = vmul.f32 %v8909_v6, %v2022_v16 }
 0x980   : > { %v1426_v38 = vmul.f32 %v1424_v18, %v1384_v30  ;;  %v2176_v59 = vadd.f32 -0.28449672, %v2174_v35  ;;  %v2177_v31 = vadd.f32 -0.28449672, %v2175_v7  ;;  %v2188_v60 = vmul.f32 1.442695, %v2186_v44 }
 0x981   : > { %v1427_v57 = vmul.f32 %v1425_v19, %v1385_v24  ;;  %v1876_v0 = vsub.f32 0.0, %v8992_v62  ;;  %6564 = vpow2.f32 %v2034_v58  ;;  %v2190_v48 = vmul.f32 1.442695, %v2187_v63 }
 0x982   : > { %v1428_v4 = vadd.f32 1.0, %v1426_v38  ;;  %v1877_v20 = vsub.f32 0.0, %v8996_v61  ;;  %v1738_v26 = vmul.f32 %v1736_v40, %v8926_v52  ;;  %v2025_v8 = vmul.f32 %v8923_v32, %v2023_v39  ;;  %v1449_v40 = vpop.permute.xlu0 %1448 }
 0x983   : > { %6566 = vpow2.f32 %v2036_v9  ;;  %v1429_v25 = vadd.f32 1.0, %v1427_v57  ;;  %v1739_v51 = vmul.f32 %v1737_v11, %v8929_v2  ;;  %v2026_v45 = vadd.f32 0.2548296, %v2024_v37 }
 0x984   : > { %v1430_v16 = vmul.f32 %v1428_v4, %v8968_v41  ;;  %v2178_v7 = vmul.f32 %v8977_v34, %v2176_v59  ;;  %v2179_v58 = vmul.f32 %v8985_v23, %v2177_v31  ;;  %6568 = vpow2.f32 %v2188_v60  ;;  %v1757_v60 = vpop.permute.xlu1 %1756 }
 0x985   : > { %v9033_v35 = vpop.eup %6560  ;;  %v1431_v27 = vmul.f32 %v1429_v25, %v8981_v56  ;;  %v1878_v52 = vmul.f32 %v1876_v0, %v8992_v62  ;;  %v9410_v44 = vrot.slane %v8897_v1, %v8551_v17  ;;  %6570 = vpow2.f32 %v2190_v48 }
 0x986   : > { %v9038_v3 = vpop.eup %6562  ;;  %v1858_v41 = vmul.f32 1.0614054, %v9033_v35  ;;  %v1879_v9 = vmul.f32 %v1877_v20, %v8996_v61  ;;  %v9411_v30 = vrot.slane %v8875_v42, %v8551_v17  ;;  %v2027_v18 = vadd.f32 0.2548296, %v2025_v8 }
 0x987   : > { %v1445_v2 = vmul.f32 %v9410_v44, %v1430_v16  ;;  %v9412_v63 = vrot.slane %v8897_v1, %v8558_v53  ;;  %v1859_v39 = vmul.f32 1.0614054, %v9038_v3  ;;  %v9413_v24 = vrot.slane %v8875_v42, %v8558_v53 }
 0x988   : > { %v1753_v56 = vmul.f32 %v9411_v30, %v1738_v26  ;;  %v2180_v37 = vadd.f32 0.2548296, %v2178_v7  ;;  %v1860_v38 = vadd.f32 -1.4531521, %v1858_v41  ;;  %v2181_v59 = vadd.f32 0.2548296, %v2179_v58 }
 0x989   : > { %v1446_v62 = vmul.f32 %v9412_v63, %v1431_v27  ;;  %v1754_v19 = vmul.f32 %v9413_v24, %v1739_v51  ;;  %v1451_v11 = vmul.f32 %v1449_v40, %v1445_v2  ;;  %v1861_v57 = vadd.f32 -1.4531521, %v1859_v39 }
 0x98a   : > { %v1880_v31 = vmul.f32 1.442695, %v1878_v52  ;;  %v2028_v0 = vmul.f32 %v8909_v6, %v2026_v45  ;;  %v1862_v4 = vmul.f32 %v9033_v35, %v1860_v38  ;;  %v1882_v48 = vmul.f32 1.442695, %v1879_v9 }
 0x98b   : > { %v1452_v61 = vmul.f32 %v1449_v40, %v1446_v62  ;;  %v1453_v1 = vadd.f32 %v1451_v11, %v8803_v36  ;;  %v1759_v20 = vmul.f32 %v1757_v60, %v1753_v56  ;;  %v2029_v26 = vmul.f32 %v8923_v32, %v2027_v18  ;;  %v6565_v25 = vpop.eup %6564 }
 0x98c   : > { %v1863_v8 = vmul.f32 %v9038_v3, %v1861_v57  ;;  %v1760_v51 = vmul.f32 %v1757_v60, %v1754_v19  ;;  %v2182_v7 = vmul.f32 %v8977_v34, %v2180_v37  ;;  %v1864_v27 = vadd.f32 1.4214138, %v1862_v4 }
 0x98d   : > { %v1454_v42 = vadd.f32 %v1452_v61, %v8805_v12  ;;  %v1607_v16 = vadd.f32 %v8960_v54, %v1453_v1  ;;  %v6567_v6 = vpop.eup %6566  ;;  %v2183_v45 = vmul.f32 %v8985_v23, %v2181_v59  ;;  %6572 = vpow2.f32 %v1880_v31  ;;  %v5520_v59 = vld [vmem:[%s9145_s8 + $0x7] ss:$8 sm:$0x3] }
 0x98e   : > { %v1865_v58 = vadd.f32 1.4214138, %v1863_v8  ;;  %v2038_v52 = vmul.f32 %v6565_v25, %v2028_v0  ;;  %v1866_v12 = vmul.f32 %v9033_v35, %v1864_v27  ;;  %6574 = vpow2.f32 %v1882_v48  ;;  %v6569_v44 = vpop.eup %6568 }
 0x98f   : > { %v1608_v36 = vadd.f32 %v8962_v14, %v1454_v42  ;;  %v9065_v32 = vadd.f32 %v1759_v20, %v1607_v16  ;;  %v2039_v2 = vmul.f32 %v6567_v6, %v2029_v26  ;;  %v6571_v34 = vpop.eup %6570  ;;  %v2192_v9 = vmul.f32 %v6569_v44, %v2182_v7 }
 0x990   : > { %v1867_v54 = vmul.f32 %v9038_v3, %v1865_v58  ;;  %v1868_v30 = vadd.f32 -0.28449672, %v1866_v12  ;;  %v2193_v14 = vmul.f32 %v6571_v34, %v2183_v45  ;;  %vm1998_vm3 = vcmp.ge.f32.partialorder %v8801_v43, 0.0  ;;  %v5524_v45 = vld [vmem:[%s9145_s8 + $0x10] ss:$8 sm:$0x3] }
 0x991   : > { %v9068_v41 = vadd.f32 %v1760_v51, %v1608_v36  ;;  %v2040_v23 = vsub.f32 1.0, %v2038_v52  ;;  %vm1999_vm4 = vcmp.ge.f32.partialorder %v8808_v13, 0.0  ;;  %v2041_v63 = vsub.f32 1.0, %v2039_v2  ;;  %v2065_v2 = vpop.permute.xlu1 %2064 }
 0x992   : > { %v1869_v56 = vadd.f32 -0.28449672, %v1867_v54  ;;  %v1870_v18 = vmul.f32 %v9033_v35, %v1868_v30  ;;  %vm2152_vm6 = vcmp.ge.f32.partialorder %v8879_v33, 0.0  ;;  %v2194_v40 = vsub.f32 1.0, %v2192_v9 }
 0x993   : > { %v2000_v24 = vsel %vm1998_vm3, 1.0, %v9409_v10  ;;  %vm2153_vm7 = vcmp.ge.f32.partialorder %v8882_v5, 0.0  ;;  %v2195_v19 = vsub.f32 1.0, %v2193_v14  ;;  %v2001_v43 = vsel %vm1999_vm4, 1.0, %v9409_v10 }
 0x994   : > { %v1871_v62 = vmul.f32 %v9038_v3, %v1869_v56  ;;  %v1872_v39 = vadd.f32 0.2548296, %v1870_v18  ;;  %v2042_v37 = vmul.f32 %v2040_v23, %v2000_v24  ;;  %v2043_v13 = vmul.f32 %v2041_v63, %v2001_v43  ;;  %v1911_v18 = vpop.permute.xlu0 %1910 }
 0x995   : > { %v2154_v33 = vsel %vm2152_vm6, 1.0, %v9409_v10  ;;  %v2155_v5 = vsel %vm2153_vm7, 1.0, %v9409_v10  ;;  %vm1844_vm8 = vcmp.ge.f32.partialorder %v8971_v21, 0.0  ;;  %vm1845_vm9 = vcmp.ge.f32.partialorder %v8975_v49, 0.0 }
 0x996   : > { %v1873_v11 = vadd.f32 0.2548296, %v1871_v62  ;;  %v1874_v38 = vmul.f32 %v9033_v35, %v1872_v39  ;;  %v2196_v60 = vmul.f32 %v2194_v40, %v2154_v33  ;;  %v2197_v1 = vmul.f32 %v2195_v19, %v2155_v5 }
 0x997   : > { %v6573_v61 = vpop.eup %6572  ;;  %v2044_v4 = vadd.f32 1.0, %v2042_v37  ;;  %v2054_v48 = vrot.slane %v5520_v59, %v8551_v17  ;;  %v2058_v20 = vrot.slane %v5520_v59, %v8558_v53  ;;  %v1994_v42 = vmul.f32 0.5, %v8786_v15 }
 0x998   : > { %v1875_v57 = vmul.f32 %v9038_v3, %v1873_v11  ;;  %v6575_v31 = vpop.eup %6574  ;;  %v1884_v0 = vmul.f32 %v6573_v61, %v1874_v38  ;;  %v5516_v3 = vld [vmem:[%s9145_s8 + $0x6] ss:$8 sm:$0x3]  ;;  %v2045_v8 = vadd.f32 1.0, %v2043_v13  ;;  %v1846_v21 = vsel %vm1844_vm8, 1.0, %v9409_v10  ;;  %v2229_v33 = vpop.permute.xlu0 %2228 }
 0x999   : > { %v1995_v51 = vmul.f32 0.5, %v8797_v29  ;;  %v2198_v49 = vadd.f32 1.0, %v2196_v60  ;;  %v1847_v16 = vsel %vm1845_vm9, 1.0, %v9409_v10  ;;  %v2148_v27 = vmul.f32 0.5, %v8859_v28 }
 0x99a   : > { %v1885_v35 = vmul.f32 %v6575_v31, %v1875_v57  ;;  %v1886_v26 = vsub.f32 1.0, %v1884_v0  ;;  %v2149_v6 = vmul.f32 0.5, %v8863_v50  ;;  %v2199_v36 = vadd.f32 1.0, %v2197_v1 }
 0x99b   : > { %v2046_v58 = vmul.f32 %v2044_v4, %v1994_v42  ;;  %v1840_v52 = vmul.f32 0.5, %v8953_v55  ;;  %v1900_v29 = vrot.slane %v5516_v3, %v8551_v17  ;;  %v2047_v44 = vmul.f32 %v2045_v8, %v1995_v51 }
 0x99c   : > { %v1887_v25 = vsub.f32 1.0, %v1885_v35  ;;  %v1888_v7 = vmul.f32 %v1886_v26, %v1846_v21  ;;  %v1841_v54 = vmul.f32 0.5, %v8958_v46  ;;  %v1904_v28 = vrot.slane %v5516_v3, %v8558_v53  ;;  %v2219_v46 = vpop.permute.xlu1 %2218 }
 0x99d   : > { %v2200_v50 = vmul.f32 %v2198_v49, %v2148_v27  ;;  %v2208_v9 = vrot.slane %v5524_v45, %v8551_v17  ;;  %v2201_v14 = vmul.f32 %v2199_v36, %v2149_v6  ;;  %v2212_v56 = vrot.slane %v5524_v45, %v8558_v53 }
 0x99e   : > { %v1889_v15 = vmul.f32 %v1887_v25, %v1847_v16  ;;  %v1890_v12 = vadd.f32 1.0, %v1888_v7  ;;  %v2061_v55 = vmul.f32 %v2054_v48, %v2046_v58  ;;  %v2062_v62 = vmul.f32 %v2058_v20, %v2047_v44 }
 0x99f   : > { %v2215_v39 = vmul.f32 %v2208_v9, %v2200_v50  ;;  %v2216_v19 = vmul.f32 %v2212_v56, %v2201_v14  ;;  %vm3093_vm12 = vcmask 1041408  }
 0x9a0   : > { %v1891_v34 = vadd.f32 1.0, %v1889_v15  ;;  %v1892_v30 = vmul.f32 %v1890_v12, %v1840_v52  ;;  %v2067_v43 = vmul.f32 %v2065_v2, %v2061_v55  ;;  %v2068_v38 = vmul.f32 %v2065_v2, %v2062_v62 }
 0x9a1   : > { %v2221_v61 = vmul.f32 %v2219_v46, %v2215_v39  ;;  %v2222_v53 = vmul.f32 %v2219_v46, %v2216_v19 }
 0x9a2   : > { %v1893_v23 = vmul.f32 %v1891_v34, %v1841_v54  ;;  %v1907_v63 = vmul.f32 %v1900_v29, %v1892_v30 }
 0x9a4   : > { %v1908_v40 = vmul.f32 %v1904_v28, %v1893_v23  ;;  %v1913_v24 = vmul.f32 %v1911_v18, %v1907_v63 }
 0x9a6   : > { %v1914_v11 = vmul.f32 %v1911_v18, %v1908_v40  ;;  %v1915_v37 = vadd.f32 %v1913_v24, %v9065_v32 }
 0x9a8   : > { %v1916_v17 = vadd.f32 %v1914_v11, %v9068_v41  ;;  %v2069_v13 = vadd.f32 %v2067_v43, %v1915_v37 }
 0x9aa   : > { %v2070_v59 = vadd.f32 %v2068_v38, %v1916_v17  ;;  %v2223_v57 = vadd.f32 %v2221_v61, %v2069_v13 }
 0x9ac   : > { %v2224_v31 = vadd.f32 %v2222_v53, %v2070_v59  ;;  %v2231_v5 = vadd.f32 %v2229_v33, %v2223_v57  ;;  %v9414_v53 = vld [vmem:[#allocation26_spill] sm:$0xff] }
 0x9ae   : > { %v2232_v60 = vadd.f32 %v2229_v33, %v2224_v31  ;;  %v2235_v0 = vmul.f32 0.70710677, %v2231_v5  ;;  %v2233_v24 = vmul.f32 0.5, %v2231_v5  ;;  %v9415_v33 = vld [vmem:[#allocation27_spill] sm:$0xff]  ;;  %v9416_v5 = vld [vmem:[#allocation6_spill] sm:$0xff] }
 0x9b0   : > { %v2236_v1 = vmul.f32 0.70710677, %v2232_v60  ;;  %v2241_v35 = vand.u32 2147483647, %v2235_v0  ;;  %vm2237_vm10 = vcmp.ge.f32.partialorder %v2235_v0, 0.0  ;;  %v2234_v46 = vmul.f32 0.5, %v2232_v60 }
 0x9b1   : > { %v2239_v55 = vsel %vm2237_vm10, 1.0, %v9409_v10  ;;  %v9417_v0 = vld [vmem:[#allocation7_spill] sm:$0xff] }
 0x9b2   : > { %v2242_v4 = vand.u32 2147483647, %v2236_v1  ;;  %v2243_v48 = vmul.f32 0.3275911, %v2241_v35  ;;  %v2269_v41 = vsub.f32 0.0, %v2241_v35  ;;  %vm2238_vm11 = vcmp.ge.f32.partialorder %v2236_v1, 0.0 }
 0x9b3   : > { %v2240_v62 = vsel %vm2238_vm11, 1.0, %v9409_v10 }
 0x9b4   : > { %v2244_v20 = vmul.f32 0.3275911, %v2242_v4  ;;  %v2245_v26 = vadd.f32 1.0, %v2243_v48  ;;  %v2270_v3 = vsub.f32 0.0, %v2242_v4  ;;  %v2271_v8 = vmul.f32 %v2269_v41, %v2241_v35  ;;  %v9418_v48 = vld [vmem:[#allocation28_spill] sm:$0xff]  ;;  %v5292_v41 = vld [vmem:[%s9156_s19] sm:$0xff] }
 0x9b6   : > { %v2246_v32 = vadd.f32 1.0, %v2244_v20  ;;  %6576 = vrcp.f32 %v2245_v26  ;;  %v2272_v51 = vmul.f32 %v2270_v3, %v2242_v4  ;;  %v2273_v27 = vmul.f32 1.442695, %v2271_v8  ;;  %v9419_v26 = vld [vmem:[#allocation31_spill] sm:$0xff]  ;;  %v6584_v8 = vld [vmem:[%s7049_s25] sm:$0xff] }
 0x9b8   : > { %6578 = vrcp.f32 %v2246_v32  ;;  %v2275_v36 = vmul.f32 1.442695, %v2272_v51  ;;  %v6585_v51 = vld [vmem:[%s7049_s25 + $0x8] sm:$0xff] }
 0x9b9   : > { %6580 = vpow2.f32 %v2273_v27 }
 0x9ba   : > { %6582 = vpow2.f32 %v2275_v36 }
 0x9c0   : > { %v6577_v42 = vpop.eup %6576 }
 0x9c1   : > { %v2251_v25 = vmul.f32 1.0614054, %v6577_v42 }
 0x9c2   : > { %v6579_v21 = vpop.eup %6578 }
 0x9c3   : > { %v2252_v49 = vmul.f32 1.0614054, %v6579_v21  ;;  %v2253_v16 = vadd.f32 -1.4531521, %v2251_v25  ;;  %v6581_v9 = vpop.eup %6580 }
 0x9c4   : > { %v6583_v14 = vpop.eup %6582 }
 0x9c5   : > { %v2254_v7 = vadd.f32 -1.4531521, %v2252_v49  ;;  %v2255_v6 = vmul.f32 %v6577_v42, %v2253_v16 }
 0x9c7   : > { %v2256_v45 = vmul.f32 %v6579_v21, %v2254_v7  ;;  %v2257_v15 = vadd.f32 1.4214138, %v2255_v6 }
 0x9c9   : > { %v2258_v58 = vadd.f32 1.4214138, %v2256_v45  ;;  %v2259_v52 = vmul.f32 %v6577_v42, %v2257_v15 }
 0x9cb   : > { %v2260_v12 = vmul.f32 %v6579_v21, %v2258_v58  ;;  %v2261_v29 = vadd.f32 -0.28449672, %v2259_v52 }
 0x9cd   : > { %v2262_v44 = vadd.f32 -0.28449672, %v2260_v12  ;;  %v2263_v2 = vmul.f32 %v6577_v42, %v2261_v29 }
 0x9cf   : > { %v2264_v54 = vmul.f32 %v6579_v21, %v2262_v44  ;;  %v2265_v34 = vadd.f32 0.2548296, %v2263_v2 }
 0x9d1   : > { %v2266_v28 = vadd.f32 0.2548296, %v2264_v54  ;;  %v2267_v50 = vmul.f32 %v6577_v42, %v2265_v34 }
 0x9d3   : > { %v2268_v30 = vmul.f32 %v6579_v21, %v2266_v28  ;;  %v2277_v56 = vmul.f32 %v6581_v9, %v2267_v50 }
 0x9d5   : > { %v2278_v23 = vmul.f32 %v6583_v14, %v2268_v30  ;;  %v2279_v18 = vsub.f32 1.0, %v2277_v56 }
 0x9d7   : > { %v2280_v63 = vsub.f32 1.0, %v2278_v23  ;;  %v2281_v40 = vmul.f32 %v2279_v18, %v2239_v55 }
 0x9d9   : > { %v2282_v39 = vmul.f32 %v2280_v63, %v2240_v62  ;;  %v2283_v19 = vadd.f32 1.0, %v2281_v40 }
 0x9db   : > { %v2284_v11 = vadd.f32 1.0, %v2282_v39  ;;  %v2285_v43 = vmul.f32 %v2283_v19, %v2233_v24 }
 0x9dd   : > { %v2286_v37 = vmul.f32 %v2284_v11, %v2234_v46  ;;  %v3089_v38 = vrot.slane %v2285_v43, 6 }
 0x9df   : > { %v3090_v17 = vrot.slane %v2286_v37, 6  ;;  %v3094_v61 = vsel %vm3093_vm12, %v8919_v47, %v3089_v38 }
 0x9e0   : > { %v3096_v59 = vmul.f32 %v3094_v61, %v9414_v53 }
 0x9e1   : > { %v3095_v13 = vsel %vm3093_vm12, %v8921_v22, %v3090_v17 }
 0x9e2   : > { %v3097_v10 = vmul.f32 %v3095_v13, %v9415_v33  ;;  %v5387_v57 = vrot.slane %v3096_v59, 4 }
 0x9e4   : > { %v5388_v31 = vrot.slane %v3097_v10, 4  ;;  %v5391_v60 = vsel %vm749_vm0, %v9416_v5, %v5387_v57 }
 0x9e5   : > { %5393 = vst [vmem:[%s723_s23] sm:$0xff] %v5391_v60 }
 0x9e6   : > { %v5392_v47 = vsel %vm749_vm0, %v9417_v0, %v5388_v31 }
 0x9e7   : > { %5394 = vst [vmem:[%s723_s23 + $0x8] sm:$0xff] %v5392_v47 }
 0x9f8   : > { %v5373_v3 = vpop.permute.xlu1 %5372 }
 0x9fc   : > { %v5381_v7 = vpop.permute.xlu1 %5380 }
 0x9fe   : > { %v5279_v22 = vpop.f32.mrb[90].mxu0 }
 0x9ff   : > { %v5286_v1 = vrot.slane %v5279_v22, 4  ;;  %v5281_v35 = vpop.f32.mrb[91].mxu0 }
 0xa00   : > { %v5287_v4 = vrot.slane %v5281_v35, 4 }
 0xa01   : > { %v5290_v20 = vsel %vm749_vm0, %v9418_v48, %v5286_v1 }
 0xa02   : > { %v5291_v32 = vsel %vm749_vm0, %v9419_v26, %v5287_v4 }
 0xa03   : > { %5296 = vmatprep.subr.mxu0 %v5291_v32 }
 0xa04   : > { %5297 = vmatpush1.msra.mxu0 %v5290_v20 }
 0xa05   : > { %5606 = vmatmul.mubr.msk.f32.vlgmr.msra.gmra.mrb[92].mxu0 %vm3103_vm5, %v5292_v41 }
 0xad8   : > { %v5362_v42 = vpop.f32.mrb[92].mxu0 }
 0xad9   : > { %v5368_v21 = vadd.f32 %v6584_v8, %v5362_v42  ;;  %v5364_v25 = vpop.f32.mrb[93].mxu0 }
 0xada   : > { %v5369_v49 = vadd.f32 %v6585_v51, %v5364_v25 }
 0xadb   : > { %v5375_v16 = vmul.f32 %v5373_v3, %v5368_v21 }
 0xadc   : > { %v5376_v27 = vmul.f32 %v5373_v3, %v5369_v49 }
 0xadd   : > { %v5383_v6 = vadd.f32 %v5381_v7, %v5375_v16 }
 0xade   : > { %v5384_v36 = vadd.f32 %v5381_v7, %v5376_v27 }
 0xadf   : > { %5395 = vst [vmem:[%s723_s23 + $0x10] sm:$0xff] %v5383_v6 }
 0xae0   : > { %5396 = vst [vmem:[%s723_s23 + $0x18] sm:$0xff] %v5384_v36 }
 0xae1 PF: > { %s32_s3 = sadd.s32 1, %s6592_s3  }
 0xae2   : > { %p29_p4 = scmp.ge.s32.totalorder %s32_s3, 4  }
 0xae4   :  { %31 = sbr.rel (!%p29_p4) target bundleno = 8 (0x8), region = 152 }

</bundles_post_ra>
